<compile_context>
chip_gen: v7x
topology: tpu7x:2x2x1
jax: 0.10.0
libtpu: 0.0.40
codegen_flags: <defaults>
</compile_context>

<pallas_src>
import jax
import jax.numpy as jnp
from jax.experimental import pallas as pl
from jax.experimental.pallas import tpu as pltpu

NEG_SLOPE = 0.01  # PyTorch nn.LeakyReLU default negative_slope


def _leaky_relu(x):
    return jnp.where(x > 0, x, NEG_SLOPE * x)


# ---------------------------------------------------------------------------
# Fused kernel: one grid step == one batch element.
#   x_ref   : (1, H, W, Cin)      bf16
#   few_ref : (9*Cin, Cout)       bf16   FE weights, row = (kh*3+kw)*Cin + ci
#   feb_ref : (1, Cout)           f32
#   fir_ref : (25, Cout)          f32    per-channel 5x5 taps, row = kh*5 + kw
#   dsw_ref : (9*Cout, Cout)      bf16   DS weights, row = (kh*3+kw)*Cout + ci
#   dsb_ref : (1, Cout)           f32
#   o_ref   : (1, Ho, Wo, Cout)   f32
# scratch (VMEM, per core):
#   xpad_ref  : (H+2,  W+2,  Cin)   f32   replicate-padded input
#   colfe_ref : (H*W,  9*Cin)       bf16  im2col LHS for FE matmul
#   fepad_ref : (H+4,  W+4,  Cout)  f32   replicate-padded FE output
#   lppad_ref : (Ho+2, Wo+2, Cout)  f32   zero-padded low-pass output
#   colds_ref : (Ho*Wo, 9*Cout)     bf16  im2col LHS for DS matmul
# ---------------------------------------------------------------------------
def up_propagate_kernel(
    x_ref, few_ref, feb_ref, fir_ref, dsw_ref, dsb_ref, o_ref,
    xpad_ref, colfe_ref, fepad_ref, lppad_ref, colds_ref,
):
    _, H, W, Cin = x_ref.shape
    _, Ho, Wo, Cout = o_ref.shape

    # ---- stage 0: replicate-pad(1) the input entirely inside VMEM ----
    x = x_ref[0].astype(jnp.float32)                        # (H, W, Cin)
    xpad_ref[1:H + 1, 1:W + 1, :] = x
    xpad_ref[0:1, 1:W + 1, :] = x[0:1]
    xpad_ref[H + 1:H + 2, 1:W + 1, :] = x[H - 1:H]
    xl = xpad_ref[:, 1:2, :]
    xr = xpad_ref[:, W:W + 1, :]
    xpad_ref[:, 0:1, :] = xl
    xpad_ref[:, W + 1:W + 2, :] = xr

    # ---- stage 1: FE 3x3 conv as a single im2col matmul (bf16 MXU, f32 acc) ----
    for k in range(9):
        kh, kw = divmod(k, 3)
        patch = xpad_ref[kh:kh + H, kw:kw + W, :]            # (H, W, Cin)
        colfe_ref[:, k * Cin:(k + 1) * Cin] = (
            patch.reshape(H * W, Cin).astype(jnp.bfloat16))
    fe = jnp.dot(colfe_ref[...], few_ref[...],
                 preferred_element_type=jnp.float32)         # (H*W, Cout) K=9*Cin
    fe = _leaky_relu(fe + feb_ref[...])
    fe = fe.reshape(H, W, Cout)

    # ---- stage 2: replicate-pad(2) the FE output into VMEM scratch ----
    fepad_ref[2:H + 2, 2:W + 2, :] = fe
    top = fe[0:1]
    bot = fe[H - 1:H]
    fepad_ref[0:1, 2:W + 2, :] = top
    fepad_ref[1:2, 2:W + 2, :] = top
    fepad_ref[H + 2:H + 3, 2:W + 2, :] = bot
    fepad_ref[H + 3:H + 4, 2:W + 2, :] = bot
    lcol = fepad_ref[:, 2:3, :]
    rcol = fepad_ref[:, W + 1:W + 2, :]
    fepad_ref[:, 0:1, :] = lcol
    fepad_ref[:, 1:2, :] = lcol
    fepad_ref[:, W + 2:W + 3, :] = rcol
    fepad_ref[:, W + 3:W + 4, :] = rcol

    # ---- stage 3: adaptive per-channel 5x5 depthwise low-pass, stride 2 ----
    # Filter is loaded once (hoisted).  Stride-2 tap selection is done in VMEM
    # with strided pl.ds slices (4 polyphase views); each tap is then a static
    # contiguous value slice.  No HBM polyphase arrays.
    fir = fir_ref[...]                                       # (25, Cout)
    ph = [[fepad_ref[pl.ds(p, Ho + 2, stride=2),
                     pl.ds(q, Wo + 2, stride=2), :]
           for q in (0, 1)] for p in (0, 1)]                 # each (Ho+2, Wo+2, Cout)
    acc = jnp.zeros((Ho, Wo, Cout), jnp.float32)
    for k in range(25):
        kh, kw = divmod(k, 5)
        src = ph[kh % 2][kw % 2]
        patch = src[kh // 2:kh // 2 + Ho, kw // 2:kw // 2 + Wo, :]
        acc = acc + patch * fir[k].reshape(1, 1, Cout)
    lp = acc                                                 # (Ho, Wo, Cout)

    # ---- stage 4: zero-pad(1) + DS 3x3 conv (im2col matmul) + LeakyReLU ----
    lppad_ref[...] = jnp.zeros_like(lppad_ref)
    lppad_ref[1:Ho + 1, 1:Wo + 1, :] = lp
    for k in range(9):
        kh, kw = divmod(k, 3)
        patch = lppad_ref[kh:kh + Ho, kw:kw + Wo, :]         # (Ho, Wo, Cout)
        colds_ref[:, k * Cout:(k + 1) * Cout] = (
            patch.reshape(Ho * Wo, Cout).astype(jnp.bfloat16))
    out = jnp.dot(colds_ref[...], dsw_ref[...],
                  preferred_element_type=jnp.float32)        # (Ho*Wo, Cout) K=9*Cout
    out = _leaky_relu(out + dsb_ref[...])
    o_ref[...] = out.reshape(1, Ho, Wo, Cout)


# ---------------------------------------------------------------------------
# firwin (lowpass, hamming window, unit DC gain): 25-tap 1-D filter per channel,
# reshaped row-major into 5x5 inside the kernel ordering (k = kh*5 + kw), matching
# the PyTorch reference's firwin(numtabs**2, cutoff).reshape(C, 1, 5, 5).
# Tiny parameter transform -> plain JAX (not a kernel).
# ---------------------------------------------------------------------------
def firwin_lowpass_hamming(numtaps, cutoff):
    n = jnp.arange(numtaps, dtype=jnp.float32)
    m = n - (numtaps - 1) / 2.0
    win = 0.54 - 0.46 * jnp.cos(2.0 * jnp.pi * n / (numtaps - 1))
    h = cutoff[:, None] * jnp.sinc(cutoff[:, None] * m[None, :]) * win[None, :]
    h = h / jnp.sum(h, axis=1, keepdims=True)                # unit gain at DC
    return h                                                 # (C, numtaps)


# ---------------------------------------------------------------------------
# Forward pass (matches UpPropagate.forward).  FE uses pad_mode='replicate',
# design_filter uses replicate padding, DS uses the default zero pad.
# ---------------------------------------------------------------------------
def up_propagate_forward(x_nchw, params):
    # NCHW -> NHWC transpose is required anyway; fold the bf16 cast into it.
    x = jnp.transpose(x_nchw, (0, 2, 3, 1)).astype(jnp.bfloat16)
    N, H, W, Cin = x.shape
    Cout = params["fe_w"].shape[-1]
    Ho = (H + 4 - 5) // 2 + 1
    Wo = (W + 4 - 5) // 2 + 1

    fe_w = params["fe_w"].reshape(9 * Cin, Cout).astype(jnp.bfloat16)
    ds_w = params["ds_w"].reshape(9 * Cout, Cout).astype(jnp.bfloat16)
    fe_b = params["fe_b"].reshape(1, Cout).astype(jnp.float32)
    ds_b = params["ds_b"].reshape(1, Cout).astype(jnp.float32)

    # cutoff -> LeakyReLU -> sigmoid -> per-channel 25-tap firwin (5x5 row-major)
    c = jax.nn.sigmoid(_leaky_relu(params["cutoff"][:, 0]))
    fir = jnp.transpose(firwin_lowpass_hamming(25, c), (1, 0)).astype(jnp.float32)

    # TODO(synk): add row-block tiling (grid over H with halo index_maps) for
    # production spatial sizes where a full per-batch image no longer fits VMEM.
    out = pl.pallas_call(
        up_propagate_kernel,
        out_shape=jax.ShapeDtypeStruct((N, Ho, Wo, Cout), jnp.float32),
        grid=(N,),
        in_specs=[
            pl.BlockSpec((1, H, W, Cin), lambda n: (n, 0, 0, 0)),
            pl.BlockSpec((9 * Cin, Cout), lambda n: (0, 0)),
            pl.BlockSpec((1, Cout), lambda n: (0, 0)),
            pl.BlockSpec((25, Cout), lambda n: (0, 0)),
            pl.BlockSpec((9 * Cout, Cout), lambda n: (0, 0)),
            pl.BlockSpec((1, Cout), lambda n: (0, 0)),
        ],
        out_specs=pl.BlockSpec((1, Ho, Wo, Cout), lambda n: (n, 0, 0, 0)),
        scratch_shapes=[
            pltpu.VMEM((H + 2, W + 2, Cin), jnp.float32),
            pltpu.VMEM((H * W, 9 * Cin), jnp.bfloat16),
            pltpu.VMEM((H + 4, W + 4, Cout), jnp.float32),
            pltpu.VMEM((Ho + 2, Wo + 2, Cout), jnp.float32),
            pltpu.VMEM((Ho * Wo, 9 * Cout), jnp.bfloat16),
        ],
        compiler_params=pltpu.CompilerParams(
            dimension_semantics=("parallel",),
            vmem_limit_bytes=32 * 1024 * 1024,
        ),
    )(x, fe_w, fe_b, fir, ds_w, ds_b)

    return jnp.transpose(out, (0, 3, 1, 2))                  # back to NCHW


if __name__ == "__main__":
    key = jax.random.PRNGKey(0)
    k1, k2, k3, k4, kx = jax.random.split(key, 5)

    in_channel, out_channel = 4, 8
    N, H, W = 2, 16, 16

    # Deterministic synthetic parameters (shapes from UpPropagate.__init__;
    # conv weights stored as (kh, kw, Cin, Cout) for the NHWC kernels).
    params = {
        "fe_w": 0.1 * jax.random.normal(k1, (3, 3, in_channel, out_channel), jnp.float32),
        "fe_b": 0.1 * jax.random.normal(k2, (1, out_channel), jnp.float32),
        "ds_w": 0.1 * jax.random.normal(k3, (3, 3, out_channel, out_channel), jnp.float32),
        "ds_b": 0.1 * jax.random.normal(k4, (1, out_channel), jnp.float32),
        "cutoff": jnp.ones((out_channel, 1), jnp.float32) * 2.0,   # as in __init__
    }

    x = jax.random.normal(kx, (N, in_channel, H, W), jnp.float32)

    out = jax.jit(up_propagate_forward)(x, params)
    out = jax.block_until_ready(out)
    assert out.shape == (N, out_channel, H // 2, W // 2), out.shape
    assert bool(jnp.all(jnp.isfinite(out)))
    print("KERNEL_OK")
</pallas_src>

<mosaic_0001>
module attributes {stable_mosaic.version = 11 : i64} {
  func.func @up_propagate_kernel(%arg0: i32, %arg1: memref<1x16x16x4xbf16, #tpu.memory_space<vmem>>, %arg2: memref<36x8xbf16, #tpu.memory_space<vmem>>, %arg3: memref<1x8xf32, #tpu.memory_space<vmem>>, %arg4: memref<25x8xf32, #tpu.memory_space<vmem>>, %arg5: memref<72x8xbf16, #tpu.memory_space<vmem>>, %arg6: memref<1x8xf32, #tpu.memory_space<vmem>>, %arg7: memref<1x8x8x8xf32, #tpu.memory_space<vmem>>, %arg8: memref<18x18x4xf32, #tpu.memory_space<vmem>>, %arg9: memref<256x36xbf16, #tpu.memory_space<vmem>>, %arg10: memref<20x20x8xf32, #tpu.memory_space<vmem>>, %arg11: memref<10x10x8xf32, #tpu.memory_space<vmem>>, %arg12: memref<64x72xbf16, #tpu.memory_space<vmem>>) attributes {dimension_semantics = [#tpu.dimension_semantics<parallel>], iteration_bounds = array<i64: 2>, scalar_prefetch = 0 : i64, scratch_operands = 5 : i64, tpu.core_type = #tpu.core_type<tc>, window_params = [{transform_indices = @transform_0, window_bounds = array<i64: 1, 16, 16, 4>}, {pipeline_mode = #tpu.pipeline_mode<synchronous>, transform_indices = @transform_1, window_bounds = array<i64: 36, 8>}, {pipeline_mode = #tpu.pipeline_mode<synchronous>, transform_indices = @transform_2, window_bounds = array<i64: 1, 8>}, {pipeline_mode = #tpu.pipeline_mode<synchronous>, transform_indices = @transform_3, window_bounds = array<i64: 25, 8>}, {pipeline_mode = #tpu.pipeline_mode<synchronous>, transform_indices = @transform_4, window_bounds = array<i64: 72, 8>}, {pipeline_mode = #tpu.pipeline_mode<synchronous>, transform_indices = @transform_5, window_bounds = array<i64: 1, 8>}, {transform_indices = @transform_6, window_bounds = array<i64: 1, 8, 8, 8>}]} {
    %c0 = arith.constant 0 : index
    %c0_0 = arith.constant 0 : index
    %c0_1 = arith.constant 0 : index
    %c0_2 = arith.constant 0 : index
    %0 = vector.load %arg1[%c0, %c0_0, %c0_1, %c0_2] : memref<1x16x16x4xbf16, #tpu.memory_space<vmem>>, vector<1x16x16x4xbf16>
    %1 = vector.shape_cast %0 : vector<1x16x16x4xbf16> to vector<16x16x4xbf16>
    %2 = arith.extf %1 : vector<16x16x4xbf16> to vector<16x16x4xf32>
    %c1 = arith.constant 1 : index
    %c1_3 = arith.constant 1 : index
    %c0_4 = arith.constant 0 : index
    %3 = vector.load %arg8[%c1, %c1_3, %c0_4] : memref<18x18x4xf32, #tpu.memory_space<vmem>>, vector<16x16x4xf32>
    tpu.vector_store %arg8[%c1, %c1_3, %c0_4], %2 {strides = array<i32>} : memref<18x18x4xf32, #tpu.memory_space<vmem>>, vector<16x16x4xf32>,
    %4 = vector.extract_strided_slice %2 {offsets = [0, 0, 0], sizes = [1, 16, 4], strides = [1, 1, 1]} : vector<16x16x4xf32> to vector<1x16x4xf32>
    %c0_5 = arith.constant 0 : index
    %c1_6 = arith.constant 1 : index
    %c0_7 = arith.constant 0 : index
    %5 = vector.load %arg8[%c0_5, %c1_6, %c0_7] : memref<18x18x4xf32, #tpu.memory_space<vmem>>, vector<1x16x4xf32>
    tpu.vector_store %arg8[%c0_5, %c1_6, %c0_7], %4 {strides = array<i32>} : memref<18x18x4xf32, #tpu.memory_space<vmem>>, vector<1x16x4xf32>,
    %6 = vector.extract_strided_slice %2 {offsets = [15, 0, 0], sizes = [1, 16, 4], strides = [1, 1, 1]} : vector<16x16x4xf32> to vector<1x16x4xf32>
    %c17 = arith.constant 17 : index
    %c1_8 = arith.constant 1 : index
    %c0_9 = arith.constant 0 : index
    %7 = vector.load %arg8[%c17, %c1_8, %c0_9] : memref<18x18x4xf32, #tpu.memory_space<vmem>>, vector<1x16x4xf32>
    tpu.vector_store %arg8[%c17, %c1_8, %c0_9], %6 {strides = array<i32>} : memref<18x18x4xf32, #tpu.memory_space<vmem>>, vector<1x16x4xf32>,
    %c0_10 = arith.constant 0 : index
    %c1_11 = arith.constant 1 : index
    %c0_12 = arith.constant 0 : index
    %8 = vector.load %arg8[%c0_10, %c1_11, %c0_12] : memref<18x18x4xf32, #tpu.memory_space<vmem>>, vector<18x1x4xf32>
    %c0_13 = arith.constant 0 : index
    %c16 = arith.constant 16 : index
    %c0_14 = arith.constant 0 : index
    %9 = vector.load %arg8[%c0_13, %c16, %c0_14] : memref<18x18x4xf32, #tpu.memory_space<vmem>>, vector<18x1x4xf32>
    %c0_15 = arith.constant 0 : index
    %c0_16 = arith.constant 0 : index
    %c0_17 = arith.constant 0 : index
    %10 = vector.load %arg8[%c0_15, %c0_16, %c0_17] : memref<18x18x4xf32, #tpu.memory_space<vmem>>, vector<18x1x4xf32>
    tpu.vector_store %arg8[%c0_15, %c0_16, %c0_17], %8 {strides = array<i32>} : memref<18x18x4xf32, #tpu.memory_space<vmem>>, vector<18x1x4xf32>,
    %c0_18 = arith.constant 0 : index
    %c17_19 = arith.constant 17 : index
    %c0_20 = arith.constant 0 : index
    %11 = vector.load %arg8[%c0_18, %c17_19, %c0_20] : memref<18x18x4xf32, #tpu.memory_space<vmem>>, vector<18x1x4xf32>
    tpu.vector_store %arg8[%c0_18, %c17_19, %c0_20], %9 {strides = array<i32>} : memref<18x18x4xf32, #tpu.memory_space<vmem>>, vector<18x1x4xf32>,
    %c0_21 = arith.constant 0 : index
    %c0_22 = arith.constant 0 : index
    %c0_23 = arith.constant 0 : index
    %12 = vector.load %arg8[%c0_21, %c0_22, %c0_23] : memref<18x18x4xf32, #tpu.memory_space<vmem>>, vector<16x16x4xf32>
    %13 = vector.shape_cast %12 : vector<16x16x4xf32> to vector<256x4xf32>
    %14 = arith.truncf %13 : vector<256x4xf32> to vector<256x4xbf16>
    %c0_24 = arith.constant 0 : index
    %c0_25 = arith.constant 0 : index
    %15 = vector.load %arg9[%c0_24, %c0_25] : memref<256x36xbf16, #tpu.memory_space<vmem>>, vector<256x4xbf16>
    tpu.vector_store %arg9[%c0_24, %c0_25], %14 {strides = array<i32>} : memref<256x36xbf16, #tpu.memory_space<vmem>>, vector<256x4xbf16>,
    %c0_26 = arith.constant 0 : index
    %c1_27 = arith.constant 1 : index
    %c0_28 = arith.constant 0 : index
    %16 = vector.load %arg8[%c0_26, %c1_27, %c0_28] : memref<18x18x4xf32, #tpu.memory_space<vmem>>, vector<16x16x4xf32>
    %17 = vector.shape_cast %16 : vector<16x16x4xf32> to vector<256x4xf32>
    %18 = arith.truncf %17 : vector<256x4xf32> to vector<256x4xbf16>
    %c0_29 = arith.constant 0 : index
    %c4 = arith.constant 4 : index
    %19 = vector.load %arg9[%c0_29, %c4] : memref<256x36xbf16, #tpu.memory_space<vmem>>, vector<256x4xbf16>
    tpu.vector_store %arg9[%c0_29, %c4], %18 {strides = array<i32>} : memref<256x36xbf16, #tpu.memory_space<vmem>>, vector<256x4xbf16>,
    %c0_30 = arith.constant 0 : index
    %c2 = arith.constant 2 : index
    %c0_31 = arith.constant 0 : index
    %20 = vector.load %arg8[%c0_30, %c2, %c0_31] : memref<18x18x4xf32, #tpu.memory_space<vmem>>, vector<16x16x4xf32>
    %21 = vector.shape_cast %20 : vector<16x16x4xf32> to vector<256x4xf32>
    %22 = arith.truncf %21 : vector<256x4xf32> to vector<256x4xbf16>
    %c0_32 = arith.constant 0 : index
    %c8 = arith.constant 8 : index
    %23 = vector.load %arg9[%c0_32, %c8] : memref<256x36xbf16, #tpu.memory_space<vmem>>, vector<256x4xbf16>
    tpu.vector_store %arg9[%c0_32, %c8], %22 {strides = array<i32>} : memref<256x36xbf16, #tpu.memory_space<vmem>>, vector<256x4xbf16>,
    %c1_33 = arith.constant 1 : index
    %c0_34 = arith.constant 0 : index
    %c0_35 = arith.constant 0 : index
    %24 = vector.load %arg8[%c1_33, %c0_34, %c0_35] : memref<18x18x4xf32, #tpu.memory_space<vmem>>, vector<16x16x4xf32>
    %25 = vector.shape_cast %24 : vector<16x16x4xf32> to vector<256x4xf32>
    %26 = arith.truncf %25 : vector<256x4xf32> to vector<256x4xbf16>
    %c0_36 = arith.constant 0 : index
    %c12 = arith.constant 12 : index
    %27 = vector.load %arg9[%c0_36, %c12] : memref<256x36xbf16, #tpu.memory_space<vmem>>, vector<256x4xbf16>
    tpu.vector_store %arg9[%c0_36, %c12], %26 {strides = array<i32>} : memref<256x36xbf16, #tpu.memory_space<vmem>>, vector<256x4xbf16>,
    %c1_37 = arith.constant 1 : index
    %c1_38 = arith.constant 1 : index
    %c0_39 = arith.constant 0 : index
    %28 = vector.load %arg8[%c1_37, %c1_38, %c0_39] : memref<18x18x4xf32, #tpu.memory_space<vmem>>, vector<16x16x4xf32>
    %29 = vector.shape_cast %28 : vector<16x16x4xf32> to vector<256x4xf32>
    %30 = arith.truncf %29 : vector<256x4xf32> to vector<256x4xbf16>
    %c0_40 = arith.constant 0 : index
    %c16_41 = arith.constant 16 : index
    %31 = vector.load %arg9[%c0_40, %c16_41] : memref<256x36xbf16, #tpu.memory_space<vmem>>, vector<256x4xbf16>
    tpu.vector_store %arg9[%c0_40, %c16_41], %30 {strides = array<i32>} : memref<256x36xbf16, #tpu.memory_space<vmem>>, vector<256x4xbf16>,
    %c1_42 = arith.constant 1 : index
    %c2_43 = arith.constant 2 : index
    %c0_44 = arith.constant 0 : index
    %32 = vector.load %arg8[%c1_42, %c2_43, %c0_44] : memref<18x18x4xf32, #tpu.memory_space<vmem>>, vector<16x16x4xf32>
    %33 = vector.shape_cast %32 : vector<16x16x4xf32> to vector<256x4xf32>
    %34 = arith.truncf %33 : vector<256x4xf32> to vector<256x4xbf16>
    %c0_45 = arith.constant 0 : index
    %c20 = arith.constant 20 : index
    %35 = vector.load %arg9[%c0_45, %c20] : memref<256x36xbf16, #tpu.memory_space<vmem>>, vector<256x4xbf16>
    tpu.vector_store %arg9[%c0_45, %c20], %34 {strides = array<i32>} : memref<256x36xbf16, #tpu.memory_space<vmem>>, vector<256x4xbf16>,
    %c2_46 = arith.constant 2 : index
    %c0_47 = arith.constant 0 : index
    %c0_48 = arith.constant 0 : index
    %36 = vector.load %arg8[%c2_46, %c0_47, %c0_48] : memref<18x18x4xf32, #tpu.memory_space<vmem>>, vector<16x16x4xf32>
    %37 = vector.shape_cast %36 : vector<16x16x4xf32> to vector<256x4xf32>
    %38 = arith.truncf %37 : vector<256x4xf32> to vector<256x4xbf16>
    %c0_49 = arith.constant 0 : index
    %c24 = arith.constant 24 : index
    %39 = vector.load %arg9[%c0_49, %c24] : memref<256x36xbf16, #tpu.memory_space<vmem>>, vector<256x4xbf16>
    tpu.vector_store %arg9[%c0_49, %c24], %38 {strides = array<i32>} : memref<256x36xbf16, #tpu.memory_space<vmem>>, vector<256x4xbf16>,
    %c2_50 = arith.constant 2 : index
    %c1_51 = arith.constant 1 : index
    %c0_52 = arith.constant 0 : index
    %40 = vector.load %arg8[%c2_50, %c1_51, %c0_52] : memref<18x18x4xf32, #tpu.memory_space<vmem>>, vector<16x16x4xf32>
    %41 = vector.shape_cast %40 : vector<16x16x4xf32> to vector<256x4xf32>
    %42 = arith.truncf %41 : vector<256x4xf32> to vector<256x4xbf16>
    %c0_53 = arith.constant 0 : index
    %c28 = arith.constant 28 : index
    %43 = vector.load %arg9[%c0_53, %c28] : memref<256x36xbf16, #tpu.memory_space<vmem>>, vector<256x4xbf16>
    tpu.vector_store %arg9[%c0_53, %c28], %42 {strides = array<i32>} : memref<256x36xbf16, #tpu.memory_space<vmem>>, vector<256x4xbf16>,
    %c2_54 = arith.constant 2 : index
    %c2_55 = arith.constant 2 : index
    %c0_56 = arith.constant 0 : index
    %44 = vector.load %arg8[%c2_54, %c2_55, %c0_56] : memref<18x18x4xf32, #tpu.memory_space<vmem>>, vector<16x16x4xf32>
    %45 = vector.shape_cast %44 : vector<16x16x4xf32> to vector<256x4xf32>
    %46 = arith.truncf %45 : vector<256x4xf32> to vector<256x4xbf16>
    %c0_57 = arith.constant 0 : index
    %c32 = arith.constant 32 : index
    %47 = vector.load %arg9[%c0_57, %c32] : memref<256x36xbf16, #tpu.memory_space<vmem>>, vector<256x4xbf16>
    tpu.vector_store %arg9[%c0_57, %c32], %46 {strides = array<i32>} : memref<256x36xbf16, #tpu.memory_space<vmem>>, vector<256x4xbf16>,
    %c0_58 = arith.constant 0 : index
    %c0_59 = arith.constant 0 : index
    %48 = vector.load %arg9[%c0_58, %c0_59] : memref<256x36xbf16, #tpu.memory_space<vmem>>, vector<256x36xbf16>
    %c0_60 = arith.constant 0 : index
    %c0_61 = arith.constant 0 : index
    %49 = vector.load %arg2[%c0_60, %c0_61] : memref<36x8xbf16, #tpu.memory_space<vmem>>, vector<36x8xbf16>
    %cst = arith.constant dense<0.000000e+00> : vector<256x8xf32>
    %50 = tpu.matmul %48, %49, %cst {dimension_numbers = #tpu.dot_dimension_numbers<[1], [0], [0], [1], [0, 0, 1, 1], [], []>} : vector<256x36xbf16>, vector<36x8xbf16>, vector<256x8xf32> -> vector<256x8xf32>
    %c0_62 = arith.constant 0 : index
    %c0_63 = arith.constant 0 : index
    %51 = vector.load %arg3[%c0_62, %c0_63] : memref<1x8xf32, #tpu.memory_space<vmem>>, vector<1x8xf32>
    %52 = vector.broadcast %51 : vector<1x8xf32> to vector<256x8xf32>
    %53 = arith.addf %50, %52 : vector<256x8xf32>
    %cst_64 = arith.constant 0.000000e+00 : f32
    %54 = vector.broadcast %cst_64 : f32 to vector<256x8xf32>
    %55 = arith.cmpf ogt, %53, %54 : vector<256x8xf32>
    %cst_65 = arith.constant 0.00999999977 : f32
    %56 = vector.broadcast %cst_65 : f32 to vector<256x8xf32>
    %57 = arith.mulf %56, %53 : vector<256x8xf32>
    %58 = arith.select %55, %53, %57 : vector<256x8xi1>, vector<256x8xf32>
    %59 = vector.shape_cast %58 : vector<256x8xf32> to vector<16x16x8xf32>
    %c2_66 = arith.constant 2 : index
    %c2_67 = arith.constant 2 : index
    %c0_68 = arith.constant 0 : index
    %60 = vector.load %arg10[%c2_66, %c2_67, %c0_68] : memref<20x20x8xf32, #tpu.memory_space<vmem>>, vector<16x16x8xf32>
    tpu.vector_store %arg10[%c2_66, %c2_67, %c0_68], %59 {strides = array<i32>} : memref<20x20x8xf32, #tpu.memory_space<vmem>>, vector<16x16x8xf32>,
    %61 = vector.extract_strided_slice %59 {offsets = [0, 0, 0], sizes = [1, 16, 8], strides = [1, 1, 1]} : vector<16x16x8xf32> to vector<1x16x8xf32>
    %62 = vector.extract_strided_slice %59 {offsets = [15, 0, 0], sizes = [1, 16, 8], strides = [1, 1, 1]} : vector<16x16x8xf32> to vector<1x16x8xf32>
    %c0_69 = arith.constant 0 : index
    %c2_70 = arith.constant 2 : index
    %c0_71 = arith.constant 0 : index
    %63 = vector.load %arg10[%c0_69, %c2_70, %c0_71] : memref<20x20x8xf32, #tpu.memory_space<vmem>>, vector<1x16x8xf32>
    tpu.vector_store %arg10[%c0_69, %c2_70, %c0_71], %61 {strides = array<i32>} : memref<20x20x8xf32, #tpu.memory_space<vmem>>, vector<1x16x8xf32>,
    %c1_72 = arith.constant 1 : index
    %c2_73 = arith.constant 2 : index
    %c0_74 = arith.constant 0 : index
    %64 = vector.load %arg10[%c1_72, %c2_73, %c0_74] : memref<20x20x8xf32, #tpu.memory_space<vmem>>, vector<1x16x8xf32>
    tpu.vector_store %arg10[%c1_72, %c2_73, %c0_74], %61 {strides = array<i32>} : memref<20x20x8xf32, #tpu.memory_space<vmem>>, vector<1x16x8xf32>,
    %c18 = arith.constant 18 : index
    %c2_75 = arith.constant 2 : index
    %c0_76 = arith.constant 0 : index
    %65 = vector.load %arg10[%c18, %c2_75, %c0_76] : memref<20x20x8xf32, #tpu.memory_space<vmem>>, vector<1x16x8xf32>
    tpu.vector_store %arg10[%c18, %c2_75, %c0_76], %62 {strides = array<i32>} : memref<20x20x8xf32, #tpu.memory_space<vmem>>, vector<1x16x8xf32>,
    %c19 = arith.constant 19 : index
    %c2_77 = arith.constant 2 : index
    %c0_78 = arith.constant 0 : index
    %66 = vector.load %arg10[%c19, %c2_77, %c0_78] : memref<20x20x8xf32, #tpu.memory_space<vmem>>, vector<1x16x8xf32>
    tpu.vector_store %arg10[%c19, %c2_77, %c0_78], %62 {strides = array<i32>} : memref<20x20x8xf32, #tpu.memory_space<vmem>>, vector<1x16x8xf32>,
    %c0_79 = arith.constant 0 : index
    %c2_80 = arith.constant 2 : index
    %c0_81 = arith.constant 0 : index
    %67 = vector.load %arg10[%c0_79, %c2_80, %c0_81] : memref<20x20x8xf32, #tpu.memory_space<vmem>>, vector<20x1x8xf32>
    %c0_82 = arith.constant 0 : index
    %c17_83 = arith.constant 17 : index
    %c0_84 = arith.constant 0 : index
    %68 = vector.load %arg10[%c0_82, %c17_83, %c0_84] : memref<20x20x8xf32, #tpu.memory_space<vmem>>, vector<20x1x8xf32>
    %c0_85 = arith.constant 0 : index
    %c0_86 = arith.constant 0 : index
    %c0_87 = arith.constant 0 : index
    %69 = vector.load %arg10[%c0_85, %c0_86, %c0_87] : memref<20x20x8xf32, #tpu.memory_space<vmem>>, vector<20x1x8xf32>
    tpu.vector_store %arg10[%c0_85, %c0_86, %c0_87], %67 {strides = array<i32>} : memref<20x20x8xf32, #tpu.memory_space<vmem>>, vector<20x1x8xf32>,
    %c0_88 = arith.constant 0 : index
    %c1_89 = arith.constant 1 : index
    %c0_90 = arith.constant 0 : index
    %70 = vector.load %arg10[%c0_88, %c1_89, %c0_90] : memref<20x20x8xf32, #tpu.memory_space<vmem>>, vector<20x1x8xf32>
    tpu.vector_store %arg10[%c0_88, %c1_89, %c0_90], %67 {strides = array<i32>} : memref<20x20x8xf32, #tpu.memory_space<vmem>>, vector<20x1x8xf32>,
    %c0_91 = arith.constant 0 : index
    %c18_92 = arith.constant 18 : index
    %c0_93 = arith.constant 0 : index
    %71 = vector.load %arg10[%c0_91, %c18_92, %c0_93] : memref<20x20x8xf32, #tpu.memory_space<vmem>>, vector<20x1x8xf32>
    tpu.vector_store %arg10[%c0_91, %c18_92, %c0_93], %68 {strides = array<i32>} : memref<20x20x8xf32, #tpu.memory_space<vmem>>, vector<20x1x8xf32>,
    %c0_94 = arith.constant 0 : index
    %c19_95 = arith.constant 19 : index
    %c0_96 = arith.constant 0 : index
    %72 = vector.load %arg10[%c0_94, %c19_95, %c0_96] : memref<20x20x8xf32, #tpu.memory_space<vmem>>, vector<20x1x8xf32>
    tpu.vector_store %arg10[%c0_94, %c19_95, %c0_96], %68 {strides = array<i32>} : memref<20x20x8xf32, #tpu.memory_space<vmem>>, vector<20x1x8xf32>,
    %c0_97 = arith.constant 0 : index
    %c0_98 = arith.constant 0 : index
    %73 = vector.load %arg4[%c0_97, %c0_98] : memref<25x8xf32, #tpu.memory_space<vmem>>, vector<25x8xf32>
    %c0_99 = arith.constant 0 : index
    %c0_100 = arith.constant 0 : index
    %c0_101 = arith.constant 0 : index
    %74 = tpu.strided_load %arg10[%c0_99, %c0_100, %c0_101] {strides = array<i32: 2, 2, 1>} : memref<20x20x8xf32, #tpu.memory_space<vmem>>, vector<10x10x8xf32>
    %c0_102 = arith.constant 0 : index
    %c1_103 = arith.constant 1 : index
    %c0_104 = arith.constant 0 : index
    %75 = tpu.strided_load %arg10[%c0_102, %c1_103, %c0_104] {strides = array<i32: 2, 2, 1>} : memref<20x20x8xf32, #tpu.memory_space<vmem>>, vector<10x10x8xf32>
    %c1_105 = arith.constant 1 : index
    %c0_106 = arith.constant 0 : index
    %c0_107 = arith.constant 0 : index
    %76 = tpu.strided_load %arg10[%c1_105, %c0_106, %c0_107] {strides = array<i32: 2, 2, 1>} : memref<20x20x8xf32, #tpu.memory_space<vmem>>, vector<10x10x8xf32>
    %c1_108 = arith.constant 1 : index
    %c1_109 = arith.constant 1 : index
    %c0_110 = arith.constant 0 : index
    %77 = tpu.strided_load %arg10[%c1_108, %c1_109, %c0_110] {strides = array<i32: 2, 2, 1>} : memref<20x20x8xf32, #tpu.memory_space<vmem>>, vector<10x10x8xf32>
    %cst_111 = arith.constant 0.000000e+00 : f32
    %78 = vector.broadcast %cst_111 : f32 to vector<8x8x8xf32>
    %79 = vector.extract_strided_slice %74 {offsets = [0, 0, 0], sizes = [8, 8, 8], strides = [1, 1, 1]} : vector<10x10x8xf32> to vector<8x8x8xf32>
    %80 = vector.extract_strided_slice %73 {offsets = [0, 0], sizes = [1, 8], strides = [1, 1]} : vector<25x8xf32> to vector<1x8xf32>
    %81 = vector.shape_cast %80 : vector<1x8xf32> to vector<8xf32>
    %82 = vector.shape_cast %81 : vector<8xf32> to vector<1x1x8xf32>
    %83 = vector.broadcast %82 : vector<1x1x8xf32> to vector<8x8x8xf32>
    %84 = arith.mulf %79, %83 : vector<8x8x8xf32>
    %85 = arith.addf %78, %84 : vector<8x8x8xf32>
    %86 = vector.extract_strided_slice %75 {offsets = [0, 0, 0], sizes = [8, 8, 8], strides = [1, 1, 1]} : vector<10x10x8xf32> to vector<8x8x8xf32>
    %87 = vector.extract_strided_slice %73 {offsets = [1, 0], sizes = [1, 8], strides = [1, 1]} : vector<25x8xf32> to vector<1x8xf32>
    %88 = vector.shape_cast %87 : vector<1x8xf32> to vector<8xf32>
    %89 = vector.shape_cast %88 : vector<8xf32> to vector<1x1x8xf32>
    %90 = vector.broadcast %89 : vector<1x1x8xf32> to vector<8x8x8xf32>
    %91 = arith.mulf %86, %90 : vector<8x8x8xf32>
    %92 = arith.addf %85, %91 : vector<8x8x8xf32>
    %93 = vector.extract_strided_slice %74 {offsets = [0, 1, 0], sizes = [8, 8, 8], strides = [1, 1, 1]} : vector<10x10x8xf32> to vector<8x8x8xf32>
    %94 = vector.extract_strided_slice %73 {offsets = [2, 0], sizes = [1, 8], strides = [1, 1]} : vector<25x8xf32> to vector<1x8xf32>
    %95 = vector.shape_cast %94 : vector<1x8xf32> to vector<8xf32>
    %96 = vector.shape_cast %95 : vector<8xf32> to vector<1x1x8xf32>
    %97 = vector.broadcast %96 : vector<1x1x8xf32> to vector<8x8x8xf32>
    %98 = arith.mulf %93, %97 : vector<8x8x8xf32>
    %99 = arith.addf %92, %98 : vector<8x8x8xf32>
    %100 = vector.extract_strided_slice %75 {offsets = [0, 1, 0], sizes = [8, 8, 8], strides = [1, 1, 1]} : vector<10x10x8xf32> to vector<8x8x8xf32>
    %101 = vector.extract_strided_slice %73 {offsets = [3, 0], sizes = [1, 8], strides = [1, 1]} : vector<25x8xf32> to vector<1x8xf32>
    %102 = vector.shape_cast %101 : vector<1x8xf32> to vector<8xf32>
    %103 = vector.shape_cast %102 : vector<8xf32> to vector<1x1x8xf32>
    %104 = vector.broadcast %103 : vector<1x1x8xf32> to vector<8x8x8xf32>
    %105 = arith.mulf %100, %104 : vector<8x8x8xf32>
    %106 = arith.addf %99, %105 : vector<8x8x8xf32>
    %107 = vector.extract_strided_slice %74 {offsets = [0, 2, 0], sizes = [8, 8, 8], strides = [1, 1, 1]} : vector<10x10x8xf32> to vector<8x8x8xf32>
    %108 = vector.extract_strided_slice %73 {offsets = [4, 0], sizes = [1, 8], strides = [1, 1]} : vector<25x8xf32> to vector<1x8xf32>
    %109 = vector.shape_cast %108 : vector<1x8xf32> to vector<8xf32>
    %110 = vector.shape_cast %109 : vector<8xf32> to vector<1x1x8xf32>
    %111 = vector.broadcast %110 : vector<1x1x8xf32> to vector<8x8x8xf32>
    %112 = arith.mulf %107, %111 : vector<8x8x8xf32>
    %113 = arith.addf %106, %112 : vector<8x8x8xf32>
    %114 = vector.extract_strided_slice %76 {offsets = [0, 0, 0], sizes = [8, 8, 8], strides = [1, 1, 1]} : vector<10x10x8xf32> to vector<8x8x8xf32>
    %115 = vector.extract_strided_slice %73 {offsets = [5, 0], sizes = [1, 8], strides = [1, 1]} : vector<25x8xf32> to vector<1x8xf32>
    %116 = vector.shape_cast %115 : vector<1x8xf32> to vector<8xf32>
    %117 = vector.shape_cast %116 : vector<8xf32> to vector<1x1x8xf32>
    %118 = vector.broadcast %117 : vector<1x1x8xf32> to vector<8x8x8xf32>
    %119 = arith.mulf %114, %118 : vector<8x8x8xf32>
    %120 = arith.addf %113, %119 : vector<8x8x8xf32>
    %121 = vector.extract_strided_slice %77 {offsets = [0, 0, 0], sizes = [8, 8, 8], strides = [1, 1, 1]} : vector<10x10x8xf32> to vector<8x8x8xf32>
    %122 = vector.extract_strided_slice %73 {offsets = [6, 0], sizes = [1, 8], strides = [1, 1]} : vector<25x8xf32> to vector<1x8xf32>
    %123 = vector.shape_cast %122 : vector<1x8xf32> to vector<8xf32>
    %124 = vector.shape_cast %123 : vector<8xf32> to vector<1x1x8xf32>
    %125 = vector.broadcast %124 : vector<1x1x8xf32> to vector<8x8x8xf32>
    %126 = arith.mulf %121, %125 : vector<8x8x8xf32>
    %127 = arith.addf %120, %126 : vector<8x8x8xf32>
    %128 = vector.extract_strided_slice %76 {offsets = [0, 1, 0], sizes = [8, 8, 8], strides = [1, 1, 1]} : vector<10x10x8xf32> to vector<8x8x8xf32>
    %129 = vector.extract_strided_slice %73 {offsets = [7, 0], sizes = [1, 8], strides = [1, 1]} : vector<25x8xf32> to vector<1x8xf32>
    %130 = vector.shape_cast %129 : vector<1x8xf32> to vector<8xf32>
    %131 = vector.shape_cast %130 : vector<8xf32> to vector<1x1x8xf32>
    %132 = vector.broadcast %131 : vector<1x1x8xf32> to vector<8x8x8xf32>
    %133 = arith.mulf %128, %132 : vector<8x8x8xf32>
    %134 = arith.addf %127, %133 : vector<8x8x8xf32>
    %135 = vector.extract_strided_slice %77 {offsets = [0, 1, 0], sizes = [8, 8, 8], strides = [1, 1, 1]} : vector<10x10x8xf32> to vector<8x8x8xf32>
    %136 = vector.extract_strided_slice %73 {offsets = [8, 0], sizes = [1, 8], strides = [1, 1]} : vector<25x8xf32> to vector<1x8xf32>
    %137 = vector.shape_cast %136 : vector<1x8xf32> to vector<8xf32>
    %138 = vector.shape_cast %137 : vector<8xf32> to vector<1x1x8xf32>
    %139 = vector.broadcast %138 : vector<1x1x8xf32> to vector<8x8x8xf32>
    %140 = arith.mulf %135, %139 : vector<8x8x8xf32>
    %141 = arith.addf %134, %140 : vector<8x8x8xf32>
    %142 = vector.extract_strided_slice %76 {offsets = [0, 2, 0], sizes = [8, 8, 8], strides = [1, 1, 1]} : vector<10x10x8xf32> to vector<8x8x8xf32>
    %143 = vector.extract_strided_slice %73 {offsets = [9, 0], sizes = [1, 8], strides = [1, 1]} : vector<25x8xf32> to vector<1x8xf32>
    %144 = vector.shape_cast %143 : vector<1x8xf32> to vector<8xf32>
    %145 = vector.shape_cast %144 : vector<8xf32> to vector<1x1x8xf32>
    %146 = vector.broadcast %145 : vector<1x1x8xf32> to vector<8x8x8xf32>
    %147 = arith.mulf %142, %146 : vector<8x8x8xf32>
    %148 = arith.addf %141, %147 : vector<8x8x8xf32>
    %149 = vector.extract_strided_slice %74 {offsets = [1, 0, 0], sizes = [8, 8, 8], strides = [1, 1, 1]} : vector<10x10x8xf32> to vector<8x8x8xf32>
    %150 = vector.extract_strided_slice %73 {offsets = [10, 0], sizes = [1, 8], strides = [1, 1]} : vector<25x8xf32> to vector<1x8xf32>
    %151 = vector.shape_cast %150 : vector<1x8xf32> to vector<8xf32>
    %152 = vector.shape_cast %151 : vector<8xf32> to vector<1x1x8xf32>
    %153 = vector.broadcast %152 : vector<1x1x8xf32> to vector<8x8x8xf32>
    %154 = arith.mulf %149, %153 : vector<8x8x8xf32>
    %155 = arith.addf %148, %154 : vector<8x8x8xf32>
    %156 = vector.extract_strided_slice %75 {offsets = [1, 0, 0], sizes = [8, 8, 8], strides = [1, 1, 1]} : vector<10x10x8xf32> to vector<8x8x8xf32>
    %157 = vector.extract_strided_slice %73 {offsets = [11, 0], sizes = [1, 8], strides = [1, 1]} : vector<25x8xf32> to vector<1x8xf32>
    %158 = vector.shape_cast %157 : vector<1x8xf32> to vector<8xf32>
    %159 = vector.shape_cast %158 : vector<8xf32> to vector<1x1x8xf32>
    %160 = vector.broadcast %159 : vector<1x1x8xf32> to vector<8x8x8xf32>
    %161 = arith.mulf %156, %160 : vector<8x8x8xf32>
    %162 = arith.addf %155, %161 : vector<8x8x8xf32>
    %163 = vector.extract_strided_slice %74 {offsets = [1, 1, 0], sizes = [8, 8, 8], strides = [1, 1, 1]} : vector<10x10x8xf32> to vector<8x8x8xf32>
    %164 = vector.extract_strided_slice %73 {offsets = [12, 0], sizes = [1, 8], strides = [1, 1]} : vector<25x8xf32> to vector<1x8xf32>
    %165 = vector.shape_cast %164 : vector<1x8xf32> to vector<8xf32>
    %166 = vector.shape_cast %165 : vector<8xf32> to vector<1x1x8xf32>
    %167 = vector.broadcast %166 : vector<1x1x8xf32> to vector<8x8x8xf32>
    %168 = arith.mulf %163, %167 : vector<8x8x8xf32>
    %169 = arith.addf %162, %168 : vector<8x8x8xf32>
    %170 = vector.extract_strided_slice %75 {offsets = [1, 1, 0], sizes = [8, 8, 8], strides = [1, 1, 1]} : vector<10x10x8xf32> to vector<8x8x8xf32>
    %171 = vector.extract_strided_slice %73 {offsets = [13, 0], sizes = [1, 8], strides = [1, 1]} : vector<25x8xf32> to vector<1x8xf32>
    %172 = vector.shape_cast %171 : vector<1x8xf32> to vector<8xf32>
    %173 = vector.shape_cast %172 : vector<8xf32> to vector<1x1x8xf32>
    %174 = vector.broadcast %173 : vector<1x1x8xf32> to vector<8x8x8xf32>
    %175 = arith.mulf %170, %174 : vector<8x8x8xf32>
    %176 = arith.addf %169, %175 : vector<8x8x8xf32>
    %177 = vector.extract_strided_slice %74 {offsets = [1, 2, 0], sizes = [8, 8, 8], strides = [1, 1, 1]} : vector<10x10x8xf32> to vector<8x8x8xf32>
    %178 = vector.extract_strided_slice %73 {offsets = [14, 0], sizes = [1, 8], strides = [1, 1]} : vector<25x8xf32> to vector<1x8xf32>
    %179 = vector.shape_cast %178 : vector<1x8xf32> to vector<8xf32>
    %180 = vector.shape_cast %179 : vector<8xf32> to vector<1x1x8xf32>
    %181 = vector.broadcast %180 : vector<1x1x8xf32> to vector<8x8x8xf32>
    %182 = arith.mulf %177, %181 : vector<8x8x8xf32>
    %183 = arith.addf %176, %182 : vector<8x8x8xf32>
    %184 = vector.extract_strided_slice %76 {offsets = [1, 0, 0], sizes = [8, 8, 8], strides = [1, 1, 1]} : vector<10x10x8xf32> to vector<8x8x8xf32>
    %185 = vector.extract_strided_slice %73 {offsets = [15, 0], sizes = [1, 8], strides = [1, 1]} : vector<25x8xf32> to vector<1x8xf32>
    %186 = vector.shape_cast %185 : vector<1x8xf32> to vector<8xf32>
    %187 = vector.shape_cast %186 : vector<8xf32> to vector<1x1x8xf32>
    %188 = vector.broadcast %187 : vector<1x1x8xf32> to vector<8x8x8xf32>
    %189 = arith.mulf %184, %188 : vector<8x8x8xf32>
    %190 = arith.addf %183, %189 : vector<8x8x8xf32>
    %191 = vector.extract_strided_slice %77 {offsets = [1, 0, 0], sizes = [8, 8, 8], strides = [1, 1, 1]} : vector<10x10x8xf32> to vector<8x8x8xf32>
    %192 = vector.extract_strided_slice %73 {offsets = [16, 0], sizes = [1, 8], strides = [1, 1]} : vector<25x8xf32> to vector<1x8xf32>
    %193 = vector.shape_cast %192 : vector<1x8xf32> to vector<8xf32>
    %194 = vector.shape_cast %193 : vector<8xf32> to vector<1x1x8xf32>
    %195 = vector.broadcast %194 : vector<1x1x8xf32> to vector<8x8x8xf32>
    %196 = arith.mulf %191, %195 : vector<8x8x8xf32>
    %197 = arith.addf %190, %196 : vector<8x8x8xf32>
    %198 = vector.extract_strided_slice %76 {offsets = [1, 1, 0], sizes = [8, 8, 8], strides = [1, 1, 1]} : vector<10x10x8xf32> to vector<8x8x8xf32>
    %199 = vector.extract_strided_slice %73 {offsets = [17, 0], sizes = [1, 8], strides = [1, 1]} : vector<25x8xf32> to vector<1x8xf32>
    %200 = vector.shape_cast %199 : vector<1x8xf32> to vector<8xf32>
    %201 = vector.shape_cast %200 : vector<8xf32> to vector<1x1x8xf32>
    %202 = vector.broadcast %201 : vector<1x1x8xf32> to vector<8x8x8xf32>
    %203 = arith.mulf %198, %202 : vector<8x8x8xf32>
    %204 = arith.addf %197, %203 : vector<8x8x8xf32>
    %205 = vector.extract_strided_slice %77 {offsets = [1, 1, 0], sizes = [8, 8, 8], strides = [1, 1, 1]} : vector<10x10x8xf32> to vector<8x8x8xf32>
    %206 = vector.extract_strided_slice %73 {offsets = [18, 0], sizes = [1, 8], strides = [1, 1]} : vector<25x8xf32> to vector<1x8xf32>
    %207 = vector.shape_cast %206 : vector<1x8xf32> to vector<8xf32>
    %208 = vector.shape_cast %207 : vector<8xf32> to vector<1x1x8xf32>
    %209 = vector.broadcast %208 : vector<1x1x8xf32> to vector<8x8x8xf32>
    %210 = arith.mulf %205, %209 : vector<8x8x8xf32>
    %211 = arith.addf %204, %210 : vector<8x8x8xf32>
    %212 = vector.extract_strided_slice %76 {offsets = [1, 2, 0], sizes = [8, 8, 8], strides = [1, 1, 1]} : vector<10x10x8xf32> to vector<8x8x8xf32>
    %213 = vector.extract_strided_slice %73 {offsets = [19, 0], sizes = [1, 8], strides = [1, 1]} : vector<25x8xf32> to vector<1x8xf32>
    %214 = vector.shape_cast %213 : vector<1x8xf32> to vector<8xf32>
    %215 = vector.shape_cast %214 : vector<8xf32> to vector<1x1x8xf32>
    %216 = vector.broadcast %215 : vector<1x1x8xf32> to vector<8x8x8xf32>
    %217 = arith.mulf %212, %216 : vector<8x8x8xf32>
    %218 = arith.addf %211, %217 : vector<8x8x8xf32>
    %219 = vector.extract_strided_slice %74 {offsets = [2, 0, 0], sizes = [8, 8, 8], strides = [1, 1, 1]} : vector<10x10x8xf32> to vector<8x8x8xf32>
    %220 = vector.extract_strided_slice %73 {offsets = [20, 0], sizes = [1, 8], strides = [1, 1]} : vector<25x8xf32> to vector<1x8xf32>
    %221 = vector.shape_cast %220 : vector<1x8xf32> to vector<8xf32>
    %222 = vector.shape_cast %221 : vector<8xf32> to vector<1x1x8xf32>
    %223 = vector.broadcast %222 : vector<1x1x8xf32> to vector<8x8x8xf32>
    %224 = arith.mulf %219, %223 : vector<8x8x8xf32>
    %225 = arith.addf %218, %224 : vector<8x8x8xf32>
    %226 = vector.extract_strided_slice %75 {offsets = [2, 0, 0], sizes = [8, 8, 8], strides = [1, 1, 1]} : vector<10x10x8xf32> to vector<8x8x8xf32>
    %227 = vector.extract_strided_slice %73 {offsets = [21, 0], sizes = [1, 8], strides = [1, 1]} : vector<25x8xf32> to vector<1x8xf32>
    %228 = vector.shape_cast %227 : vector<1x8xf32> to vector<8xf32>
    %229 = vector.shape_cast %228 : vector<8xf32> to vector<1x1x8xf32>
    %230 = vector.broadcast %229 : vector<1x1x8xf32> to vector<8x8x8xf32>
    %231 = arith.mulf %226, %230 : vector<8x8x8xf32>
    %232 = arith.addf %225, %231 : vector<8x8x8xf32>
    %233 = vector.extract_strided_slice %74 {offsets = [2, 1, 0], sizes = [8, 8, 8], strides = [1, 1, 1]} : vector<10x10x8xf32> to vector<8x8x8xf32>
    %234 = vector.extract_strided_slice %73 {offsets = [22, 0], sizes = [1, 8], strides = [1, 1]} : vector<25x8xf32> to vector<1x8xf32>
    %235 = vector.shape_cast %234 : vector<1x8xf32> to vector<8xf32>
    %236 = vector.shape_cast %235 : vector<8xf32> to vector<1x1x8xf32>
    %237 = vector.broadcast %236 : vector<1x1x8xf32> to vector<8x8x8xf32>
    %238 = arith.mulf %233, %237 : vector<8x8x8xf32>
    %239 = arith.addf %232, %238 : vector<8x8x8xf32>
    %240 = vector.extract_strided_slice %75 {offsets = [2, 1, 0], sizes = [8, 8, 8], strides = [1, 1, 1]} : vector<10x10x8xf32> to vector<8x8x8xf32>
    %241 = vector.extract_strided_slice %73 {offsets = [23, 0], sizes = [1, 8], strides = [1, 1]} : vector<25x8xf32> to vector<1x8xf32>
    %242 = vector.shape_cast %241 : vector<1x8xf32> to vector<8xf32>
    %243 = vector.shape_cast %242 : vector<8xf32> to vector<1x1x8xf32>
    %244 = vector.broadcast %243 : vector<1x1x8xf32> to vector<8x8x8xf32>
    %245 = arith.mulf %240, %244 : vector<8x8x8xf32>
    %246 = arith.addf %239, %245 : vector<8x8x8xf32>
    %247 = vector.extract_strided_slice %74 {offsets = [2, 2, 0], sizes = [8, 8, 8], strides = [1, 1, 1]} : vector<10x10x8xf32> to vector<8x8x8xf32>
    %248 = vector.extract_strided_slice %73 {offsets = [24, 0], sizes = [1, 8], strides = [1, 1]} : vector<25x8xf32> to vector<1x8xf32>
    %249 = vector.shape_cast %248 : vector<1x8xf32> to vector<8xf32>
    %250 = vector.shape_cast %249 : vector<8xf32> to vector<1x1x8xf32>
    %251 = vector.broadcast %250 : vector<1x1x8xf32> to vector<8x8x8xf32>
    %252 = arith.mulf %247, %251 : vector<8x8x8xf32>
    %253 = arith.addf %246, %252 : vector<8x8x8xf32>
    %cst_112 = arith.constant 0.000000e+00 : f32
    %254 = vector.broadcast %cst_112 : f32 to vector<10x10x8xf32>
    %c0_113 = arith.constant 0 : index
    %c0_114 = arith.constant 0 : index
    %c0_115 = arith.constant 0 : index
    %255 = vector.load %arg11[%c0_113, %c0_114, %c0_115] : memref<10x10x8xf32, #tpu.memory_space<vmem>>, vector<10x10x8xf32>
    tpu.vector_store %arg11[%c0_113, %c0_114, %c0_115], %254 {strides = array<i32>} : memref<10x10x8xf32, #tpu.memory_space<vmem>>, vector<10x10x8xf32>,
    %c1_116 = arith.constant 1 : index
    %c1_117 = arith.constant 1 : index
    %c0_118 = arith.constant 0 : index
    %256 = vector.load %arg11[%c1_116, %c1_117, %c0_118] : memref<10x10x8xf32, #tpu.memory_space<vmem>>, vector<8x8x8xf32>
    tpu.vector_store %arg11[%c1_116, %c1_117, %c0_118], %253 {strides = array<i32>} : memref<10x10x8xf32, #tpu.memory_space<vmem>>, vector<8x8x8xf32>,
    %c0_119 = arith.constant 0 : index
    %c0_120 = arith.constant 0 : index
    %c0_121 = arith.constant 0 : index
    %257 = vector.load %arg11[%c0_119, %c0_120, %c0_121] : memref<10x10x8xf32, #tpu.memory_space<vmem>>, vector<8x8x8xf32>
    %258 = vector.shape_cast %257 : vector<8x8x8xf32> to vector<64x8xf32>
    %259 = arith.truncf %258 : vector<64x8xf32> to vector<64x8xbf16>
    %c0_122 = arith.constant 0 : index
    %c0_123 = arith.constant 0 : index
    %260 = vector.load %arg12[%c0_122, %c0_123] : memref<64x72xbf16, #tpu.memory_space<vmem>>, vector<64x8xbf16>
    tpu.vector_store %arg12[%c0_122, %c0_123], %259 {strides = array<i32>} : memref<64x72xbf16, #tpu.memory_space<vmem>>, vector<64x8xbf16>,
    %c0_124 = arith.constant 0 : index
    %c1_125 = arith.constant 1 : index
    %c0_126 = arith.constant 0 : index
    %261 = vector.load %arg11[%c0_124, %c1_125, %c0_126] : memref<10x10x8xf32, #tpu.memory_space<vmem>>, vector<8x8x8xf32>
    %262 = vector.shape_cast %261 : vector<8x8x8xf32> to vector<64x8xf32>
    %263 = arith.truncf %262 : vector<64x8xf32> to vector<64x8xbf16>
    %c0_127 = arith.constant 0 : index
    %c8_128 = arith.constant 8 : index
    %264 = vector.load %arg12[%c0_127, %c8_128] : memref<64x72xbf16, #tpu.memory_space<vmem>>, vector<64x8xbf16>
    tpu.vector_store %arg12[%c0_127, %c8_128], %263 {strides = array<i32>} : memref<64x72xbf16, #tpu.memory_space<vmem>>, vector<64x8xbf16>,
    %c0_129 = arith.constant 0 : index
    %c2_130 = arith.constant 2 : index
    %c0_131 = arith.constant 0 : index
    %265 = vector.load %arg11[%c0_129, %c2_130, %c0_131] : memref<10x10x8xf32, #tpu.memory_space<vmem>>, vector<8x8x8xf32>
    %266 = vector.shape_cast %265 : vector<8x8x8xf32> to vector<64x8xf32>
    %267 = arith.truncf %266 : vector<64x8xf32> to vector<64x8xbf16>
    %c0_132 = arith.constant 0 : index
    %c16_133 = arith.constant 16 : index
    %268 = vector.load %arg12[%c0_132, %c16_133] : memref<64x72xbf16, #tpu.memory_space<vmem>>, vector<64x8xbf16>
    tpu.vector_store %arg12[%c0_132, %c16_133], %267 {strides = array<i32>} : memref<64x72xbf16, #tpu.memory_space<vmem>>, vector<64x8xbf16>,
    %c1_134 = arith.constant 1 : index
    %c0_135 = arith.constant 0 : index
    %c0_136 = arith.constant 0 : index
    %269 = vector.load %arg11[%c1_134, %c0_135, %c0_136] : memref<10x10x8xf32, #tpu.memory_space<vmem>>, vector<8x8x8xf32>
    %270 = vector.shape_cast %269 : vector<8x8x8xf32> to vector<64x8xf32>
    %271 = arith.truncf %270 : vector<64x8xf32> to vector<64x8xbf16>
    %c0_137 = arith.constant 0 : index
    %c24_138 = arith.constant 24 : index
    %272 = vector.load %arg12[%c0_137, %c24_138] : memref<64x72xbf16, #tpu.memory_space<vmem>>, vector<64x8xbf16>
    tpu.vector_store %arg12[%c0_137, %c24_138], %271 {strides = array<i32>} : memref<64x72xbf16, #tpu.memory_space<vmem>>, vector<64x8xbf16>,
    %c1_139 = arith.constant 1 : index
    %c1_140 = arith.constant 1 : index
    %c0_141 = arith.constant 0 : index
    %273 = vector.load %arg11[%c1_139, %c1_140, %c0_141] : memref<10x10x8xf32, #tpu.memory_space<vmem>>, vector<8x8x8xf32>
    %274 = vector.shape_cast %273 : vector<8x8x8xf32> to vector<64x8xf32>
    %275 = arith.truncf %274 : vector<64x8xf32> to vector<64x8xbf16>
    %c0_142 = arith.constant 0 : index
    %c32_143 = arith.constant 32 : index
    %276 = vector.load %arg12[%c0_142, %c32_143] : memref<64x72xbf16, #tpu.memory_space<vmem>>, vector<64x8xbf16>
    tpu.vector_store %arg12[%c0_142, %c32_143], %275 {strides = array<i32>} : memref<64x72xbf16, #tpu.memory_space<vmem>>, vector<64x8xbf16>,
    %c1_144 = arith.constant 1 : index
    %c2_145 = arith.constant 2 : index
    %c0_146 = arith.constant 0 : index
    %277 = vector.load %arg11[%c1_144, %c2_145, %c0_146] : memref<10x10x8xf32, #tpu.memory_space<vmem>>, vector<8x8x8xf32>
    %278 = vector.shape_cast %277 : vector<8x8x8xf32> to vector<64x8xf32>
    %279 = arith.truncf %278 : vector<64x8xf32> to vector<64x8xbf16>
    %c0_147 = arith.constant 0 : index
    %c40 = arith.constant 40 : index
    %280 = vector.load %arg12[%c0_147, %c40] : memref<64x72xbf16, #tpu.memory_space<vmem>>, vector<64x8xbf16>
    tpu.vector_store %arg12[%c0_147, %c40], %279 {strides = array<i32>} : memref<64x72xbf16, #tpu.memory_space<vmem>>, vector<64x8xbf16>,
    %c2_148 = arith.constant 2 : index
    %c0_149 = arith.constant 0 : index
    %c0_150 = arith.constant 0 : index
    %281 = vector.load %arg11[%c2_148, %c0_149, %c0_150] : memref<10x10x8xf32, #tpu.memory_space<vmem>>, vector<8x8x8xf32>
    %282 = vector.shape_cast %281 : vector<8x8x8xf32> to vector<64x8xf32>
    %283 = arith.truncf %282 : vector<64x8xf32> to vector<64x8xbf16>
    %c0_151 = arith.constant 0 : index
    %c48 = arith.constant 48 : index
    %284 = vector.load %arg12[%c0_151, %c48] : memref<64x72xbf16, #tpu.memory_space<vmem>>, vector<64x8xbf16>
    tpu.vector_store %arg12[%c0_151, %c48], %283 {strides = array<i32>} : memref<64x72xbf16, #tpu.memory_space<vmem>>, vector<64x8xbf16>,
    %c2_152 = arith.constant 2 : index
    %c1_153 = arith.constant 1 : index
    %c0_154 = arith.constant 0 : index
    %285 = vector.load %arg11[%c2_152, %c1_153, %c0_154] : memref<10x10x8xf32, #tpu.memory_space<vmem>>, vector<8x8x8xf32>
    %286 = vector.shape_cast %285 : vector<8x8x8xf32> to vector<64x8xf32>
    %287 = arith.truncf %286 : vector<64x8xf32> to vector<64x8xbf16>
    %c0_155 = arith.constant 0 : index
    %c56 = arith.constant 56 : index
    %288 = vector.load %arg12[%c0_155, %c56] : memref<64x72xbf16, #tpu.memory_space<vmem>>, vector<64x8xbf16>
    tpu.vector_store %arg12[%c0_155, %c56], %287 {strides = array<i32>} : memref<64x72xbf16, #tpu.memory_space<vmem>>, vector<64x8xbf16>,
    %c2_156 = arith.constant 2 : index
    %c2_157 = arith.constant 2 : index
    %c0_158 = arith.constant 0 : index
    %289 = vector.load %arg11[%c2_156, %c2_157, %c0_158] : memref<10x10x8xf32, #tpu.memory_space<vmem>>, vector<8x8x8xf32>
    %290 = vector.shape_cast %289 : vector<8x8x8xf32> to vector<64x8xf32>
    %291 = arith.truncf %290 : vector<64x8xf32> to vector<64x8xbf16>
    %c0_159 = arith.constant 0 : index
    %c64 = arith.constant 64 : index
    %292 = vector.load %arg12[%c0_159, %c64] : memref<64x72xbf16, #tpu.memory_space<vmem>>, vector<64x8xbf16>
    tpu.vector_store %arg12[%c0_159, %c64], %291 {strides = array<i32>} : memref<64x72xbf16, #tpu.memory_space<vmem>>, vector<64x8xbf16>,
    %c0_160 = arith.constant 0 : index
    %c0_161 = arith.constant 0 : index
    %293 = vector.load %arg12[%c0_160, %c0_161] : memref<64x72xbf16, #tpu.memory_space<vmem>>, vector<64x72xbf16>
    %c0_162 = arith.constant 0 : index
    %c0_163 = arith.constant 0 : index
    %294 = vector.load %arg5[%c0_162, %c0_163] : memref<72x8xbf16, #tpu.memory_space<vmem>>, vector<72x8xbf16>
    %cst_164 = arith.constant dense<0.000000e+00> : vector<64x8xf32>
    %295 = tpu.matmul %293, %294, %cst_164 {dimension_numbers = #tpu.dot_dimension_numbers<[1], [0], [0], [1], [0, 0, 1, 1], [], []>} : vector<64x72xbf16>, vector<72x8xbf16>, vector<64x8xf32> -> vector<64x8xf32>
    %c0_165 = arith.constant 0 : index
    %c0_166 = arith.constant 0 : index
    %296 = vector.load %arg6[%c0_165, %c0_166] : memref<1x8xf32, #tpu.memory_space<vmem>>, vector<1x8xf32>
    %297 = vector.broadcast %296 : vector<1x8xf32> to vector<64x8xf32>
    %298 = arith.addf %295, %297 : vector<64x8xf32>
    %cst_167 = arith.constant 0.000000e+00 : f32
    %299 = vector.broadcast %cst_167 : f32 to vector<64x8xf32>
    %300 = arith.cmpf ogt, %298, %299 : vector<64x8xf32>
    %cst_168 = arith.constant 0.00999999977 : f32
    %301 = vector.broadcast %cst_168 : f32 to vector<64x8xf32>
    %302 = arith.mulf %301, %298 : vector<64x8xf32>
    %303 = arith.select %300, %298, %302 : vector<64x8xi1>, vector<64x8xf32>
    %304 = vector.shape_cast %303 : vector<64x8xf32> to vector<1x8x8x8xf32>
    %c0_169 = arith.constant 0 : index
    %c0_170 = arith.constant 0 : index
    %c0_171 = arith.constant 0 : index
    %c0_172 = arith.constant 0 : index
    %305 = vector.load %arg7[%c0_169, %c0_170, %c0_171, %c0_172] : memref<1x8x8x8xf32, #tpu.memory_space<vmem>>, vector<1x8x8x8xf32>
    tpu.vector_store %arg7[%c0_169, %c0_170, %c0_171, %c0_172], %304 {strides = array<i32>} : memref<1x8x8x8xf32, #tpu.memory_space<vmem>>, vector<1x8x8x8xf32>,
    return
  }
  func.func @transform_0(%arg0: i32) -> (i32, i32, i32, i32) {
    %c0_i32 = arith.constant 0 : i32
    %c0_i32_0 = arith.constant 0 : i32
    %c0_i32_1 = arith.constant 0 : i32
    %c0_i32_2 = arith.constant 0 : i32
    return %arg0, %c0_i32, %c0_i32_0, %c0_i32_1 : i32, i32, i32, i32
  }
  func.func @transform_1(%arg0: i32) -> (i32, i32) {
    %c0_i32 = arith.constant 0 : i32
    %c0_i32_0 = arith.constant 0 : i32
    %c0_i32_1 = arith.constant 0 : i32
    return %c0_i32, %c0_i32_0 : i32, i32
  }
  func.func @transform_2(%arg0: i32) -> (i32, i32) {
    %c0_i32 = arith.constant 0 : i32
    %c0_i32_0 = arith.constant 0 : i32
    %c0_i32_1 = arith.constant 0 : i32
    return %c0_i32, %c0_i32_0 : i32, i32
  }
  func.func @transform_3(%arg0: i32) -> (i32, i32) {
    %c0_i32 = arith.constant 0 : i32
    %c0_i32_0 = arith.constant 0 : i32
    %c0_i32_1 = arith.constant 0 : i32
    return %c0_i32, %c0_i32_0 : i32, i32
  }
  func.func @transform_4(%arg0: i32) -> (i32, i32) {
    %c0_i32 = arith.constant 0 : i32
    %c0_i32_0 = arith.constant 0 : i32
    %c0_i32_1 = arith.constant 0 : i32
    return %c0_i32, %c0_i32_0 : i32, i32
  }
  func.func @transform_5(%arg0: i32) -> (i32, i32) {
    %c0_i32 = arith.constant 0 : i32
    %c0_i32_0 = arith.constant 0 : i32
    %c0_i32_1 = arith.constant 0 : i32
    return %c0_i32, %c0_i32_0 : i32, i32
  }
  func.func @transform_6(%arg0: i32) -> (i32, i32, i32, i32) {
    %c0_i32 = arith.constant 0 : i32
    %c0_i32_0 = arith.constant 0 : i32
    %c0_i32_1 = arith.constant 0 : i32
    %c0_i32_2 = arith.constant 0 : i32
    return %arg0, %c0_i32, %c0_i32_0, %c0_i32_1 : i32, i32, i32, i32
  }
}

</mosaic_0001>

<bundles_post_ra>
// kernel: up_propagate_forward.1
= control target key start
LH: loop header
LB: loop body
LE: loop exit
PB: predicated region body
PF: predicated region fallthrough
CT: control target
= control target key end

     0   :  { %s4408_s21 = smov 0   ;;  %s6405_s0 = inlined_call_operand.vmem [shape: bf16[2,16,16,4], index: 0, kind: input, shape index: {}]   ;;  %s6406_s1 = inlined_call_operand.vmem [shape: bf16[36,8], index: 1, kind: input, shape index: {}]   ;;  %s6407_s2 = inlined_call_operand.vmem [shape: f32[1,8], index: 2, kind: input, shape index: {}]   ;;  %s6408_s3 = inlined_call_operand.vmem [shape: f32[25,8], index: 3, kind: input, shape index: {}]   ;;  %s6409_s4 = inlined_call_operand.vmem [shape: bf16[72,8], index: 4, kind: input, shape index: {}]   ;;  %s6410_s5 = inlined_call_operand.vmem [shape: f32[1,8], index: 5, kind: input, shape index: {}]   ;;  %s6411_s6 = inlined_call_operand.vmem [shape: f32[2,8,8,8], index: 6, kind: output, shape index: {}]  }
   0x1 LB: > { %s4103_s22 = sadd.s32 4294967295, %s4358_s21   ;;  %p4107_p0 = scmp.ge.s32.totalorder %s4358_s21, 1  ;;  %s4358_s21 = sphi %s4408_s21, %s16_s21  }
   0x2   : > { %p212_p1 = scmp.lt.s32.totalorder %s4358_s21, 3 }
   0x4   : > { %p213_p2 = pnand %p4107_p0, %p212_p1 }
   0x6   : > { %216 = sbr.rel (%p213_p2) target bundleno = 1130 (0x46a), region = 44 }
   0xd   : > { %p242_p3 = scmp.lt.s32.totalorder %s4103_s22, 1  ;;  %vm318_vm0 = vcmask 31744   ;;  %vm392_vm1 = vcmask 24576   ;;  %s4360_s27 = smov 16   ;;  %vm1618_vm2 = vcmask 1041408   ;;  %vm605_vm3 = vcmask 64544  }
   0xe   : > { %s4361_s28 = smov 4   ;;  %s4362_s29 = smov 28   ;;  %vm734_vm4 = vcmask 97344   ;;  %vm863_vm5 = vcmask 130144   ;;  %vm992_vm6 = vcmask 162944   ;;  %vm1121_vm7 = vcmask 195744  }
   0xf   : > { %s6525_s22 = smov (!%p242_p3, %s4103_s22), 1  ;;  %s4363_s30 = smov 8   ;;  %vm1251_vm8 = vcmask 228544   ;;  %vm1380_vm9 = vcmask 261344   ;;  %vm1509_vm10 = vcmask 294144   ;;  %vm1569_vm11 = vcmask 293888  }
  0x10   : > { %s4145_s23 = sshll.u32 %s6525_s22, 7  ;;  %s4364_s7 = smov 12   ;;  %vm1880_vm12 = vcmask 64512   ;;  %vm3542_vm13 = vcmask 58368  }
  0x11   : > { %s4422_s26 = scalar_lea.vmem %s6405_s0, %s4145_s23  ;;  %s4365_s8 = smov 20  }
  0x12   : > { %v4211_v0 = vld [vmem:[%s4422_s26 + $0x8] sm:$0xff]   ;;  %v4148_v1 = vld [vmem:[%s4422_s26] sm:$0xff]   ;;  %v4212_v2 = vld [vmem:[%s4422_s26 + $0x10] sm:$0xff]   ;;  %s4366_s9 = smov 24   ;;  %s4367_s14 = smov 32  }
  0x13   : > { %v4153_v3 = vunpack.c.l.bf16 %v4211_v0  ;;  %v4154_v4 = vunpack.c.h.bf16 %v4211_v0  ;;  %v4149_v5 = vunpack.c.l.bf16 %v4148_v1  ;;  %v4150_v6 = vunpack.c.h.bf16 %v4148_v1  ;;  %v4213_v7 = vld [vmem:[%s4422_s26 + $0x18] sm:$0xff]   ;;  %v4214_v8 = vld [vmem:[%s4422_s26 + $0x20] sm:$0xff]   ;;  %v4215_v9 = vld [vmem:[%s4422_s26 + $0x28] sm:$0xff]   ;;  %s4369_s10 = smov 40   ;;  %s4370_s11 = smov 48  }
  0x14   : > { %v4157_v10 = vunpack.c.l.bf16 %v4212_v2  ;;  %v4158_v11 = vunpack.c.h.bf16 %v4212_v2  ;;  %v4161_v12 = vunpack.c.l.bf16 %v4213_v7  ;;  %v4162_v13 = vunpack.c.h.bf16 %v4213_v7  ;;  %v4216_v14 = vld [vmem:[%s4422_s26 + $0x30] sm:$0xff]   ;;  %v4219_v15 = vld [vmem:[%s4422_s26 + $0x48] sm:$0xff]   ;;  %v4217_v21 = vld [vmem:[%s4422_s26 + $0x38] sm:$0xff]   ;;  %s4371_s12 = smov 56   ;;  %s4372_s13 = smov 64  }
  0x15   : > { %v4220_v16 = vld [vmem:[%s4422_s26 + $0x50] sm:$0xff]   ;;  %321 = vst.msk [vmem:[#allocation2 + $0x31] sm:$0xff] %vm318_vm0, %v4153_v3  ;;  %322 = vst.msk [vmem:[#allocation2 + $0x39] sm:$0xff] %vm318_vm0, %v4154_v4  ;;  %v4165_v17 = vunpack.c.l.bf16 %v4214_v8  ;;  %v4166_v18 = vunpack.c.h.bf16 %v4214_v8  ;;  %v4169_v19 = vunpack.c.l.bf16 %v4215_v9  ;;  %v4170_v20 = vunpack.c.h.bf16 %v4215_v9  ;;  %v4221_v22 = vld [vmem:[%s4422_s26 + $0x58] sm:$0xff]  }
  0x16   : > { %351 = vst.msk [vmem:[#allocation2 + $0x1] sm:$0xff] %vm318_vm0, %v4149_v5  ;;  %352 = vst.msk [vmem:[#allocation2 + $0x9] sm:$0xff] %vm318_vm0, %v4150_v6  ;;  %v4218_v23 = vld [vmem:[%s4422_s26 + $0x40] sm:$0xff]   ;;  %v4173_v24 = vunpack.c.l.bf16 %v4216_v14  ;;  %v4174_v25 = vunpack.c.h.bf16 %v4216_v14  ;;  %v4185_v26 = vunpack.c.l.bf16 %v4219_v15  ;;  %v4186_v27 = vunpack.c.h.bf16 %v4219_v15 }
  0x17   : > { %319 = vst.msk [vmem:[#allocation2 + $0x19] sm:$0xff] %vm318_vm0, %v4149_v5  ;;  %320 = vst.msk [vmem:[#allocation2 + $0x21] sm:$0xff] %vm318_vm0, %v4150_v6  ;;  %v4189_v28 = vunpack.c.l.bf16 %v4220_v16  ;;  %v4190_v29 = vunpack.c.h.bf16 %v4220_v16  ;;  %v4177_v30 = vunpack.c.l.bf16 %v4217_v21  ;;  %v4178_v31 = vunpack.c.h.bf16 %v4217_v21 }
  0x18   : > { %323 = vst.msk [vmem:[#allocation2 + $0x49] sm:$0xff] %vm318_vm0, %v4157_v10  ;;  %324 = vst.msk [vmem:[#allocation2 + $0x51] sm:$0xff] %vm318_vm0, %v4158_v11  ;;  %v4193_v32 = vunpack.c.l.bf16 %v4221_v22  ;;  %v4194_v33 = vunpack.c.h.bf16 %v4221_v22  ;;  %v4181_v34 = vunpack.c.l.bf16 %v4218_v23  ;;  %v4182_v42 = vunpack.c.h.bf16 %v4218_v23 }
  0x19   : > { %325 = vst.msk [vmem:[#allocation2 + $0x61] sm:$0xff] %vm318_vm0, %v4161_v12  ;;  %326 = vst.msk [vmem:[#allocation2 + $0x69] sm:$0xff] %vm318_vm0, %v4162_v13 }
  0x1a   : > { %327 = vst.msk [vmem:[#allocation2 + $0x79] sm:$0xff] %vm318_vm0, %v4165_v17  ;;  %328 = vst.msk [vmem:[#allocation2 + $0x81] sm:$0xff] %vm318_vm0, %v4166_v18 }
  0x1b   : > { %329 = vst.msk [vmem:[#allocation2 + $0x91] sm:$0xff] %vm318_vm0, %v4169_v19  ;;  %330 = vst.msk [vmem:[#allocation2 + $0x99] sm:$0xff] %vm318_vm0, %v4170_v20 }
  0x1c   : > { %331 = vst.msk [vmem:[#allocation2 + $0xa9] sm:$0xff] %vm318_vm0, %v4173_v24  ;;  %332 = vst.msk [vmem:[#allocation2 + $0xb1] sm:$0xff] %vm318_vm0, %v4174_v25  ;;  %v882_v35 = vld [vmem:[#allocation2 + $0x31] sm:$0xff]  ;;  %v883_v36 = vld [vmem:[#allocation2 + $0x39] sm:$0xff] }
  0x1d   : > { %337 = vst.msk [vmem:[#allocation2 + $0xf1] sm:$0xff] %vm318_vm0, %v4185_v26  ;;  %338 = vst.msk [vmem:[#allocation2 + $0xf9] sm:$0xff] %vm318_vm0, %v4186_v27  ;;  %v493_v37 = vld [vmem:[#allocation2 + $0x1] sm:$0xff]  ;;  %v4461_v38 = vpack.c.bf16 %v883_v36, %v882_v35  ;;  %v494_v39 = vld [vmem:[#allocation2 + $0x9] sm:$0xff] }
  0x1e   : > { %339 = vst.msk [vmem:[#allocation2 + $0x109] sm:$0xff] %vm318_vm0, %v4189_v28  ;;  %340 = vst.msk [vmem:[#allocation2 + $0x111] sm:$0xff] %vm318_vm0, %v4190_v29  ;;  %v525_v43 = vpack.c.bf16 %v494_v39, %v493_v37  ;;  %v495_v44 = vld [vmem:[#allocation2 + $0x19] sm:$0xff]  ;;  %v496_v45 = vld [vmem:[#allocation2 + $0x21] sm:$0xff] }
  0x1f   : > { %333 = vst.msk [vmem:[#allocation2 + $0xc1] sm:$0xff] %vm318_vm0, %v4177_v30  ;;  %334 = vst.msk [vmem:[#allocation2 + $0xc9] sm:$0xff] %vm318_vm0, %v4178_v31  ;;  %v1270_v40 = vld [vmem:[#allocation2 + $0x49] sm:$0xff]  ;;  %v1271_v41 = vld [vmem:[#allocation2 + $0x51] sm:$0xff]  ;;  %946 = vrot.lane.b32.xlu1 %v4461_v38, %s4360_s27  ;;  %v526_v49 = vpack.c.bf16 %v496_v45, %v495_v44 }
  0x20   : > { %341 = vst.msk [vmem:[#allocation2 + $0x121] sm:$0xff] %vm318_vm0, %v4193_v32  ;;  %342 = vst.msk [vmem:[#allocation2 + $0x129] sm:$0xff] %vm318_vm0, %v4194_v33  ;;  %v374_v46 = vld [vmem:[#allocation2 + $0x10] sm:$0x1]  ;;  %v4465_v47 = vpack.c.bf16 %v1271_v41, %v1270_v40  ;;  %v375_v48 = vld [vmem:[#allocation2 + $0x28] sm:$0x1]  ;;  %557 = vrot.lane.b32.xlu0 %v525_v43, %s4361_s28 }
  0x21   : > { %335 = vst.msk [vmem:[#allocation2 + $0xd9] sm:$0xff] %vm318_vm0, %v4181_v34  ;;  %336 = vst.msk [vmem:[#allocation2 + $0xe1] sm:$0xff] %vm318_vm0, %v4182_v42  ;;  %v358_v50 = vld [vmem:[#allocation2 + $0x31] sm:$0x1]  ;;  %v357_v51 = vld [vmem:[#allocation2 + $0x19] sm:$0x1] }
  0x22   : > { %411 = vst.msk [vmem:[#allocation2 + $0x11] sm:$0x1] %vm392_vm1, %v374_v46  ;;  %412 = vst.msk [vmem:[#allocation2 + $0x29] sm:$0x1] %vm392_vm1, %v375_v48  ;;  %v376_v52 = vld [vmem:[#allocation2 + $0x40] sm:$0x1] }
  0x23   : > { %395 = vst.msk [vmem:[#allocation2 + $0x30] sm:$0x1] %vm392_vm1, %v358_v50  ;;  %394 = vst.msk [vmem:[#allocation2 + $0x18] sm:$0x1] %vm392_vm1, %v357_v51  ;;  %v359_v53 = vld [vmem:[#allocation2 + $0x49] sm:$0x1]  ;;  %1334 = vrot.lane.b32.xlu1 %v4465_v47, %s4362_s29 }
  0x24   : > { %413 = vst.msk [vmem:[#allocation2 + $0x41] sm:$0x1] %vm392_vm1, %v376_v52  ;;  %v377_v54 = vld [vmem:[#allocation2 + $0x58] sm:$0x1]  ;;  %396 = vst.msk [vmem:[#allocation2 + $0x48] sm:$0x1] %vm392_vm1, %v359_v53  ;;  %559 = vrot.lane.b32.xlu0 %v526_v49, %s4361_s28 }
  0x25   : > { %414 = vst.msk [vmem:[#allocation2 + $0x59] sm:$0x1] %vm392_vm1, %v377_v54  ;;  %v360_v55 = vld [vmem:[#allocation2 + $0x61] sm:$0x1]  ;;  %v622_v56 = vld [vmem:[#allocation2 + $0x2] sm:$0xff]  ;;  %v754_v61 = vld [vmem:[#allocation2 + $0x38] sm:$0xff] }
  0x26   : > { %397 = vst.msk [vmem:[#allocation2 + $0x60] sm:$0x1] %vm392_vm1, %v360_v55  ;;  %v378_v57 = vld [vmem:[#allocation2 + $0x70] sm:$0x1]  ;;  %v624_v58 = vld [vmem:[#allocation2 + $0x1a] sm:$0xff]  ;;  %v758_v9 = vld [vmem:[#allocation2 + $0x68] sm:$0xff] }
  0x27   : > { %415 = vst.msk [vmem:[#allocation2 + $0x71] sm:$0x1] %vm392_vm1, %v378_v57  ;;  %v361_v59 = vld [vmem:[#allocation2 + $0x79] sm:$0x1]  ;;  %v752_v62 = vld [vmem:[#allocation2 + $0x20] sm:$0xff]  ;;  %v1142_v1 = vld [vmem:[#allocation2 + $0x50] sm:$0xff] }
  0x28   : > { %398 = vst.msk [vmem:[#allocation2 + $0x78] sm:$0x1] %vm392_vm1, %v361_v59  ;;  %v379_v2 = vld [vmem:[#allocation2 + $0x88] sm:$0x1]  ;;  %944 = vrot.lane.b32.xlu0 %v526_v49, %s4360_s27  ;;  %v362_v5 = vld [vmem:[#allocation2 + $0x91] sm:$0x1] }
  0x29   : > { %v623_v60 = vld [vmem:[#allocation2 + $0xa] sm:$0xff]  ;;  %v625_v0 = vld [vmem:[#allocation2 + $0x22] sm:$0xff]  ;;  %416 = vst.msk [vmem:[#allocation2 + $0x89] sm:$0x1] %vm392_vm1, %v379_v2  ;;  %399 = vst.msk [vmem:[#allocation2 + $0x90] sm:$0x1] %vm392_vm1, %v362_v5 }
  0x2a   : > { %v654_v63 = vpack.c.bf16 %v623_v60, %v622_v56  ;;  %v753_v3 = vld [vmem:[#allocation2 + $0x30] sm:$0xff]  ;;  %v751_v4 = vld [vmem:[#allocation2 + $0x18] sm:$0xff]  ;;  %v655_v6 = vpack.c.bf16 %v625_v0, %v624_v58  ;;  %v1146_v13 = vld [vmem:[#allocation2 + $0x80] sm:$0xff] }
  0x2b   : > { %v784_v7 = vpack.c.bf16 %v754_v61, %v753_v3  ;;  %v783_v8 = vpack.c.bf16 %v752_v62, %v751_v4  ;;  %v1141_v10 = vld [vmem:[#allocation2 + $0x48] sm:$0xff]  ;;  %v380_v14 = vld [vmem:[#allocation2 + $0xa0] sm:$0x1]  ;;  %v1011_v17 = vld [vmem:[#allocation2 + $0x32] sm:$0xff] }
  0x2c   : > { %686 = vrot.lane.b32.xlu1 %v654_v63, %s4363_s30  ;;  %v4486_v11 = vpack.c.bf16 %v1142_v1, %v1141_v10  ;;  %1332 = vrot.lane.b32.xlu0 %v4461_v38, %s4362_s29  ;;  %417 = vst.msk [vmem:[#allocation2 + $0xa1] sm:$0x1] %vm392_vm1, %v380_v14  ;;  %v363_v16 = vld [vmem:[#allocation2 + $0xa9] sm:$0x1]  ;;  %v1012_v19 = vld [vmem:[#allocation2 + $0x3a] sm:$0xff]  ;;  %v1150_v28 = vld [vmem:[#allocation2 + $0xb0] sm:$0xff] }
  0x2d   : > { %v757_v12 = vld [vmem:[#allocation2 + $0x60] sm:$0xff]  ;;  %478 = vst.msk [vmem:[#allocation3 + $0x8] sm:$0xff] %vm318_vm0, %v783_v8  ;;  %479 = vst.msk [vmem:[#allocation3 + $0x10] sm:$0xff] %vm318_vm0, %v784_v7  ;;  %v762_v21 = vld [vmem:[#allocation2 + $0x98] sm:$0xff]  ;;  %v4509_v25 = vpack.c.bf16 %v1012_v19, %v1011_v17 }
  0x2e   : > { %v4492_v15 = vpack.c.bf16 %v758_v9, %v757_v12  ;;  %400 = vst.msk [vmem:[#allocation2 + $0xa8] sm:$0x1] %vm392_vm1, %v363_v16  ;;  %v381_v22 = vld [vmem:[#allocation2 + $0xb8] sm:$0x1]  ;;  %v384_v23 = vld [vmem:[#allocation2 + $0x100] sm:$0x1] }
  0x2f   : > { %v1145_v18 = vld [vmem:[#allocation2 + $0x78] sm:$0xff]  ;;  %480 = vst.msk [vmem:[#allocation3 + $0x18] sm:$0xff] %vm318_vm0, %v4486_v11  ;;  %v364_v27 = vld [vmem:[#allocation2 + $0xc1] sm:$0x1]  ;;  %v367_v30 = vld [vmem:[#allocation2 + $0x109] sm:$0x1] }
  0x30   : > { %688 = vrot.lane.b32.xlu1 %v655_v6, %s4363_s30  ;;  %v4499_v20 = vpack.c.bf16 %v1146_v13, %v1145_v18  ;;  %481 = vst.msk [vmem:[#allocation3 + $0x20] sm:$0xff] %vm318_vm0, %v4492_v15  ;;  %815 = vrot.lane.b32.xlu0 %v783_v8, %s4364_s7  ;;  %v761_v24 = vld [vmem:[#allocation2 + $0x90] sm:$0xff]  ;;  %v356_v29 = vld [vmem:[#allocation2 + $0x1] sm:$0x1]  ;;  %v385_v31 = vld [vmem:[#allocation2 + $0x118] sm:$0x1] }
  0x31   : > { %418 = vst.msk [vmem:[#allocation2 + $0xb9] sm:$0x1] %vm392_vm1, %v381_v22  ;;  %421 = vst.msk [vmem:[#allocation2 + $0x101] sm:$0x1] %vm392_vm1, %v384_v23  ;;  %v4511_v26 = vpack.c.bf16 %v762_v21, %v761_v24  ;;  %v368_v34 = vld [vmem:[#allocation2 + $0x121] sm:$0x1] }
  0x32   : > { %482 = vst.msk [vmem:[#allocation3 + $0x28] sm:$0xff] %vm318_vm0, %v4499_v20  ;;  %v382_v35 = vld [vmem:[#allocation2 + $0xd0] sm:$0x1]  ;;  %v430_v36 = vld [vmem:[#allocation2 + $0x8] sm:$0xff]  ;;  %v365_v39 = vld [vmem:[#allocation2 + $0xd9] sm:$0x1] }
  0x33   : > { %401 = vst.msk [vmem:[#allocation2 + $0xc0] sm:$0x1] %vm392_vm1, %v364_v27  ;;  %393 = vst.msk [vmem:[#allocation2] sm:$0x1] %vm392_vm1, %v356_v29  ;;  %v772_v37 = vld [vmem:[#allocation2 + $0x110] sm:$0xff]  ;;  %v4340_v43 = vld [vmem:[%s6406_s1] sm:$0xff]  }
  0x34   : > { %817 = vrot.lane.b32.xlu1 %v784_v7, %s4364_s7  ;;  %404 = vst.msk [vmem:[#allocation2 + $0x108] sm:$0x1] %vm392_vm1, %v367_v30  ;;  %1073 = vrot.lane.b32.xlu0 %v655_v6, %s4365_s8  ;;  %422 = vst.msk [vmem:[#allocation2 + $0x119] sm:$0x1] %vm392_vm1, %v385_v31  ;;  %v386_v40 = vld [vmem:[#allocation2 + $0x130] sm:$0x1] }
  0x35   : > { %483 = vst.msk [vmem:[#allocation3 + $0x30] sm:$0xff] %vm318_vm0, %v4511_v26  ;;  %v1149_v32 = vld [vmem:[#allocation2 + $0xa8] sm:$0xff]  ;;  %v1400_v42 = vld [vmem:[#allocation2 + $0x52] sm:$0xff]  ;;  %4254 = vmatprep.subr.bf16.mxu0 %v4340_v43  ;;  %4310 = vmatprep.subr.bf16.mxu1 %v4340_v43  ;;  %v4222_v51 = vld [vmem:[%s4422_s26 + $0x60] sm:$0xff]  }
  0x36   : > { %v4522_v33 = vpack.c.bf16 %v1150_v28, %v1149_v32  ;;  %405 = vst.msk [vmem:[#allocation2 + $0x120] sm:$0x1] %vm392_vm1, %v368_v34  ;;  %419 = vst.msk [vmem:[#allocation2 + $0xd1] sm:$0x1] %vm392_vm1, %v382_v35  ;;  %v1399_v41 = vld [vmem:[#allocation2 + $0x4a] sm:$0xff]  ;;  %4255 = vmatpush3.bf16.msra.mxu0 %v4340_v43  ;;  %v4197_v53 = vunpack.c.l.bf16 %v4222_v51  ;;  %v4198_v54 = vunpack.c.h.bf16 %v4222_v51  ;;  %v1154_v56 = vld [vmem:[#allocation2 + $0xe0] sm:$0xff]  ;;  %4313 = vmatpush3.bf16.msra.mxu1 %v4340_v43 }
  0x37   : > { %402 = vst.msk [vmem:[#allocation2 + $0xd8] sm:$0x1] %vm392_vm1, %v365_v39  ;;  %423 = vst.msk [vmem:[#allocation2 + $0x131] sm:$0x1] %vm392_vm1, %v386_v40  ;;  %v4341_v49 = vld [vmem:[%s6406_s1 + $0x8] sm:$0xff]   ;;  %v1430_v50 = vpack.c.bf16 %v1400_v42, %v1399_v41  ;;  %v770_v8 = vld [vmem:[#allocation2 + $0xf8] sm:$0xff] }
  0x38   : > { %1075 = vrot.lane.b32.xlu1 %v4509_v25, %s4365_s8  ;;  %484 = vst.msk [vmem:[#allocation3 + $0x38] sm:$0xff] %vm318_vm0, %v4522_v33  ;;  %1203 = vrot.lane.b32.xlu0 %v784_v7, %s4366_s9  ;;  %v383_v52 = vld [vmem:[#allocation2 + $0xe8] sm:$0x1]  ;;  %v4342_v55 = vld [vmem:[%s6406_s1 + $0x10] ss:$0 sps:$4 sm:$0x33]  }
  0x39   : > { %4256 = vmatprep.subr.bf16.mxu0 %v4341_v49  ;;  %420 = vst.msk [vmem:[#allocation2 + $0xe9] sm:$0x1] %vm392_vm1, %v383_v52  ;;  %4311 = vmatprep.subr.bf16.mxu1 %v4341_v49  ;;  %v1620_v58 = vsel %vm1618_vm2, %v4342_v55, 0  ;;  %v886_v59 = vld [vmem:[#allocation2 + $0x61] sm:$0xff]  ;;  %v887_v60 = vld [vmem:[#allocation2 + $0x69] sm:$0xff]  ;;  %v890_v27 = vld [vmem:[#allocation2 + $0x91] sm:$0xff] }
  0x3a   : > { %v429_v44 = vld [vmem:[#allocation2] sm:$0xff]  ;;  %343 = vst.msk [vmem:[#allocation2 + $0x139] sm:$0xff] %vm318_vm0, %v4197_v53  ;;  %344 = vst.msk [vmem:[#allocation2 + $0x141] sm:$0xff] %vm318_vm0, %v4198_v54  ;;  %4257 = vmatpush3.bf16.msra.mxu0 %v4341_v49  ;;  %4314 = vmatpush3.bf16.msra.mxu1 %v4341_v49  ;;  %v366_v63 = vld [vmem:[#allocation2 + $0xf1] sm:$0x1]  ;;  %v915_v1 = vpack.c.bf16 %v887_v60, %v886_v59 }
  0x3b   : > { %v771_v45 = vld [vmem:[#allocation2 + $0x108] sm:$0xff]  ;;  %v461_v46 = vpack.c.bf16 %v430_v36, %v429_v44  ;;  %4316 = vmatprep.subr.msk.bf16.mxu0 %vm1618_vm2, %v4342_v55  ;;  %4317 = vmatprep.subr.msk.bf16.mxu1 %vm1618_vm2, %v4342_v55  ;;  %403 = vst.msk [vmem:[#allocation2 + $0xf0] sm:$0x1] %vm392_vm1, %v366_v63  ;;  %v1403_v17 = vld [vmem:[#allocation2 + $0x7a] sm:$0xff]  ;;  %v1019_v31 = vld [vmem:[#allocation2 + $0x92] sm:$0xff]  ;;  %vm1964_vm2 = vcmask 57344  }
  0x3c   : > { %1205 = vrot.lane.b32.xlu1 %v4486_v11, %s4366_s9  ;;  %v4536_v48 = vpack.c.bf16 %v772_v37, %v771_v45  ;;  %1461 = vrot.lane.b32.xlu0 %v4509_v25, %s4367_s14  ;;  %v4223_v0 = vld [vmem:[%s4422_s26 + $0x68] sm:$0xff]   ;;  %v891_v28 = vld [vmem:[#allocation2 + $0x99] sm:$0xff]  ;;  %v1279_v36 = vld [vmem:[#allocation2 + $0xb1] sm:$0xff] }
  0x3d   : > { %477 = vst.msk [vmem:[#allocation3] sm:$0xff] %vm318_vm0, %v461_v46  ;;  %v4201_v2 = vunpack.c.l.bf16 %v4223_v0  ;;  %v1015_v3 = vld [vmem:[#allocation2 + $0x62] sm:$0xff]  ;;  %v1016_v4 = vld [vmem:[#allocation2 + $0x6a] sm:$0xff]  ;;  %v4202_v12 = vunpack.c.h.bf16 %v4223_v0  ;;  %v917_v29 = vpack.c.bf16 %v891_v28, %v890_v27  ;;  %v1020_v32 = vld [vmem:[#allocation2 + $0x9a] sm:$0xff] }
  0x3e   : > { %488 = vst.msk [vmem:[#allocation3 + $0x58] sm:$0xff] %vm318_vm0, %v4536_v48  ;;  %4259 = vmatpush3.bf16.msra.mxu0 %v1620_v58  ;;  %4315 = vmatpush3.bf16.msra.mxu1 %v1620_v58  ;;  %v1044_v6 = vpack.c.bf16 %v1016_v4, %v1015_v3  ;;  %v1275_v13 = vld [vmem:[#allocation2 + $0x81] sm:$0xff]  ;;  %v1046_v35 = vpack.c.bf16 %v1020_v32, %v1019_v31  ;;  %v4225_v43 = vld [vmem:[%s4422_s26 + $0x78] sm:$0xff]   ;;  %v515_v54 = vld [vmem:[#allocation2 + $0x109] sm:$0xff] }
  0x3f   : > { %345 = vst.msk [vmem:[#allocation2 + $0x151] sm:$0xff] %vm318_vm0, %v4201_v2  ;;  %346 = vst.msk [vmem:[#allocation2 + $0x159] sm:$0xff] %vm318_vm0, %v4202_v12  ;;  %v1404_v18 = vld [vmem:[#allocation2 + $0x82] sm:$0xff]  ;;  %v4209_v44 = vunpack.c.l.bf16 %v4225_v43  ;;  %v1408_v45 = vld [vmem:[#allocation2 + $0xb2] sm:$0xff]  ;;  %v4210_v51 = vunpack.c.h.bf16 %v4225_v43 }
  0x40   : > { %561 = vrot.lane.b32.xlu1 %v4461_v38, %s4361_s28  ;;  %1463 = vrot.lane.b32.xlu0 %v1430_v50, %s4367_s14  ;;  %v1153_v38 = vld [vmem:[#allocation2 + $0xd8] sm:$0xff]  ;;  %v1432_v23 = vpack.c.bf16 %v1404_v18, %v1403_v17  ;;  %v894_v4 = vld [vmem:[#allocation2 + $0xc1] sm:$0xff]  ;;  %v1024_v17 = vld [vmem:[#allocation2 + $0xca] sm:$0xff] }
  0x41   : > { %v4558_v57 = vpack.c.bf16 %v1154_v56, %v1153_v38  ;;  %v369_v61 = vld [vmem:[#allocation2 + $0x139] sm:$0x1]  ;;  %v387_v62 = vld [vmem:[#allocation2 + $0x148] sm:$0x1]  ;;  %v1162_v5 = vld [vmem:[#allocation2 + $0x140] sm:$0xff]  ;;  %349 = vst.msk [vmem:[#allocation2 + $0x181] sm:$0xff] %vm318_vm0, %v4209_v44 }
  0x42   : > { %406 = vst.msk [vmem:[#allocation2 + $0x138] sm:$0x1] %vm392_vm1, %v369_v61  ;;  %424 = vst.msk [vmem:[#allocation2 + $0x149] sm:$0x1] %vm392_vm1, %v387_v62  ;;  %v769_v10 = vld [vmem:[#allocation2 + $0xf0] sm:$0xff]  ;;  %v643_v38 = vld [vmem:[#allocation2 + $0xfa] sm:$0xff] }
  0x43   : > { %486 = vst.msk [vmem:[#allocation3 + $0x48] sm:$0xff] %vm318_vm0, %v4558_v57  ;;  %354 = vst.msk [vmem:[#allocation2 + $0x199] sm:$0xff] %vm318_vm0, %v4209_v44  ;;  %v513_v49 = vld [vmem:[#allocation2 + $0xf1] sm:$0xff]  ;;  %v765_v61 = vld [vmem:[#allocation2 + $0xc0] sm:$0xff] }
  0x44   : > { %563 = vrot.lane.b32.xlu1 %v4465_v47, %s4361_s28  ;;  %690 = vrot.lane.b32.xlu0 %v4509_v25, %s4363_s30  ;;  %350 = vst.msk [vmem:[#allocation2 + $0x189] sm:$0xff] %vm318_vm0, %v4210_v51  ;;  %355 = vst.msk [vmem:[#allocation2 + $0x1a1] sm:$0xff] %vm318_vm0, %v4210_v51  ;;  %v516_v55 = vld [vmem:[#allocation2 + $0x111] sm:$0xff]  ;;  %v766_v62 = vld [vmem:[#allocation2 + $0xc8] sm:$0xff] }
  0x45   : > { %v642_v56 = vld [vmem:[#allocation2 + $0xf2] sm:$0xff]  ;;  %v4645_v59 = vpack.c.bf16 %v516_v55, %v515_v54  ;;  %v790_v0 = vpack.c.bf16 %v766_v62, %v765_v61  ;;  %v773_v12 = vld [vmem:[#allocation2 + $0x120] sm:$0xff]  ;;  %v446_v31 = vld [vmem:[#allocation2 + $0xc8] sm:$0xff] }
  0x46   : > { %v370_v14 = vld [vmem:[#allocation2 + $0x151] sm:$0x1]  ;;  %v778_v21 = vld [vmem:[#allocation2 + $0x158] sm:$0xff]  ;;  %v388_v25 = vld [vmem:[#allocation2 + $0x160] sm:$0x1]  ;;  %v4650_v60 = vpack.c.bf16 %v643_v38, %v642_v56 }
  0x47   : > { %407 = vst.msk [vmem:[#allocation2 + $0x150] sm:$0x1] %vm392_vm1, %v370_v14  ;;  %425 = vst.msk [vmem:[#allocation2 + $0x161] sm:$0x1] %vm392_vm1, %v388_v25  ;;  %v645_v2 = vld [vmem:[#allocation2 + $0x112] sm:$0xff]  ;;  %v1031_v32 = vld [vmem:[#allocation2 + $0x122] sm:$0xff] }
  0x48   : > { %692 = vrot.lane.b32.xlu1 %v1430_v50, %s4363_s30  ;;  %819 = vrot.lane.b32.xlu0 %v4486_v11, %s4364_s7  ;;  %v4581_v11 = vpack.c.bf16 %v770_v8, %v769_v10  ;;  %v372_v52 = vld [vmem:[#allocation2 + $0x181] sm:$0x1]  ;;  %v454_v54 = vld [vmem:[#allocation2 + $0x128] sm:$0xff]  ;;  %v1290_v62 = vld [vmem:[#allocation2 + $0x139] sm:$0xff] }
  0x49   : > { %v1161_v7 = vld [vmem:[#allocation2 + $0x138] sm:$0xff]  ;;  %409 = vst.msk [vmem:[#allocation2 + $0x180] sm:$0x1] %vm392_vm1, %v372_v52  ;;  %v453_v52 = vld [vmem:[#allocation2 + $0x120] sm:$0xff] }
  0x4a   : > { %v4577_v9 = vpack.c.bf16 %v1162_v5, %v1161_v7  ;;  %487 = vst.msk [vmem:[#allocation3 + $0x50] sm:$0xff] %vm318_vm0, %v4581_v11  ;;  %v373_v63 = vld [vmem:[#allocation2 + $0x199] sm:$0x1]  ;;  %v895_v5 = vld [vmem:[#allocation2 + $0xc9] sm:$0xff]  ;;  %v473_v56 = vpack.c.bf16 %v454_v54, %v453_v52 }
  0x4b   : > { %v390_v58 = vld [vmem:[#allocation2 + $0x190] sm:$0x1]  ;;  %410 = vst.msk [vmem:[#allocation2 + $0x198] sm:$0x1] %vm392_vm1, %v373_v63  ;;  %v391_v7 = vld [vmem:[#allocation2 + $0x1a8] sm:$0x1]  ;;  %v4664_v8 = vpack.c.bf16 %v895_v5, %v894_v4 }
  0x4c   : > { %821 = vrot.lane.b32.xlu1 %v4492_v15, %s4364_s7  ;;  %948 = vrot.lane.b32.xlu0 %v4465_v47, %s4360_s27  ;;  %490 = vst.msk [vmem:[#allocation3 + $0x68] sm:$0xff] %vm318_vm0, %v4577_v9  ;;  %v1274_v47 = vld [vmem:[#allocation2 + $0x79] sm:$0xff]  ;;  %489 = vst.msk [vmem:[#allocation3 + $0x60] sm:$0xff] %vm318_vm0, %v473_v56  ;;  %v1291_v63 = vld [vmem:[#allocation2 + $0x141] sm:$0xff] }
  0x4d   : > { %v1303_v16 = vpack.c.bf16 %v1275_v13, %v1274_v47  ;;  %427 = vst.msk [vmem:[#allocation2 + $0x191] sm:$0x1] %vm392_vm1, %v390_v58  ;;  %428 = vst.msk [vmem:[#allocation2 + $0x1a9] sm:$0x1] %vm392_vm1, %v391_v7  ;;  %v774_v47 = vld [vmem:[#allocation2 + $0x128] sm:$0xff]  ;;  %v1419_v7 = vld [vmem:[#allocation2 + $0x13a] sm:$0xff] }
  0x4e   : > { %v777_v19 = vld [vmem:[#allocation2 + $0x150] sm:$0xff]  ;;  %v794_v14 = vpack.c.bf16 %v774_v47, %v773_v12 }
  0x4f   : > { %v4595_v22 = vpack.c.bf16 %v778_v21, %v777_v19 }
  0x50   : > { %950 = vrot.lane.b32.xlu1 %v915_v1, %s4360_s27  ;;  %1077 = vrot.lane.b32.xlu0 %v1430_v50, %s4365_s8  ;;  %v514_v50 = vld [vmem:[#allocation2 + $0xf9] sm:$0xff] }
  0x51   : > { %491 = vst.msk [vmem:[#allocation3 + $0x70] sm:$0xff] %vm318_vm0, %v4595_v22  ;;  %v4639_v53 = vpack.c.bf16 %v514_v50, %v513_v49  ;;  %v1411_v49 = vld [vmem:[#allocation2 + $0xda] sm:$0xff]  ;;  %v1412_v50 = vld [vmem:[#allocation2 + $0xe2] sm:$0xff] }
  0x52   : > { %v4723_v55 = vpack.c.bf16 %v1412_v50, %v1411_v49 }
  0x54   : > { %1079 = vrot.lane.b32.xlu1 %v1044_v6, %s4365_s8  ;;  %1207 = vrot.lane.b32.xlu0 %v4492_v15, %s4366_s9  ;;  %v4224_v15 = vld [vmem:[%s4422_s26 + $0x70] sm:$0xff]  }
  0x55   : > { %v4205_v24 = vunpack.c.l.bf16 %v4224_v15  ;;  %v4206_v30 = vunpack.c.h.bf16 %v4224_v15  ;;  %v903_v15 = vld [vmem:[#allocation2 + $0x129] sm:$0xff] }
  0x57   : > { %347 = vst.msk [vmem:[#allocation2 + $0x169] sm:$0xff] %vm318_vm0, %v4205_v24  ;;  %348 = vst.msk [vmem:[#allocation2 + $0x171] sm:$0xff] %vm318_vm0, %v4206_v30  ;;  %v445_v30 = vld [vmem:[#allocation2 + $0xc0] sm:$0xff] }
  0x58   : > { %1209 = vrot.lane.b32.xlu1 %v4499_v20, %s4366_s9  ;;  %1336 = vrot.lane.b32.xlu0 %v915_v1, %s4362_s29 }
  0x5c   : > { %1338 = vrot.lane.b32.xlu1 %v1303_v16, %s4362_s29  ;;  %1465 = vrot.lane.b32.xlu0 %v1044_v6, %s4367_s14 }
  0x5e   : > { %v371_v34 = vld [vmem:[#allocation2 + $0x169] sm:$0x1]  ;;  %v1166_v39 = vld [vmem:[#allocation2 + $0x170] sm:$0xff]  ;;  %v389_v41 = vld [vmem:[#allocation2 + $0x178] sm:$0x1] }
  0x5f   : > { %408 = vst.msk [vmem:[#allocation2 + $0x168] sm:$0x1] %vm392_vm1, %v371_v34  ;;  %426 = vst.msk [vmem:[#allocation2 + $0x179] sm:$0x1] %vm392_vm1, %v389_v41  ;;  %v1032_v34 = vld [vmem:[#allocation2 + $0x12a] sm:$0xff]  ;;  %v1283_v41 = vld [vmem:[#allocation2 + $0xe1] sm:$0xff] }
  0x60   : > { %565 = vrot.lane.b32.xlu1 %v915_v1, %s4361_s28  ;;  %1467 = vrot.lane.b32.xlu0 %v1432_v23, %s4367_s14  ;;  %v644_v1 = vld [vmem:[#allocation2 + $0x10a] sm:$0xff] }
  0x64   : > { %567 = vrot.lane.b32.xlu1 %v1303_v16, %s4361_s28  ;;  %694 = vrot.lane.b32.xlu0 %v1044_v6, %s4363_s30 }
  0x66   : > { %v1165_v37 = vld [vmem:[#allocation2 + $0x168] sm:$0xff]  ;;  %v1424_v49 = vld [vmem:[#allocation2 + $0x172] sm:$0xff] }
  0x67   : > { %v4618_v40 = vpack.c.bf16 %v1166_v39, %v1165_v37  ;;  %v4698_v37 = vpack.c.bf16 %v1032_v34, %v1031_v32  ;;  %v1282_v39 = vld [vmem:[#allocation2 + $0xd9] sm:$0xff] }
  0x68   : > { %696 = vrot.lane.b32.xlu1 %v1432_v23, %s4363_s30  ;;  %823 = vrot.lane.b32.xlu0 %v4499_v20, %s4364_s7  ;;  %v1278_v20 = vld [vmem:[#allocation2 + $0xa9] sm:$0xff]  ;;  %v4707_v44 = vpack.c.bf16 %v1283_v41, %v1282_v39 }
  0x69   : > { %v1305_v42 = vpack.c.bf16 %v1279_v36, %v1278_v20  ;;  %492 = vst.msk [vmem:[#allocation3 + $0x78] sm:$0xff] %vm318_vm0, %v4618_v40 }
  0x6c   : > { %825 = vrot.lane.b32.xlu1 %v4511_v26, %s4364_s7  ;;  %952 = vrot.lane.b32.xlu0 %v1303_v16, %s4360_s27  ;;  %v1023_v16 = vld [vmem:[#allocation2 + $0xc2] sm:$0xff] }
  0x6d   : > { %v4675_v21 = vpack.c.bf16 %v1024_v17, %v1023_v16 }
  0x70   : > { %954 = vrot.lane.b32.xlu1 %v917_v29, %s4360_s27  ;;  %1081 = vrot.lane.b32.xlu0 %v1432_v23, %s4365_s8  ;;  %v902_v23 = vld [vmem:[#allocation2 + $0x121] sm:$0xff] }
  0x71   : > { %v4682_v27 = vpack.c.bf16 %v903_v15, %v902_v23 }
  0x74   : > { %1083 = vrot.lane.b32.xlu1 %v1046_v35, %s4365_s8  ;;  %1211 = vrot.lane.b32.xlu0 %v4511_v26, %s4366_s9  ;;  %v1407_v26 = vld [vmem:[#allocation2 + $0xaa] sm:$0xff] }
  0x75   : > { %v1434_v46 = vpack.c.bf16 %v1408_v45, %v1407_v26 }
  0x78   : > { %1213 = vrot.lane.b32.xlu1 %v4522_v33, %s4366_s9  ;;  %1340 = vrot.lane.b32.xlu0 %v917_v29, %s4362_s29 }
  0x7c   : > { %1342 = vrot.lane.b32.xlu1 %v1305_v42, %s4362_s29  ;;  %1469 = vrot.lane.b32.xlu0 %v1046_v35, %s4367_s14 }
  0x80   : > { %569 = vrot.lane.b32.xlu1 %v917_v29, %s4361_s28  ;;  %1471 = vrot.lane.b32.xlu0 %v1434_v46, %s4367_s14 }
  0x84   : > { %571 = vrot.lane.b32.xlu1 %v1305_v42, %s4361_s28  ;;  %698 = vrot.lane.b32.xlu0 %v1046_v35, %s4363_s30  ;;  %v469_v35 = vpack.c.bf16 %v446_v31, %v445_v30 }
  0x86   : > { %485 = vst.msk [vmem:[#allocation3 + $0x40] sm:$0xff] %vm318_vm0, %v469_v35  ;;  %v1035_v35 = vld [vmem:[#allocation2 + $0x152] sm:$0xff] }
  0x88   : > { %577 = vrot.lane.b32.xlu1 %v4639_v53, %s4361_s28  ;;  %700 = vrot.lane.b32.xlu0 %v1434_v46, %s4363_s30 }
  0x8c   : > { %827 = vrot.lane.b32.xlu1 %v4522_v33, %s4364_s7  ;;  %579 = vrot.lane.b32.xlu0 %v4645_v59, %s4361_s28  ;;  %v4658_v33 = vpack.c.bf16 %v645_v2, %v644_v1 }
  0x90   : > { %706 = vrot.lane.b32.xlu1 %v4650_v60, %s4363_s30  ;;  %829 = vrot.lane.b32.xlu0 %v790_v0, %s4364_s7 }
  0x91   : > { %v947_v3 = vpop.permute.xlu1 %946 }
  0x92   : > { %v558_v6 = vpop.permute.xlu0 %557 }
  0x93   : > { %606 = vst.msk [vmem:[#allocation3] sm:$0xff] %vm605_vm3, %v558_v6 }
  0x94   : > { %956 = vrot.lane.b32.xlu1 %v1305_v42, %s4360_s27  ;;  %708 = vrot.lane.b32.xlu0 %v4658_v33, %s4363_s30 }
  0x95   : > { %v1335_v10 = vpop.permute.xlu1 %1334 }
  0x96   : > { %v560_v13 = vpop.permute.xlu0 %559 }
  0x97   : > { %607 = vst.msk [vmem:[#allocation3 + $0x8] sm:$0xff] %vm605_vm3, %v560_v13 }
  0x98   : > { %835 = vrot.lane.b32.xlu1 %v4536_v48, %s4364_s7  ;;  %958 = vrot.lane.b32.xlu0 %v4664_v8, %s4360_s27 }
  0x9a   : > { %v945_v18 = vpop.permute.xlu0 %944 }
  0x9c   : > { %1085 = vrot.lane.b32.xlu1 %v1434_v46, %s4365_s8  ;;  %837 = vrot.lane.b32.xlu0 %v794_v14, %s4364_s7 }
  0x9e   : > { %v687_v19 = vpop.permute.xlu1 %686  ;;  %v1333_v24 = vpop.permute.xlu0 %1332 }
  0x9f   : > { %735 = vst.msk [vmem:[#allocation3] sm:$0xff] %vm734_vm4, %v687_v19 }
  0xa0   : > { %964 = vrot.lane.b32.xlu1 %v4645_v59, %s4360_s27  ;;  %1087 = vrot.lane.b32.xlu0 %v4675_v21, %s4365_s8 }
  0xa2   : > { %v689_v25 = vpop.permute.xlu1 %688  ;;  %v816_v28 = vpop.permute.xlu0 %815 }
  0xa3   : > { %736 = vst.msk [vmem:[#allocation3 + $0x8] sm:$0xff] %vm734_vm4, %v689_v25 }
  0xa4   : > { %1215 = vrot.lane.b32.xlu1 %v790_v0, %s4366_s9  ;;  %864 = vst.msk [vmem:[#allocation3] sm:$0xff] %vm863_vm5, %v816_v28  ;;  %966 = vrot.lane.b32.xlu0 %v4682_v27, %s4360_s27  ;;  %v907_v28 = vld [vmem:[#allocation2 + $0x159] sm:$0xff] }
  0xa5   : > { %993 = vst.msk [vmem:[#allocation3] sm:$0xff] %vm992_vm6, %v945_v18 }
  0xa6   : > { %v818_v29 = vpop.permute.xlu1 %817  ;;  %v1074_v20 = vpop.permute.xlu0 %1073 }
  0xa7   : > { %865 = vst.msk [vmem:[#allocation3 + $0x8] sm:$0xff] %vm863_vm5, %v818_v29 }
  0xa8   : > { %1093 = vrot.lane.b32.xlu1 %v4658_v33, %s4365_s8  ;;  %994 = vst.msk [vmem:[#allocation3 + $0x8] sm:$0xff] %vm992_vm6, %v947_v3  ;;  %1217 = vrot.lane.b32.xlu0 %v4558_v57, %s4366_s9  ;;  %v1311_v3 = vpack.c.bf16 %v1291_v63, %v1290_v62 }
  0xa9   : > { %1122 = vst.msk [vmem:[#allocation3] sm:$0xff] %vm1121_vm7, %v1074_v20  ;;  %v1036_v20 = vld [vmem:[#allocation2 + $0x15a] sm:$0xff] }
  0xaa   : > { %v1076_v36 = vpop.permute.xlu1 %1075  ;;  %v1204_v42 = vpop.permute.xlu0 %1203 }
  0xab   : > { %1123 = vst.msk [vmem:[#allocation3 + $0x8] sm:$0xff] %vm1121_vm7, %v1076_v36 }
  0xac   : > { %1344 = vrot.lane.b32.xlu1 %v4664_v8, %s4362_s29  ;;  %1252 = vst.msk [vmem:[#allocation3] sm:$0xff] %vm1251_vm8, %v1204_v42  ;;  %1095 = vrot.lane.b32.xlu0 %v4698_v37, %s4365_s8 }
  0xad   : > { %1381 = vst.msk [vmem:[#allocation3] sm:$0xff] %vm1380_vm9, %v1333_v24 }
  0xae   : > { %v1206_v43 = vpop.permute.xlu1 %1205  ;;  %v1462_v26 = vpop.permute.xlu0 %1461 }
  0xaf   : > { %1253 = vst.msk [vmem:[#allocation3 + $0x8] sm:$0xff] %vm1251_vm8, %v1206_v43 }
  0xb0   : > { %1223 = vrot.lane.b32.xlu1 %v794_v14, %s4366_s9  ;;  %1382 = vst.msk [vmem:[#allocation3 + $0x8] sm:$0xff] %vm1380_vm9, %v1335_v10  ;;  %1346 = vrot.lane.b32.xlu0 %v4707_v44, %s4362_s29 }
  0xb1   : > { %1510 = vst.msk [vmem:[#allocation3] sm:$0xff] %vm1509_vm10, %v1462_v26 }
  0xb2   : > { %v562_v45 = vpop.permute.xlu1 %561  ;;  %v1464_v46 = vpop.permute.xlu0 %1463 }
  0xb3   : > { %608 = vst.msk [vmem:[#allocation3 + $0x10] sm:$0xff] %vm605_vm3, %v562_v45 }
  0xb4   : > { %1473 = vrot.lane.b32.xlu1 %v4675_v21, %s4367_s14  ;;  %1511 = vst.msk [vmem:[#allocation3 + $0x8] sm:$0xff] %vm1509_vm10, %v1464_v46  ;;  %573 = vrot.lane.b32.xlu0 %v4664_v8, %s4361_s28  ;;  %v1420_v8 = vld [vmem:[#allocation2 + $0x142] sm:$0xff] }
  0xb5   : > { %v1440_v12 = vpack.c.bf16 %v1420_v8, %v1419_v7 }
  0xb6   : > { %v564_v51 = vpop.permute.xlu1 %563  ;;  %v691_v38 = vpop.permute.xlu0 %690 }
  0xb7   : > { %609 = vst.msk [vmem:[#allocation3 + $0x18] sm:$0xff] %vm605_vm3, %v564_v51 }
  0xb8   : > { %1225 = vrot.lane.b32.xlu1 %v4577_v9, %s4366_s9  ;;  %v1526_v58 = vld [vmem:[#allocation3] sm:$0xff]  ;;  %737 = vst.msk [vmem:[#allocation3 + $0x10] sm:$0xff] %vm734_vm4, %v691_v38  ;;  %1352 = vrot.lane.b32.xlu0 %v4682_v27, %s4362_s29  ;;  %v781_v38 = vld [vmem:[#allocation2 + $0x180] sm:$0xff] }
  0xb9   : > { %4260 = vmatprep.mubr.msk.bf16.mxu0 %vm1569_vm11, %v1526_v58  ;;  %v782_v58 = vld [vmem:[#allocation2 + $0x188] sm:$0xff] }
  0xba   : > { %v693_v61 = vpop.permute.xlu1 %692  ;;  %v820_v0 = vpop.permute.xlu0 %819  ;;  %v798_v62 = vpack.c.bf16 %v782_v58, %v781_v38 }
  0xbb   : > { %738 = vst.msk [vmem:[#allocation3 + $0x18] sm:$0xff] %vm734_vm4, %v693_v61  ;;  %v1527_v1 = vld [vmem:[#allocation3 + $0x8] sm:$0xff] }
  0xbc   : > { %1475 = vrot.lane.b32.xlu1 %v4723_v55, %s4367_s14  ;;  %866 = vst.msk [vmem:[#allocation3 + $0x10] sm:$0xff] %vm863_vm5, %v820_v0  ;;  %4261 = vmatmul.mubr.msk.bf16.vlgmr.msra.gmra.mrb[0].mxu0 %vm1569_vm11, %v1527_v1  ;;  %v910_v0 = vld [vmem:[#allocation2 + $0x181] sm:$0xff]  ;;  %v911_v1 = vld [vmem:[#allocation2 + $0x189] sm:$0xff] }
  0xbd   : > { %575 = vrot.lane.b32.xlu0 %v4707_v44, %s4361_s28 }
  0xbe   : > { %v822_v2 = vpop.permute.xlu1 %821  ;;  %v949_v4 = vpop.permute.xlu0 %948 }
  0xbf   : > { %867 = vst.msk [vmem:[#allocation3 + $0x18] sm:$0xff] %vm863_vm5, %v822_v2 }
  0xc0   : > { %702 = vrot.lane.b32.xlu1 %v4675_v21, %s4363_s30  ;;  %995 = vst.msk [vmem:[#allocation3 + $0x10] sm:$0xff] %vm992_vm6, %v949_v4 }
  0xc1   : > { %1354 = vrot.lane.b32.xlu0 %v1311_v3, %s4362_s29 }
  0xc2   : > { %v951_v5 = vpop.permute.xlu1 %950  ;;  %v1078_v6 = vpop.permute.xlu0 %1077 }
  0xc3   : > { %996 = vst.msk [vmem:[#allocation3 + $0x18] sm:$0xff] %vm992_vm6, %v951_v5  ;;  %v1039_v5 = vld [vmem:[#allocation2 + $0x182] sm:$0xff] }
  0xc4   : > { %1481 = vrot.lane.b32.xlu1 %v4698_v37, %s4367_s14  ;;  %1124 = vst.msk [vmem:[#allocation3 + $0x10] sm:$0xff] %vm1121_vm7, %v1078_v6  ;;  %v1040_v6 = vld [vmem:[#allocation2 + $0x18a] sm:$0xff] }
  0xc5   : > { %581 = vrot.lane.b32.xlu0 %v4682_v27, %s4361_s28  ;;  %v1056_v8 = vpack.c.bf16 %v1040_v6, %v1039_v5 }
  0xc6   : > { %v1080_v10 = vpop.permute.xlu1 %1079  ;;  %v1208_v47 = vpop.permute.xlu0 %1207 }
  0xc7   : > { %1125 = vst.msk [vmem:[#allocation3 + $0x18] sm:$0xff] %vm1121_vm7, %v1080_v10 }
  0xc8   : > { %704 = vrot.lane.b32.xlu1 %v4723_v55, %s4363_s30  ;;  %1254 = vst.msk [vmem:[#allocation3 + $0x10] sm:$0xff] %vm1251_vm8, %v1208_v47  ;;  %v1170_v47 = vld [vmem:[#allocation2 + $0x1a0] sm:$0xff] }
  0xc9   : > { %831 = vrot.lane.b32.xlu0 %v4558_v57, %s4364_s7 }
  0xca   : > { %v1210_v13 = vpop.permute.xlu1 %1209  ;;  %v1337_v14 = vpop.permute.xlu0 %1336 }
  0xcb   : > { %1255 = vst.msk [vmem:[#allocation3 + $0x18] sm:$0xff] %vm1251_vm8, %v1210_v13 }
  0xcc   : > { %1483 = vrot.lane.b32.xlu1 %v1440_v12, %s4367_s14  ;;  %1383 = vst.msk [vmem:[#allocation3 + $0x10] sm:$0xff] %vm1380_vm9, %v1337_v14 }
  0xcd   : > { %583 = vrot.lane.b32.xlu0 %v1311_v3, %s4361_s28 }
  0xce   : > { %v1339_v16 = vpop.permute.xlu1 %1338  ;;  %v1466_v17 = vpop.permute.xlu0 %1465 }
  0xcf   : > { %1384 = vst.msk [vmem:[#allocation3 + $0x18] sm:$0xff] %vm1380_vm9, %v1339_v16  ;;  %v1298_v16 = vld [vmem:[#allocation2 + $0x199] sm:$0xff] }
  0xd0   : > { %710 = vrot.lane.b32.xlu1 %v4698_v37, %s4363_s30  ;;  %1512 = vst.msk [vmem:[#allocation3 + $0x10] sm:$0xff] %vm1509_vm10, %v1466_v17  ;;  %v1299_v17 = vld [vmem:[#allocation2 + $0x1a1] sm:$0xff] }
  0xd1   : > { %833 = vrot.lane.b32.xlu0 %v4581_v11, %s4364_s7 }
  0xd2   : > { %v566_v18 = vpop.permute.xlu1 %565  ;;  %v1468_v57 = vpop.permute.xlu0 %1467 }
  0xd3   : > { %610 = vst.msk [vmem:[#allocation3 + $0x20] sm:$0xff] %vm605_vm3, %v566_v18 }
  0xd4   : > { %960 = vrot.lane.b32.xlu1 %v4707_v44, %s4360_s27  ;;  %1513 = vst.msk [vmem:[#allocation3 + $0x18] sm:$0xff] %vm1509_vm10, %v1468_v57  ;;  %v1295_v44 = vld [vmem:[#allocation2 + $0x171] sm:$0xff]  ;;  %v1315_v57 = vpack.c.bf16 %v1299_v17, %v1298_v16 }
  0xd5   : > { %712 = vrot.lane.b32.xlu0 %v1440_v12, %s4363_s30 }
  0xd6   : > { %v568_v19 = vpop.permute.xlu1 %567  ;;  %v695_v21 = vpop.permute.xlu0 %694 }
  0xd7   : > { %611 = vst.msk [vmem:[#allocation3 + $0x28] sm:$0xff] %vm605_vm3, %v568_v19  ;;  %v1528_v23 = vld [vmem:[#allocation3 + $0x10] sm:$0xff] }
  0xd8   : > { %839 = vrot.lane.b32.xlu1 %v4577_v9, %s4364_s7  ;;  %739 = vst.msk [vmem:[#allocation3 + $0x20] sm:$0xff] %vm734_vm4, %v695_v21  ;;  %4264 = vmatprep.mubr.msk.bf16.mxu0 %vm1569_vm11, %v1528_v23  ;;  %v906_v9 = vld [vmem:[#allocation2 + $0x151] sm:$0xff]  ;;  %v1427_v21 = vld [vmem:[#allocation2 + $0x19a] sm:$0xff]  ;;  %v1428_v23 = vld [vmem:[#allocation2 + $0x1a2] sm:$0xff] }
  0xd9   : > { %962 = vrot.lane.b32.xlu0 %v4639_v53, %s4360_s27  ;;  %v925_v31 = vpack.c.bf16 %v907_v28, %v906_v9 }
  0xda   : > { %v697_v15 = vpop.permute.xlu1 %696  ;;  %v824_v24 = vpop.permute.xlu0 %823 }
  0xdb   : > { %740 = vst.msk [vmem:[#allocation3 + $0x28] sm:$0xff] %vm734_vm4, %v697_v15  ;;  %v1529_v25 = vld [vmem:[#allocation3 + $0x18] sm:$0xff] }
  0xdc   : > { %1089 = vrot.lane.b32.xlu1 %v4723_v55, %s4365_s8  ;;  %868 = vst.msk [vmem:[#allocation3 + $0x20] sm:$0xff] %vm863_vm5, %v824_v24  ;;  %4265 = vmatmul.mubr.msk.bf16.gmra.mrb[4].mxu0 %vm1569_vm11, %v1529_v25  ;;  %v1444_v24 = vpack.c.bf16 %v1428_v23, %v1427_v21  ;;  %v4368_v21 = vmov 0.0  }
  0xdd   : > { %841 = vrot.lane.b32.xlu0 %v4595_v22, %s4364_s7  ;;  %3541 = vst.msk [vmem:[#allocation5] sm:$0xff] %vm1880_vm12, %v4368_v21  ;;  %3544 = vst.msk [vmem:[#allocation5 + $0x10] sm:$0xff] %vm1880_vm12, %v4368_v21 }
  0xde   : > { %v826_v27 = vpop.permute.xlu1 %825  ;;  %v953_v29 = vpop.permute.xlu0 %952  ;;  %3543 = vst.msk [vmem:[#allocation5 + $0x8] sm:$0x3] %vm3542_vm13, %v4368_v21  ;;  %3545 = vst.msk [vmem:[#allocation5 + $0x18] sm:$0x3] %vm3542_vm13, %v4368_v21 }
  0xdf   : > { %869 = vst.msk [vmem:[#allocation3 + $0x28] sm:$0xff] %vm863_vm5, %v826_v27 }
  0xe0   : > { %968 = vrot.lane.b32.xlu1 %v1311_v3, %s4360_s27  ;;  %997 = vst.msk [vmem:[#allocation3 + $0x20] sm:$0xff] %vm992_vm6, %v953_v29  ;;  %v927_v3 = vpack.c.bf16 %v911_v1, %v910_v0 }
  0xe1   : > { %1091 = vrot.lane.b32.xlu0 %v4650_v60, %s4365_s8  ;;  %3546 = vst.msk [vmem:[#allocation5 + $0x20] sm:$0xff] %vm1880_vm12, %v4368_v21  ;;  %3548 = vst.msk [vmem:[#allocation5 + $0x30] sm:$0xff] %vm1880_vm12, %v4368_v21 }
  0xe2   : > { %v955_v30 = vpop.permute.xlu1 %954  ;;  %v1082_v32 = vpop.permute.xlu0 %1081  ;;  %3547 = vst.msk [vmem:[#allocation5 + $0x28] sm:$0x3] %vm3542_vm13, %v4368_v21  ;;  %3549 = vst.msk [vmem:[#allocation5 + $0x38] sm:$0x3] %vm3542_vm13, %v4368_v21 }
  0xe3   : > { %998 = vst.msk [vmem:[#allocation3 + $0x28] sm:$0xff] %vm992_vm6, %v955_v30 }
  0xe4   : > { %1219 = vrot.lane.b32.xlu1 %v4581_v11, %s4366_s9  ;;  %1126 = vst.msk [vmem:[#allocation3 + $0x20] sm:$0xff] %vm1121_vm7, %v1082_v32  ;;  %v1054_v11 = vpack.c.bf16 %v1036_v20, %v1035_v35 }
  0xe5   : > { %970 = vrot.lane.b32.xlu0 %v925_v31, %s4360_s27  ;;  %3550 = vst.msk [vmem:[#allocation5 + $0x40] sm:$0xff] %vm1880_vm12, %v4368_v21  ;;  %3552 = vst.msk [vmem:[#allocation5 + $0x50] sm:$0xff] %vm1880_vm12, %v4368_v21 }
  0xe6   : > { %v1084_v34 = vpop.permute.xlu1 %1083  ;;  %v1212_v36 = vpop.permute.xlu0 %1211  ;;  %3551 = vst.msk [vmem:[#allocation5 + $0x48] sm:$0x3] %vm3542_vm13, %v4368_v21  ;;  %3553 = vst.msk [vmem:[#allocation5 + $0x58] sm:$0x3] %vm3542_vm13, %v4368_v21 }
  0xe7   : > { %1127 = vst.msk [vmem:[#allocation3 + $0x28] sm:$0xff] %vm1121_vm7, %v1084_v34 }
  0xe8   : > { %1097 = vrot.lane.b32.xlu1 %v1440_v12, %s4365_s8  ;;  %1256 = vst.msk [vmem:[#allocation3 + $0x20] sm:$0xff] %vm1251_vm8, %v1212_v36  ;;  %v1169_v12 = vld [vmem:[#allocation2 + $0x198] sm:$0xff] }
  0xe9   : > { %1221 = vrot.lane.b32.xlu0 %v4536_v48, %s4366_s9  ;;  %v1186_v13 = vpack.c.bf16 %v1170_v47, %v1169_v12  ;;  %3554 = vst.msk [vmem:[#allocation5 + $0x60] sm:$0xff] %vm1880_vm12, %v4368_v21  ;;  %3556 = vst.msk [vmem:[#allocation5 + $0x70] sm:$0xff] %vm1880_vm12, %v4368_v21 }
  0xea   : > { %v1214_v37 = vpop.permute.xlu1 %1213  ;;  %v1341_v39 = vpop.permute.xlu0 %1340  ;;  %3555 = vst.msk [vmem:[#allocation5 + $0x68] sm:$0x3] %vm3542_vm13, %v4368_v21  ;;  %3557 = vst.msk [vmem:[#allocation5 + $0x78] sm:$0x3] %vm3542_vm13, %v4368_v21 }
  0xeb   : > { %1257 = vst.msk [vmem:[#allocation3 + $0x28] sm:$0xff] %vm1251_vm8, %v1214_v37 }
  0xec   : > { %1348 = vrot.lane.b32.xlu1 %v4639_v53, %s4362_s29  ;;  %1385 = vst.msk [vmem:[#allocation3 + $0x20] sm:$0xff] %vm1380_vm9, %v1341_v39  ;;  %v1294_v53 = vld [vmem:[#allocation2 + $0x169] sm:$0xff] }
  0xed   : > { %1099 = vrot.lane.b32.xlu0 %v1054_v11, %s4365_s8  ;;  %3558 = vst.msk [vmem:[#allocation5 + $0x80] sm:$0xff] %vm1880_vm12, %v4368_v21  ;;  %3560 = vst.msk [vmem:[#allocation5 + $0x90] sm:$0xff] %vm1880_vm12, %v4368_v21 }
  0xee   : > { %v1343_v41 = vpop.permute.xlu1 %1342  ;;  %v1470_v42 = vpop.permute.xlu0 %1469  ;;  %3559 = vst.msk [vmem:[#allocation5 + $0x88] sm:$0x3] %vm3542_vm13, %v4368_v21  ;;  %3561 = vst.msk [vmem:[#allocation5 + $0x98] sm:$0x3] %vm3542_vm13, %v4368_v21 }
  0xef   : > { %1386 = vst.msk [vmem:[#allocation3 + $0x28] sm:$0xff] %vm1380_vm9, %v1343_v41 }
  0xf0   : > { %1227 = vrot.lane.b32.xlu1 %v4595_v22, %s4366_s9  ;;  %1514 = vst.msk [vmem:[#allocation3 + $0x20] sm:$0xff] %vm1509_vm10, %v1470_v42  ;;  %v1313_v22 = vpack.c.bf16 %v1295_v44, %v1294_v53 }
  0xf1   : > { %1350 = vrot.lane.b32.xlu0 %v4645_v59, %s4362_s29  ;;  %v1423_v59 = vld [vmem:[#allocation2 + $0x16a] sm:$0xff] }
  0xf2   : > { %v570_v43 = vpop.permute.xlu1 %569  ;;  %v1472_v48 = vpop.permute.xlu0 %1471 }
  0xf3   : > { %612 = vst.msk [vmem:[#allocation3 + $0x30] sm:$0xff] %vm605_vm3, %v570_v43 }
  0xf4   : > { %1477 = vrot.lane.b32.xlu1 %v4650_v60, %s4367_s14  ;;  %1515 = vst.msk [vmem:[#allocation3 + $0x28] sm:$0xff] %vm1509_vm10, %v1472_v48  ;;  %v1442_v60 = vpack.c.bf16 %v1424_v49, %v1423_v59 }
  0xf5   : > { %1229 = vrot.lane.b32.xlu0 %v4618_v40, %s4366_s9 }
  0xf6   : > { %v572_v26 = vpop.permute.xlu1 %571  ;;  %v699_v45 = vpop.permute.xlu0 %698 }
  0xf7   : > { %613 = vst.msk [vmem:[#allocation3 + $0x38] sm:$0xff] %vm605_vm3, %v572_v26  ;;  %v1530_v46 = vld [vmem:[#allocation3 + $0x20] sm:$0xff] }
  0xf8   : > { %1356 = vrot.lane.b32.xlu1 %v925_v31, %s4362_s29  ;;  %741 = vst.msk [vmem:[#allocation3 + $0x30] sm:$0xff] %vm734_vm4, %v699_v45  ;;  %4268 = vmatprep.mubr.msk.bf16.mxu0 %vm1569_vm11, %v1530_v46 }
  0xf9   : > { %1479 = vrot.lane.b32.xlu0 %v4658_v33, %s4367_s14 }
  0xfa   : > { %v578_v50 = vpop.permute.xlu1 %577  ;;  %v701_v51 = vpop.permute.xlu0 %700 }
  0xfb   : > { %616 = vst.msk [vmem:[#allocation3 + $0x50] sm:$0xff] %vm605_vm3, %v578_v50  ;;  %v1531_v52 = vld [vmem:[#allocation3 + $0x28] sm:$0xff] }
  0xfc   : > { %1358 = vrot.lane.b32.xlu1 %v1313_v22, %s4362_s29  ;;  %742 = vst.msk [vmem:[#allocation3 + $0x38] sm:$0xff] %vm734_vm4, %v701_v51  ;;  %4269 = vmatmul.mubr.msk.bf16.gmra.mrb[8].mxu0 %vm1569_vm11, %v1531_v52 }
  0xfd   : > { %1485 = vrot.lane.b32.xlu0 %v1054_v11, %s4367_s14 }
  0xfe   : > { %v828_v54 = vpop.permute.xlu1 %827  ;;  %v580_v55 = vpop.permute.xlu0 %579 }
  0xff   : > { %870 = vst.msk [vmem:[#allocation3 + $0x30] sm:$0xff] %vm863_vm5, %v828_v54 }
 0x100   : > { %1487 = vrot.lane.b32.xlu1 %v1442_v60, %s4367_s14  ;;  %617 = vst.msk [vmem:[#allocation3 + $0x58] sm:$0xff] %vm605_vm3, %v580_v55 }
 0x101   : > { %585 = vrot.lane.b32.xlu0 %v925_v31, %s4361_s28 }
 0x102   : > { %v707_v56 = vpop.permute.xlu1 %706  ;;  %v830_v33 = vpop.permute.xlu0 %829 }
 0x103   : > { %745 = vst.msk [vmem:[#allocation3 + $0x50] sm:$0xff] %vm734_vm4, %v707_v56 }
 0x104   : > { %587 = vrot.lane.b32.xlu1 %v1313_v22, %s4361_s28  ;;  %871 = vst.msk [vmem:[#allocation3 + $0x38] sm:$0xff] %vm863_vm5, %v830_v33 }
 0x105   : > { %714 = vrot.lane.b32.xlu0 %v1054_v11, %s4363_s30 }
 0x106   : > { %v957_v61 = vpop.permute.xlu1 %956  ;;  %v709_v63 = vpop.permute.xlu0 %708 }
 0x107   : > { %999 = vst.msk [vmem:[#allocation3 + $0x30] sm:$0xff] %vm992_vm6, %v957_v61 }
 0x108   : > { %716 = vrot.lane.b32.xlu1 %v1442_v60, %s4363_s30  ;;  %746 = vst.msk [vmem:[#allocation3 + $0x58] sm:$0xff] %vm734_vm4, %v709_v63 }
 0x109   : > { %843 = vrot.lane.b32.xlu0 %v4618_v40, %s4364_s7 }
 0x10a   : > { %v836_v2 = vpop.permute.xlu1 %835  ;;  %v959_v4 = vpop.permute.xlu0 %958 }
 0x10b   : > { %874 = vst.msk [vmem:[#allocation3 + $0x50] sm:$0xff] %vm863_vm5, %v836_v2 }
 0x10c   : > { %845 = vrot.lane.b32.xlu1 %v798_v62, %s4364_s7  ;;  %1000 = vst.msk [vmem:[#allocation3 + $0x38] sm:$0xff] %vm992_vm6, %v959_v4 }
 0x10d   : > { %972 = vrot.lane.b32.xlu0 %v1313_v22, %s4360_s27 }
 0x10e   : > { %v1086_v7 = vpop.permute.xlu1 %1085  ;;  %v838_v10 = vpop.permute.xlu0 %837 }
 0x10f   : > { %1128 = vst.msk [vmem:[#allocation3 + $0x30] sm:$0xff] %vm1121_vm7, %v1086_v7 }
 0x110   : > { %974 = vrot.lane.b32.xlu1 %v927_v3, %s4360_s27  ;;  %875 = vst.msk [vmem:[#allocation3 + $0x58] sm:$0xff] %vm863_vm5, %v838_v10 }
 0x111   : > { %1101 = vrot.lane.b32.xlu0 %v1442_v60, %s4365_s8 }
 0x112   : > { %v965_v40 = vpop.permute.xlu1 %964  ;;  %v1088_v14 = vpop.permute.xlu0 %1087 }
 0x113   : > { %1003 = vst.msk [vmem:[#allocation3 + $0x50] sm:$0xff] %vm992_vm6, %v965_v40 }
 0x114   : > { %1103 = vrot.lane.b32.xlu1 %v1056_v8, %s4365_s8  ;;  %1129 = vst.msk [vmem:[#allocation3 + $0x38] sm:$0xff] %vm1121_vm7, %v1088_v14 }
 0x115   : > { %1231 = vrot.lane.b32.xlu0 %v798_v62, %s4366_s9 }
 0x116   : > { %v1216_v18 = vpop.permute.xlu1 %1215  ;;  %v967_v19 = vpop.permute.xlu0 %966 }
 0x117   : > { %1258 = vst.msk [vmem:[#allocation3 + $0x30] sm:$0xff] %vm1251_vm8, %v1216_v18 }
 0x118   : > { %1233 = vrot.lane.b32.xlu1 %v1186_v13, %s4366_s9  ;;  %1004 = vst.msk [vmem:[#allocation3 + $0x58] sm:$0xff] %vm992_vm6, %v967_v19 }
 0x119   : > { %1360 = vrot.lane.b32.xlu0 %v927_v3, %s4362_s29 }
 0x11a   : > { %v1094_v15 = vpop.permute.xlu1 %1093  ;;  %v1218_v25 = vpop.permute.xlu0 %1217 }
 0x11b   : > { %1132 = vst.msk [vmem:[#allocation3 + $0x50] sm:$0xff] %vm1121_vm7, %v1094_v15 }
 0x11c   : > { %1362 = vrot.lane.b32.xlu1 %v1315_v57, %s4362_s29  ;;  %1259 = vst.msk [vmem:[#allocation3 + $0x38] sm:$0xff] %vm1251_vm8, %v1218_v25 }
 0x11d   : > { %1489 = vrot.lane.b32.xlu0 %v1056_v8, %s4367_s14 }
 0x11e   : > { %v1345_v27 = vpop.permute.xlu1 %1344  ;;  %v1096_v9 = vpop.permute.xlu0 %1095 }
 0x11f   : > { %1387 = vst.msk [vmem:[#allocation3 + $0x30] sm:$0xff] %vm1380_vm9, %v1345_v27 }
 0x120   : > { %1491 = vrot.lane.b32.xlu1 %v1444_v24, %s4367_s14  ;;  %1133 = vst.msk [vmem:[#allocation3 + $0x58] sm:$0xff] %vm1121_vm7, %v1096_v9 }
 0x122   : > { %v1224_v28 = vpop.permute.xlu1 %1223  ;;  %v1347_v29 = vpop.permute.xlu0 %1346 }
 0x123   : > { %1262 = vst.msk [vmem:[#allocation3 + $0x50] sm:$0xff] %vm1251_vm8, %v1224_v28  ;;  %v4948_v28 = vld [vmem:[%s6407_s2] ss:$0 sm:$0xff] }
 0x124   : > { %1388 = vst.msk [vmem:[#allocation3 + $0x38] sm:$0xff] %vm1380_vm9, %v1347_v29 }
 0x126   : > { %v1474_v30 = vpop.permute.xlu1 %1473  ;;  %v574_v31 = vpop.permute.xlu0 %573 }
 0x127   : > { %1516 = vst.msk [vmem:[#allocation3 + $0x30] sm:$0xff] %vm1509_vm10, %v1474_v30 }
 0x128   : > { %614 = vst.msk [vmem:[#allocation3 + $0x40] sm:$0xff] %vm605_vm3, %v574_v31 }
 0x12a   : > { %v1226_v32 = vpop.permute.xlu1 %1225  ;;  %v1353_v34 = vpop.permute.xlu0 %1352 }
 0x12b   : > { %1263 = vst.msk [vmem:[#allocation3 + $0x58] sm:$0xff] %vm1251_vm8, %v1226_v32 }
 0x12c   : > { %1391 = vst.msk [vmem:[#allocation3 + $0x50] sm:$0xff] %vm1380_vm9, %v1353_v34 }
 0x12e   : > { %v1476_v35 = vpop.permute.xlu1 %1475  ;;  %v1532_v20 = vld [vmem:[#allocation3 + $0x30] sm:$0xff] }
 0x12f   : > { %1517 = vst.msk [vmem:[#allocation3 + $0x38] sm:$0xff] %vm1509_vm10, %v1476_v35  ;;  %4272 = vmatprep.mubr.msk.bf16.mxu0 %vm1569_vm11, %v1532_v20  ;;  %v576_v36 = vpop.permute.xlu0 %575 }
 0x130   : > { %615 = vst.msk [vmem:[#allocation3 + $0x48] sm:$0xff] %vm605_vm3, %v576_v36 }
 0x132   : > { %v703_v37 = vpop.permute.xlu1 %702 }
 0x133   : > { %743 = vst.msk [vmem:[#allocation3 + $0x40] sm:$0xff] %vm734_vm4, %v703_v37  ;;  %v1355_v11 = vpop.permute.xlu0 %1354 }
 0x134   : > { %1392 = vst.msk [vmem:[#allocation3 + $0x58] sm:$0xff] %vm1380_vm9, %v1355_v11 }
 0x136   : > { %v1482_v39 = vpop.permute.xlu1 %1481  ;;  %v1533_v41 = vld [vmem:[#allocation3 + $0x38] sm:$0xff] }
 0x137   : > { %1520 = vst.msk [vmem:[#allocation3 + $0x50] sm:$0xff] %vm1509_vm10, %v1482_v39  ;;  %4273 = vmatmul.mubr.msk.bf16.gmra.mrb[12].mxu0 %vm1569_vm11, %v1533_v41  ;;  %v582_v42 = vpop.permute.xlu0 %581 }
 0x138   : > { %618 = vst.msk [vmem:[#allocation3 + $0x60] sm:$0xff] %vm605_vm3, %v582_v42 }
 0x13a   : > { %v705_v43 = vpop.permute.xlu1 %704 }
 0x13b   : > { %744 = vst.msk [vmem:[#allocation3 + $0x48] sm:$0xff] %vm734_vm4, %v705_v43  ;;  %v832_v48 = vpop.permute.xlu0 %831 }
 0x13c   : > { %872 = vst.msk [vmem:[#allocation3 + $0x40] sm:$0xff] %vm863_vm5, %v832_v48 }
 0x13e   : > { %v1484_v53 = vpop.permute.xlu1 %1483  ;;  %v1536_v44 = vld [vmem:[#allocation3 + $0x50] sm:$0xff] }
 0x13f   : > { %1521 = vst.msk [vmem:[#allocation3 + $0x58] sm:$0xff] %vm1509_vm10, %v1484_v53  ;;  %4280 = vmatprep.mubr.msk.bf16.mxu1 %vm1569_vm11, %v1536_v44  ;;  %v584_v26 = vpop.permute.xlu0 %583 }
 0x140   : > { %619 = vst.msk [vmem:[#allocation3 + $0x68] sm:$0xff] %vm605_vm3, %v584_v26 }
 0x142   : > { %v711_v22 = vpop.permute.xlu1 %710 }
 0x143   : > { %747 = vst.msk [vmem:[#allocation3 + $0x60] sm:$0xff] %vm734_vm4, %v711_v22  ;;  %v834_v45 = vpop.permute.xlu0 %833 }
 0x144   : > { %873 = vst.msk [vmem:[#allocation3 + $0x48] sm:$0xff] %vm863_vm5, %v834_v45 }
 0x146   : > { %v961_v46 = vpop.permute.xlu1 %960  ;;  %v1537_v59 = vld [vmem:[#allocation3 + $0x58] sm:$0xff] }
 0x147   : > { %1001 = vst.msk [vmem:[#allocation3 + $0x40] sm:$0xff] %vm992_vm6, %v961_v46  ;;  %4281 = vmatmul.mubr.msk.bf16.vlgmr.msra.gmra.mrb[0].mxu1 %vm1569_vm11, %v1537_v59  ;;  %v713_v49 = vpop.permute.xlu0 %712 }
 0x148   : > { %748 = vst.msk [vmem:[#allocation3 + $0x68] sm:$0xff] %vm734_vm4, %v713_v49 }
 0x14a   : > { %v840_v50 = vpop.permute.xlu1 %839 }
 0x14b   : > { %876 = vst.msk [vmem:[#allocation3 + $0x60] sm:$0xff] %vm863_vm5, %v840_v50  ;;  %v963_v60 = vpop.permute.xlu0 %962 }
 0x14c   : > { %1002 = vst.msk [vmem:[#allocation3 + $0x48] sm:$0xff] %vm992_vm6, %v963_v60  ;;  %v2199_v60 = vlaneseq }
 0x14e   : > { %v1090_v51 = vpop.permute.xlu1 %1089 }
 0x14f   : > { %1130 = vst.msk [vmem:[#allocation3 + $0x40] sm:$0xff] %vm1121_vm7, %v1090_v51  ;;  %v842_v52 = vpop.permute.xlu0 %841 }
 0x150   : > { %877 = vst.msk [vmem:[#allocation3 + $0x68] sm:$0xff] %vm863_vm5, %v842_v52 }
 0x152   : > { %v969_v54 = vpop.permute.xlu1 %968 }
 0x153   : > { %1005 = vst.msk [vmem:[#allocation3 + $0x60] sm:$0xff] %vm992_vm6, %v969_v54  ;;  %v1092_v55 = vpop.permute.xlu0 %1091 }
 0x154   : > { %1131 = vst.msk [vmem:[#allocation3 + $0x48] sm:$0xff] %vm1121_vm7, %v1092_v55 }
 0x156   : > { %v1220_v56 = vpop.permute.xlu1 %1219 }
 0x157   : > { %1260 = vst.msk [vmem:[#allocation3 + $0x40] sm:$0xff] %vm1251_vm8, %v1220_v56  ;;  %v971_v33 = vpop.permute.xlu0 %970  ;;  %v2200_v56 = vshrl.u32 %v2199_v60, 7 }
 0x158   : > { %1006 = vst.msk [vmem:[#allocation3 + $0x68] sm:$0xff] %vm992_vm6, %v971_v33 }
 0x159   : > { %v4982_v33 = vsub.s32 0, %v2200_v56 }
 0x15a   : > { %v1098_v38 = vpop.permute.xlu1 %1097 }
 0x15b   : > { %1134 = vst.msk [vmem:[#allocation3 + $0x60] sm:$0xff] %vm1121_vm7, %v1098_v38  ;;  %v1222_v58 = vpop.permute.xlu0 %1221  ;;  %v4984_v38 = vsub.s32 1, %v2200_v56 }
 0x15c   : > { %1261 = vst.msk [vmem:[#allocation3 + $0x48] sm:$0xff] %vm1251_vm8, %v1222_v58  ;;  %v2045_v58 = vld [vmem:[%s6408_s3] sm:$0xff] }
 0x15e   : > { %v1349_v61 = vpop.permute.xlu1 %1348 }
 0x15f   : > { %1389 = vst.msk [vmem:[#allocation3 + $0x40] sm:$0xff] %vm1380_vm9, %v1349_v61  ;;  %v1100_v62 = vpop.permute.xlu0 %1099  ;;  %v4989_v61 = vsub.s32 2, %v2200_v56 }
 0x160   : > { %1135 = vst.msk [vmem:[#allocation3 + $0x68] sm:$0xff] %vm1121_vm7, %v1100_v62  ;;  %v4991_v62 = vsub.s32 3, %v2200_v56 }
 0x162   : > { %v1228_v63 = vpop.permute.xlu1 %1227 }
 0x163   : > { %1264 = vst.msk [vmem:[#allocation3 + $0x60] sm:$0xff] %vm1251_vm8, %v1228_v63  ;;  %v1351_v0 = vpop.permute.xlu0 %1350  ;;  %v4994_v63 = vrot.slane %v2045_v58, %v4982_v33 }
 0x164   : > { %1390 = vst.msk [vmem:[#allocation3 + $0x48] sm:$0xff] %vm1380_vm9, %v1351_v0  ;;  %v4997_v0 = vrot.slane %v2045_v58, %v4984_v38 }
 0x165   : > { %6448 = vst [vmem:[#allocation7_spill] sm:$0xff] %v4994_v63 }
 0x166   : > { %v1478_v1 = vpop.permute.xlu1 %1477  ;;  %6449 = vst [vmem:[#allocation8_spill] sm:$0xff] %v4997_v0 }
 0x167   : > { %1518 = vst.msk [vmem:[#allocation3 + $0x40] sm:$0xff] %vm1509_vm10, %v1478_v1  ;;  %v1230_v2 = vpop.permute.xlu0 %1229  ;;  %v5000_v1 = vrot.slane %v2045_v58, %v4989_v61 }
 0x168   : > { %1265 = vst.msk [vmem:[#allocation3 + $0x68] sm:$0xff] %vm1251_vm8, %v1230_v2 }
 0x169   : > { %6450 = vst [vmem:[#allocation9_spill] sm:$0xff] %v5000_v1 }
 0x16a   : > { %v1357_v3 = vpop.permute.xlu1 %1356 }
 0x16b   : > { %1393 = vst.msk [vmem:[#allocation3 + $0x60] sm:$0xff] %vm1380_vm9, %v1357_v3  ;;  %v1480_v4 = vpop.permute.xlu0 %1479 }
 0x16c   : > { %1519 = vst.msk [vmem:[#allocation3 + $0x48] sm:$0xff] %vm1509_vm10, %v1480_v4  ;;  %v5002_v4 = vsub.s32 4, %v2200_v56 }
 0x16e   : > { %v1359_v5 = vpop.permute.xlu1 %1358  ;;  %v1534_v6 = vld [vmem:[#allocation3 + $0x40] sm:$0xff] }
 0x16f   : > { %1394 = vst.msk [vmem:[#allocation3 + $0x68] sm:$0xff] %vm1380_vm9, %v1359_v5  ;;  %4276 = vmatprep.mubr.msk.bf16.mxu0 %vm1569_vm11, %v1534_v6  ;;  %v1486_v7 = vpop.permute.xlu0 %1485  ;;  %v5005_v5 = vrot.slane %v2045_v58, %v4991_v62 }
 0x170   : > { %1522 = vst.msk [vmem:[#allocation3 + $0x60] sm:$0xff] %vm1509_vm10, %v1486_v7 }
 0x171   : > { %6451 = vst [vmem:[#allocation10_spill] sm:$0xff] %v5005_v5 }
 0x172   : > { %v1488_v8 = vpop.permute.xlu1 %1487 }
 0x173   : > { %1523 = vst.msk [vmem:[#allocation3 + $0x68] sm:$0xff] %vm1509_vm10, %v1488_v8  ;;  %v586_v10 = vpop.permute.xlu0 %585  ;;  %v1535_v12 = vld [vmem:[#allocation3 + $0x48] sm:$0xff] }
 0x174   : > { %620 = vst.msk [vmem:[#allocation3 + $0x70] sm:$0xff] %vm605_vm3, %v586_v10  ;;  %4277 = vmatmul.mubr.msk.bf16.gmra.mrb[16].mxu0 %vm1569_vm11, %v1535_v12 }
 0x176   : > { %v588_v47 = vpop.permute.xlu1 %587 }
 0x177   : > { %621 = vst.msk [vmem:[#allocation3 + $0x78] sm:$0xff] %vm605_vm3, %v588_v47  ;;  %v715_v40 = vpop.permute.xlu0 %714  ;;  %v1538_v13 = vld [vmem:[#allocation3 + $0x60] sm:$0xff]  ;;  %vm2275_vm3 = vcmask 1046528  }
 0x178   : > { %749 = vst.msk [vmem:[#allocation3 + $0x70] sm:$0xff] %vm734_vm4, %v715_v40  ;;  %4284 = vmatprep.mubr.msk.bf16.mxu1 %vm1569_vm11, %v1538_v13  ;;  %v5012_v40 = vrot.slane %v2045_v58, %v5002_v4  ;;  %v5017_v13 = vld [vmem:[%s6408_s3 + $0x8] sm:$0xff] }
 0x17a   : > { %v717_v14 = vpop.permute.xlu1 %716  ;;  %v1539_v16 = vld [vmem:[#allocation3 + $0x68] sm:$0xff]  ;;  %6452 = vst [vmem:[#allocation11_spill] sm:$0xff] %v5012_v40 }
 0x17b   : > { %750 = vst.msk [vmem:[#allocation3 + $0x78] sm:$0xff] %vm734_vm4, %v717_v14  ;;  %4285 = vmatmul.mubr.msk.bf16.gmra.mrb[4].mxu1 %vm1569_vm11, %v1539_v16  ;;  %v844_v17 = vpop.permute.xlu0 %843  ;;  %v5019_v14 = vsub.s32 7, %v2200_v56  ;;  %vm2428_vm4 = vcmask 1045504  }
 0x17c   : > { %878 = vst.msk [vmem:[#allocation3 + $0x70] sm:$0xff] %vm863_vm5, %v844_v17 }
 0x17e   : > { %v846_v18 = vpop.permute.xlu1 %845 }
 0x17f   : > { %879 = vst.msk [vmem:[#allocation3 + $0x78] sm:$0xff] %vm863_vm5, %v846_v18  ;;  %v973_v57 = vpop.permute.xlu0 %972 }
 0x180   : > { %1007 = vst.msk [vmem:[#allocation3 + $0x70] sm:$0xff] %vm992_vm6, %v973_v57 }
 0x182   : > { %v975_v19 = vpop.permute.xlu1 %974 }
 0x183   : > { %1008 = vst.msk [vmem:[#allocation3 + $0x78] sm:$0xff] %vm992_vm6, %v975_v19  ;;  %v1102_v23 = vpop.permute.xlu0 %1101 }
 0x184   : > { %1136 = vst.msk [vmem:[#allocation3 + $0x70] sm:$0xff] %vm1121_vm7, %v1102_v23 }
 0x186   : > { %v1104_v15 = vpop.permute.xlu1 %1103 }
 0x187   : > { %1137 = vst.msk [vmem:[#allocation3 + $0x78] sm:$0xff] %vm1121_vm7, %v1104_v15  ;;  %v1232_v24 = vpop.permute.xlu0 %1231  ;;  %v5029_v15 = vsub.s32 5, %v2200_v56 }
 0x188   : > { %1266 = vst.msk [vmem:[#allocation3 + $0x70] sm:$0xff] %vm1251_vm8, %v1232_v24  ;;  %v5031_v24 = vsub.s32 6, %v2200_v56 }
 0x18a   : > { %v1234_v25 = vpop.permute.xlu1 %1233 }
 0x18b   : > { %1267 = vst.msk [vmem:[#allocation3 + $0x78] sm:$0xff] %vm1251_vm8, %v1234_v25  ;;  %v1361_v27 = vpop.permute.xlu0 %1360 }
 0x18c   : > { %1395 = vst.msk [vmem:[#allocation3 + $0x70] sm:$0xff] %vm1380_vm9, %v1361_v27 }
 0x18e   : > { %v1363_v9 = vpop.permute.xlu1 %1362 }
 0x18f   : > { %1396 = vst.msk [vmem:[#allocation3 + $0x78] sm:$0xff] %vm1380_vm9, %v1363_v9  ;;  %v1490_v29 = vpop.permute.xlu0 %1489  ;;  %v4262_v30 = vpop.f32.mrb[0].mxu0 }
 0x190   : > { %1524 = vst.msk [vmem:[#allocation3 + $0x70] sm:$0xff] %vm1509_vm10, %v1490_v29  ;;  %v1665_v31 = vadd.f32 %v4262_v30, %v4948_v28  ;;  %v1656_v34 = vpop.f32.mrb[1].mxu0 }
 0x191   : > { %v1657_v35 = vadd.f32 %v4948_v28, %v1656_v34  ;;  %v4263_v20 = vpop.f32.mrb[2].mxu0 }
 0x192   : > { %v1492_v32 = vpop.permute.xlu1 %1491  ;;  %vm1785_vm14 = vcmp.gt.f32.partialorder %v1665_v31, 0.0  ;;  %v1817_v36 = vmul.f32 0.01, %v1665_v31  ;;  %v1668_v37 = vadd.f32 %v4263_v20, %v4948_v28  ;;  %v1659_v11 = vpop.f32.mrb[3].mxu0  ;;  %v5047_v20 = vrot.slane %v5017_v13, %v4984_v38 }
 0x193   : > { %1525 = vst.msk [vmem:[#allocation3 + $0x78] sm:$0xff] %vm1509_vm10, %v1492_v32  ;;  %vm1783_vm15 = vcmp.gt.f32.partialorder %v1657_v35, 0.0  ;;  %v1815_v39 = vmul.f32 0.01, %v1657_v35  ;;  %v1660_v41 = vadd.f32 %v4948_v28, %v1659_v11  ;;  %v5052_v11 = vrot.slane %v2045_v58, %v5019_v14 }
 0x194   : > { %v1849_v42 = vsel %vm1785_vm14, %v1665_v31, %v1817_v36  ;;  %vm1786_vm0 = vcmp.gt.f32.partialorder %v1668_v37, 0.0  ;;  %v1818_v43 = vmul.f32 0.01, %v1668_v37  ;;  %6454 = vst [vmem:[#allocation13_spill] sm:$0xff] %v5047_v20 }
 0x195   : > { %1883 = vst.msk [vmem:[#allocation4 + $0x4a] sm:$0xff] %vm1880_vm12, %v1849_v42  ;;  %v1847_v48 = vsel %vm1783_vm15, %v1657_v35, %v1815_v39  ;;  %vm1784_vm1 = vcmp.gt.f32.partialorder %v1660_v41, 0.0  ;;  %v1816_v53 = vmul.f32 0.01, %v1660_v41  ;;  %v5043_v35 = vrot.slane %v5017_v13, %v4982_v33  ;;  %6455 = vst [vmem:[#allocation14_spill] sm:$0xff] %v5052_v11 }
 0x196   : > { %1881 = vst.msk [vmem:[#allocation4 + $0x32] sm:$0xff] %vm1880_vm12, %v1847_v48  ;;  %1913 = vst.msk [vmem:[#allocation4 + $0x2] sm:$0xff] %vm1880_vm12, %v1847_v48  ;;  %v1850_v44 = vsel %vm1786_vm0, %v1668_v37, %v1818_v43 }
 0x197   : > { %1916 = vst.msk [vmem:[#allocation4 + $0x1a] sm:$0xff] %vm1880_vm12, %v1847_v48  ;;  %1884 = vst.msk [vmem:[#allocation4 + $0x52] sm:$0xff] %vm1880_vm12, %v1850_v44  ;;  %v1848_v26 = vsel %vm1784_vm1, %v1660_v41, %v1816_v53  ;;  %v1540_v22 = vld [vmem:[#allocation3 + $0x70] sm:$0xff]  ;;  %v5061_v53 = vrot.slane %v2045_v58, %v5029_v15  ;;  %v5064_v44 = vrot.slane %v2045_v58, %v5031_v24 }
 0x198   : > { %1882 = vst.msk [vmem:[#allocation4 + $0x3a] sm:$0xff] %vm1880_vm12, %v1848_v26  ;;  %1914 = vst.msk [vmem:[#allocation4 + $0xa] sm:$0xff] %vm1880_vm12, %v1848_v26  ;;  %4288 = vmatprep.mubr.msk.bf16.mxu1 %vm1569_vm11, %v1540_v22 }
 0x199   : > { %1917 = vst.msk [vmem:[#allocation4 + $0x22] sm:$0xff] %vm1880_vm12, %v1848_v26  ;;  %6453 = vst [vmem:[#allocation12_spill] sm:$0xff] %v5043_v35 }
 0x19a   : > { %v1541_v45 = vld [vmem:[#allocation3 + $0x78] sm:$0xff]  ;;  %6456 = vst [vmem:[#allocation15_spill] sm:$0xff] %v5061_v53  ;;  %6457 = vst [vmem:[#allocation16_spill] sm:$0xff] %v5064_v44 }
 0x19b   : > { %4289 = vmatmul.mubr.msk.bf16.gmra.mrb[8].mxu1 %vm1569_vm11, %v1541_v45 }
 0x19c   : > { %v1927_v46 = vld [vmem:[#allocation4 + $0x4a] sm:$0x1] }
 0x19d   : > { %1968 = vst.msk [vmem:[#allocation4 + $0x48] sm:$0x1] %vm1964_vm2, %v1927_v46  ;;  %1988 = vst.msk [vmem:[#allocation4 + $0x49] sm:$0x1] %vm1964_vm2, %v1927_v46  ;;  %v1924_v59 = vld [vmem:[#allocation4 + $0x2] sm:$0x1]  ;;  %v5068_v46 = vrot.slane %v5017_v13, %v5029_v15 }
 0x19e   : > { %v1925_v49 = vld [vmem:[#allocation4 + $0x1a] sm:$0x1]  ;;  %v1926_v50 = vld [vmem:[#allocation4 + $0x32] sm:$0x1]  ;;  %1965 = vst.msk [vmem:[#allocation4] sm:$0x1] %vm1964_vm2, %v1924_v59 }
 0x19f   : > { %1966 = vst.msk [vmem:[#allocation4 + $0x18] sm:$0x1] %vm1964_vm2, %v1925_v49  ;;  %1967 = vst.msk [vmem:[#allocation4 + $0x30] sm:$0x1] %vm1964_vm2, %v1926_v50  ;;  %v1947_v51 = vld [vmem:[#allocation4 + $0x59] sm:$0x1] }
 0x1a0   : > { %1985 = vst.msk [vmem:[#allocation4 + $0x1] sm:$0x1] %vm1964_vm2, %v1924_v59  ;;  %1986 = vst.msk [vmem:[#allocation4 + $0x19] sm:$0x1] %vm1964_vm2, %v1925_v49  ;;  %v1944_v52 = vld [vmem:[#allocation4 + $0x11] sm:$0x1]  ;;  %v5072_v59 = vrot.slane %v5017_v13, %v5031_v24 }
 0x1a1   : > { %1987 = vst.msk [vmem:[#allocation4 + $0x31] sm:$0x1] %vm1964_vm2, %v1926_v50  ;;  %2008 = vst.msk [vmem:[#allocation4 + $0x5a] sm:$0x1] %vm1964_vm2, %v1947_v51  ;;  %v1945_v54 = vld [vmem:[#allocation4 + $0x29] sm:$0x1] }
 0x1a2   : > { %2028 = vst.msk [vmem:[#allocation4 + $0x5b] sm:$0x1] %vm1964_vm2, %v1947_v51  ;;  %v1946_v55 = vld [vmem:[#allocation4 + $0x41] sm:$0x1]  ;;  %2005 = vst.msk [vmem:[#allocation4 + $0x12] sm:$0x1] %vm1964_vm2, %v1944_v52 }
 0x1a3   : > { %2006 = vst.msk [vmem:[#allocation4 + $0x2a] sm:$0x1] %vm1964_vm2, %v1945_v54  ;;  %2007 = vst.msk [vmem:[#allocation4 + $0x42] sm:$0x1] %vm1964_vm2, %v1946_v55 }
 0x1a4   : > { %2025 = vst.msk [vmem:[#allocation4 + $0x13] sm:$0x1] %vm1964_vm2, %v1944_v52  ;;  %2026 = vst.msk [vmem:[#allocation4 + $0x2b] sm:$0x1] %vm1964_vm2, %v1945_v54 }
 0x1a5   : > { %2027 = vst.msk [vmem:[#allocation4 + $0x43] sm:$0x1] %vm1964_vm2, %v1946_v55  ;;  %v2049_v2 = vld [vmem:[#allocation4] ss:$2 sm:$0xff] }
 0x1a6   : > { %v2203_v8 = vmul.f32 %v4994_v63, %v2049_v2  ;;  %v2243_v12 = vmul.f32 %v5000_v1, %v2049_v2  ;;  %v5033_v25 = vld [vmem:[#allocation4 + $0x30] ss:$2 sm:$0xff]  ;;  %v2396_v32 = vmul.f32 %v5012_v40, %v2049_v2 }
 0x1a7   : > { %v2089_v3 = vld [vmem:[#allocation4 + $0x1] ss:$2 sm:$0xff]  ;;  %v2245_v42 = vmul.f32 %v5000_v1, %v5033_v25  ;;  %v2128_v26 = vld [vmem:[#allocation4 + $0x18] ss:$2 sm:$0xff]  ;;  %v2204_v52 = vmul.f32 %v4994_v63, %v5033_v25 }
 0x1a8   : > { %v2223_v10 = vmul.f32 %v4997_v0, %v2089_v3  ;;  %v2320_v16 = vmul.f32 %v5005_v5, %v2089_v3  ;;  %v2276_v57 = vrot.slane %v2243_v12, 1  ;;  %v5054_v39 = vld [vmem:[#allocation4 + $0x31] ss:$2 sm:$0xff]  ;;  %v2429_v50 = vrot.slane %v2396_v32, 2 }
 0x1a9   : > { %v2051_v6 = vld [vmem:[#allocation4 + $0x10] ss:$2 sm:$0x3]  ;;  %v2164_v51 = vld [vmem:[#allocation4 + $0x19] ss:$2 sm:$0xff]  ;;  %v2224_v54 = vmul.f32 %v4997_v0, %v5054_v39  ;;  %v2279_v58 = vrot.slane %v2245_v42, 1  ;;  %v2513_v3 = vmul.f32 %v5052_v11, %v2128_v26  ;;  %v2473_v12 = vmul.f32 %v5061_v53, %v2128_v26 }
 0x1aa   : > { %v2244_v47 = vmul.f32 %v5000_v1, %v2051_v6  ;;  %v5024_v18 = vld [vmem:[#allocation4 + $0x40] ss:$2 sm:$0x3]  ;;  %v2231_v27 = vadd.f32 %v2223_v10, %v2203_v8  ;;  %v2352_v30 = vrot.slane %v2320_v16, 1  ;;  %v2397_v48 = vmul.f32 %v5012_v40, %v2051_v6 }
 0x1ab   : > { %v2091_v7 = vld [vmem:[#allocation4 + $0x11] ss:$2 sm:$0x3]  ;;  %v2246_v36 = vmul.f32 %v5000_v1, %v5024_v18  ;;  %v2130_v41 = vld [vmem:[#allocation4 + $0x28] ss:$2 sm:$0x3]  ;;  %v2589_v16 = vmul.f32 %v5043_v35, %v2164_v51 }
 0x1ac   : > { %v2277_v19 = vrot.slane %v2244_v47, 1  ;;  %v2321_v21 = vmul.f32 %v5005_v5, %v2091_v7  ;;  %v2166_v22 = vld [vmem:[#allocation4 + $0x29] ss:$2 sm:$0x3]  ;;  %v2430_v60 = vrot.slane %v2397_v48, 2  ;;  %v2514_v56 = vmul.f32 %v5052_v11, %v2130_v41 }
 0x1ad   : > { %v2095_v49 = vld [vmem:[#allocation4 + $0x41] ss:$2 sm:$0x3]  ;;  %v2280_v55 = vrot.slane %v2246_v36, 1  ;;  %v2590_v6 = vmul.f32 %v5043_v35, %v2166_v22  ;;  %v2322_v7 = vmul.f32 %v5005_v5, %v5054_v39  ;;  %v2545_v32 = vrot.slane %v2513_v3, 1 }
 0x1ae   : > { %v2278_v29 = vsel %vm2275_vm3, %v2276_v57, %v2277_v19  ;;  %v2353_v31 = vrot.slane %v2321_v21, 1  ;;  %v2431_v2 = vsel %vm2428_vm4, %v2429_v50, %v2430_v60  ;;  %v2323_v8 = vmul.f32 %v5005_v5, %v2095_v49 }
 0x1af   : > { %v5022_v17 = vpop.f32.mrb[4].mxu0  ;;  %v2308_v37 = vadd.f32 %v2278_v29, %v2231_v27  ;;  %v2546_v47 = vrot.slane %v2514_v56, 1  ;;  %v2666_v57 = vmul.f32 %v5047_v20, %v2130_v41  ;;  %v5090_v19 = vrot.slane %v5017_v13, %v4989_v61 }
 0x1b0   : > { %v5027_v23 = vpop.f32.mrb[5].mxu0  ;;  %v2354_v43 = vsel %vm2275_vm3, %v2352_v30, %v2353_v31  ;;  %v2281_v21 = vsel %vm2275_vm3, %v2279_v58, %v2280_v55  ;;  %v2493_v29 = vmul.f32 %v5064_v44, %v2164_v51  ;;  %v2665_v30 = vmul.f32 %v5047_v20, %v2128_v26 }
 0x1b1   : > { %v5035_v9 = vpop.f32.mrb[6].mxu0  ;;  %v2384_v45 = vadd.f32 %v2354_v43, %v2308_v37  ;;  %v2232_v31 = vadd.f32 %v2224_v54, %v2204_v52  ;;  %v2622_v36 = vrot.slane %v2590_v6, 1  ;;  %v5097_v37 = vrot.slane %v5017_v13, %v4991_v62 }
 0x1b2   : > { %v5039_v34 = vpop.f32.mrb[7].mxu0  ;;  %v2355_v42 = vrot.slane %v2322_v7, 1  ;;  %v2356_v41 = vrot.slane %v2323_v8, 1  ;;  %v5101_v48 = vrot.slane %v5017_v13, %v5002_v4  ;;  %v2621_v50 = vrot.slane %v2589_v16, 1 }
 0x1b3   : > { %v2461_v10 = vadd.f32 %v2431_v2, %v2384_v45  ;;  %6458 = vst [vmem:[#allocation17_spill] sm:$0xff] %v5097_v37  ;;  %v2309_v22 = vadd.f32 %v2281_v21, %v2232_v31  ;;  %v2547_v45 = vsel %vm2275_vm3, %v2545_v32, %v2546_v47  ;;  %v2698_v60 = vrot.slane %v2666_v57, 2 }
 0x1b4   : > { %v2398_v26 = vmul.f32 %v5012_v40, %v5033_v25  ;;  %v2399_v51 = vmul.f32 %v5012_v40, %v5024_v18  ;;  %v2697_v54 = vrot.slane %v2665_v30, 2  ;;  %v2623_v55 = vsel %vm2275_vm3, %v2621_v50, %v2622_v36 }
 0x1b5   : > { %v2481_v27 = vadd.f32 %v2473_v12, %v2461_v10  ;;  %v2741_v56 = vmul.f32 %v5090_v19, %v5033_v25  ;;  %v2761_v58 = vmul.f32 %v5097_v37, %v5054_v39  ;;  %v2782_v2 = vmul.f32 %v5101_v48, %v5024_v18 }
 0x1b6   : > { %v2781_v6 = vmul.f32 %v5101_v48, %v5033_v25  ;;  %v1681_v7 = vadd.f32 %v5022_v17, %v4948_v28  ;;  %v1673_v8 = vadd.f32 %v4948_v28, %v5027_v23  ;;  %v2699_v10 = vsel %vm2428_vm4, %v2697_v54, %v2698_v60 }
 0x1b7   : > { %v2501_v43 = vadd.f32 %v2493_v29, %v2481_v27  ;;  %v2858_v12 = vmul.f32 %v5068_v46, %v2095_v49  ;;  %v1684_v47 = vadd.f32 %v5035_v9, %v4948_v28  ;;  %v1676_v16 = vadd.f32 %v4948_v28, %v5039_v34 }
 0x1b8   : > { %vm1789_vm5 = vcmp.gt.f32.partialorder %v1681_v7, 0.0  ;;  %v1821_v21 = vmul.f32 0.01, %v1681_v7  ;;  %vm1787_vm6 = vcmp.gt.f32.partialorder %v1673_v8, 0.0  ;;  %v2814_v27 = vrot.slane %v2782_v2, 1 }
 0x1b9   : > { %v2577_v52 = vadd.f32 %v2547_v45, %v2501_v43  ;;  %v1819_v29 = vmul.f32 0.01, %v1673_v8  ;;  %vm1790_vm7 = vcmp.gt.f32.partialorder %v1684_v47, 0.0  ;;  %v1822_v17 = vmul.f32 0.01, %v1684_v47 }
 0x1ba   : > { %v1853_v23 = vsel %vm1789_vm5, %v1681_v7, %v1821_v21  ;;  %vm1788_vm8 = vcmp.gt.f32.partialorder %v1676_v16, 0.0  ;;  %v1820_v31 = vmul.f32 0.01, %v1676_v16  ;;  %v2357_v49 = vsel %vm2275_vm3, %v2355_v42, %v2356_v41  ;;  %v5142_v2 = vld [vmem:[#allocation4 + $0x58] ss:$2 sm:$0x3] }
 0x1bb   : > { %v2653_v3 = vadd.f32 %v2623_v55, %v2577_v52  ;;  %v2433_v32 = vrot.slane %v2399_v51, 2  ;;  %1887 = vst.msk [vmem:[#allocation4 + $0x7a] sm:$0xff] %vm1880_vm12, %v1853_v23  ;;  %v1851_v9 = vsel %vm1787_vm6, %v1673_v8, %v1819_v29  ;;  %v1854_v36 = vsel %vm1790_vm7, %v1684_v47, %v1822_v17  ;;  %v5137_v55 = vld [vmem:[#allocation4 + $0x48] ss:$2 sm:$0xff] }
 0x1bc   : > { %v2813_v43 = vrot.slane %v2781_v6, 1  ;;  %v2857_v45 = vmul.f32 %v5068_v46, %v5054_v39  ;;  %1885 = vst.msk [vmem:[#allocation4 + $0x62] sm:$0xff] %vm1880_vm12, %v1851_v9  ;;  %1888 = vst.msk [vmem:[#allocation4 + $0x82] sm:$0xff] %vm1880_vm12, %v1854_v36  ;;  %v1852_v50 = vsel %vm1788_vm8, %v1676_v16, %v1820_v31  ;;  %v2385_v60 = vadd.f32 %v2357_v49, %v2309_v22 }
 0x1bd   : > { %v2729_v57 = vadd.f32 %v2699_v10, %v2653_v3  ;;  %1886 = vst.msk [vmem:[#allocation4 + $0x6a] sm:$0xff] %vm1880_vm12, %v1852_v50  ;;  %v2432_v52 = vrot.slane %v2398_v26, 2  ;;  %v2890_v41 = vrot.slane %v2858_v12, 1  ;;  %v2934_v51 = vmul.f32 %v5072_v59, %v5024_v18  ;;  %v5148_v18 = vld [vmem:[%s6408_s3 + $0x10] sm:$0xff]  ;;  %v2168_v12 = vld [vmem:[#allocation4 + $0x49] ss:$2 sm:$0xff] }
 0x1be   : > { %v2815_v42 = vsel %vm2275_vm3, %v2813_v43, %v2814_v27  ;;  %v2474_v7 = vmul.f32 %v5061_v53, %v5137_v55  ;;  %v2516_v47 = vmul.f32 %v5052_v11, %v5142_v2  ;;  %v2170_v27 = vld [vmem:[#allocation4 + $0x59] ss:$2 sm:$0x3]  ;;  %v5162_v29 = vrot.slane %v5017_v13, %v5019_v14 }
 0x1bf   : > { %v2749_v30 = vadd.f32 %v2741_v56, %v2729_v57  ;;  %v2434_v39 = vsel %vm2428_vm4, %v2432_v52, %v2433_v32  ;;  %v2889_v56 = vrot.slane %v2857_v45, 1  ;;  %v2966_v3 = vrot.slane %v2934_v51, 2 }
 0x1c0   : > { %v2462_v22 = vadd.f32 %v2434_v39, %v2385_v60  ;;  %v2515_v31 = vmul.f32 %v5052_v11, %v5137_v55  ;;  %v5171_v49 = vrot.slane %v5148_v18, %v4984_v38  ;;  %v2494_v36 = vmul.f32 %v5064_v44, %v2168_v12 }
 0x1c1   : > { %v2769_v34 = vadd.f32 %v2761_v58, %v2749_v30  ;;  %v2933_v58 = vmul.f32 %v5072_v59, %v5033_v25  ;;  %v2891_v26 = vsel %vm2275_vm3, %v2889_v56, %v2890_v41  ;;  %v2549_v50 = vrot.slane %v2516_v47, 1 }
 0x1c2   : > { %v1929_v6 = vld [vmem:[#allocation4 + $0x7a] sm:$0x1]  ;;  %v2482_v17 = vadd.f32 %v2474_v7, %v2462_v22  ;;  %v2592_v60 = vmul.f32 %v5043_v35, %v2170_v27  ;;  %v3009_v38 = vmul.f32 %v5162_v29, %v5137_v55  ;;  %v2591_v39 = vmul.f32 %v5043_v35, %v2168_v12 }
 0x1c3   : > { %v2845_v54 = vadd.f32 %v2815_v42, %v2769_v34  ;;  %1970 = vst.msk [vmem:[#allocation4 + $0x78] sm:$0x1] %vm1964_vm2, %v1929_v6  ;;  %1990 = vst.msk [vmem:[#allocation4 + $0x79] sm:$0x1] %vm1964_vm2, %v1929_v6  ;;  %v1928_v25 = vld [vmem:[#allocation4 + $0x62] sm:$0x1]  ;;  %v5183_v42 = vrot.slane %v5148_v18, %v4982_v33  ;;  %v3050_v56 = vmul.f32 %v5171_v49, %v5142_v2 }
 0x1c4   : > { %v1949_v10 = vld [vmem:[#allocation4 + $0x89] sm:$0x1]  ;;  %v2965_v16 = vrot.slane %v2933_v58, 2  ;;  %1969 = vst.msk [vmem:[#allocation4 + $0x60] sm:$0x1] %vm1964_vm2, %v1928_v25  ;;  %v2502_v41 = vadd.f32 %v2494_v36, %v2482_v17  ;;  %v5191_v22 = vrot.slane %v5148_v18, %v4989_v61  ;;  %v2668_v6 = vmul.f32 %v5047_v20, %v5142_v2 }
 0x1c5   : > { %v2921_v8 = vadd.f32 %v2891_v26, %v2845_v54  ;;  %1989 = vst.msk [vmem:[#allocation4 + $0x61] sm:$0x1] %vm1964_vm2, %v1928_v25  ;;  %2010 = vst.msk [vmem:[#allocation4 + $0x8a] sm:$0x1] %vm1964_vm2, %v1949_v10  ;;  %v1948_v57 = vld [vmem:[#allocation4 + $0x71] sm:$0x1]  ;;  %v3049_v7 = vmul.f32 %v5171_v49, %v5137_v55  ;;  %v5203_v61 = vrot.slane %v5148_v18, %v4991_v62 }
 0x1c6   : > { %2030 = vst.msk [vmem:[#allocation4 + $0x8b] sm:$0x1] %vm1964_vm2, %v1949_v10  ;;  %2009 = vst.msk [vmem:[#allocation4 + $0x72] sm:$0x1] %vm1964_vm2, %v1948_v57  ;;  %v2967_v32 = vsel %vm2428_vm4, %v2965_v16, %v2966_v3  ;;  %v2548_v54 = vrot.slane %v2515_v31, 1  ;;  %v2625_v3 = vrot.slane %v2592_v60, 1  ;;  %v3126_v25 = vmul.f32 %v5191_v22, %v2170_v27 }
 0x1c7   : > { %2029 = vst.msk [vmem:[#allocation4 + $0x73] sm:$0x1] %vm1964_vm2, %v1948_v57  ;;  %v2997_v34 = vadd.f32 %v2967_v32, %v2921_v8  ;;  %v3029_v8 = vmul.f32 %v5183_v42, %v2168_v12  ;;  %v2624_v47 = vrot.slane %v2591_v39, 1  ;;  %v2667_v16 = vmul.f32 %v5047_v20, %v5137_v55 }
 0x1c8   : > { %v2550_v33 = vsel %vm2275_vm3, %v2548_v54, %v2549_v50  ;;  %v3082_v57 = vrot.slane %v3050_v56, 1  ;;  %v3202_v17 = vmul.f32 %v5203_v61, %v5142_v2  ;;  %v2701_v31 = vrot.slane %v2668_v6, 2 }
 0x1c9   : > { %v3017_v26 = vadd.f32 %v3009_v38, %v2997_v34  ;;  %v2578_v10 = vadd.f32 %v2550_v33, %v2502_v41  ;;  %v3081_v27 = vrot.slane %v3049_v7, 1  ;;  %v3158_v32 = vrot.slane %v3126_v25, 1 }
 0x1ca   : > { %v3201_v62 = vmul.f32 %v5203_v61, %v5137_v55  ;;  %v2700_v34 = vrot.slane %v2667_v16, 2  ;;  %v3234_v50 = vrot.slane %v3202_v17, 2  ;;  %v5230_v54 = vrot.slane %v5148_v18, %v5019_v14 }
 0x1cb   : > { %v5234_v39 = vrot.slane %v5148_v18, %v5002_v4  ;;  %v5239_v33 = vrot.slane %v5148_v18, %v5029_v15 }
 0x1cc   : > { %v2097_v38 = vld [vmem:[#allocation4 + $0x61] ss:$2 sm:$0xff]  ;;  %v2702_v41 = vsel %vm2428_vm4, %v2700_v34, %v2701_v31  ;;  %6460 = vst [vmem:[#allocation19_spill] sm:$0xff] %v5230_v54 }
 0x1cd   : > { %6461 = vst [vmem:[#allocation20_spill] sm:$0xff] %v5234_v39  ;;  %6462 = vst [vmem:[#allocation21_spill] sm:$0xff] %v5239_v33  ;;  %v2225_v14 = vmul.f32 %v4997_v0, %v2097_v38 }
 0x1cf   : > { %v4270_v21 = vpop.f32.mrb[8].mxu0 }
 0x1d0   : > { %v1697_v30 = vadd.f32 %v4270_v21, %v4948_v28  ;;  %v1688_v23 = vpop.f32.mrb[9].mxu0  ;;  %v3125_v21 = vmul.f32 %v5191_v22, %v2168_v12 }
 0x1d1   : > { %v1689_v13 = vadd.f32 %v4948_v28, %v1688_v23  ;;  %v4271_v9 = vpop.f32.mrb[10].mxu0  ;;  %v2626_v23 = vsel %vm2275_vm3, %v2624_v47, %v2625_v3  ;;  %v2099_v3 = vld [vmem:[#allocation4 + $0x71] ss:$2 sm:$0x3] }
 0x1d2   : > { %vm1793_vm9 = vcmp.gt.f32.partialorder %v1697_v30, 0.0  ;;  %v1825_v43 = vmul.f32 0.01, %v1697_v30  ;;  %v5176_v45 = vpop.f32.mrb[11].mxu0  ;;  %v3157_v2 = vrot.slane %v3125_v21, 1  ;;  %v5221_v55 = vadd.f32 %v4271_v9, %v4948_v28 }
 0x1d3   : > { %vm1791_vm10 = vcmp.gt.f32.partialorder %v1689_v13, 0.0  ;;  %v1823_v52 = vmul.f32 0.01, %v1689_v13  ;;  %v5248_v4 = vadd.f32 %v4948_v28, %v5176_v45  ;;  %v2860_v21 = vmul.f32 %v5068_v46, %v2099_v3 }
 0x1d4   : > { %v1857_v51 = vsel %vm1793_vm9, %v1697_v30, %v1825_v43  ;;  %v3037_v30 = vadd.f32 %v3029_v8, %v3017_v26  ;;  %v3083_v43 = vsel %vm2275_vm3, %v3081_v27, %v3082_v57  ;;  %v3159_v56 = vsel %vm2275_vm3, %v3157_v2, %v3158_v32  ;;  %v2059_v26 = vld [vmem:[#allocation4 + $0x70] ss:$2 sm:$0x3] }
 0x1d5   : > { %1891 = vst.msk [vmem:[#allocation4 + $0xaa] sm:$0xff] %vm1880_vm12, %v1857_v51  ;;  %v1855_v58 = vsel %vm1791_vm10, %v1689_v13, %v1823_v52  ;;  %v2654_v13 = vadd.f32 %v2626_v23, %v2578_v10  ;;  %v5216_v52 = vld [vmem:[#allocation4 + $0x60] ss:$2 sm:$0xff]  ;;  %v5226_v51 = vrot.slane %v5148_v18, %v5031_v24  ;;  %vm1794_vm11 = vcmp.gt.f32.partialorder %v5221_v55, 0.0 }
 0x1d6   : > { %1889 = vst.msk [vmem:[#allocation4 + $0x92] sm:$0xff] %vm1880_vm12, %v1855_v58  ;;  %v3113_v60 = vadd.f32 %v3083_v43, %v3037_v30  ;;  %v3233_v58 = vrot.slane %v3201_v62, 2  ;;  %v2205_v24 = vmul.f32 %v4994_v63, %v5216_v52  ;;  %v2742_v6 = vmul.f32 %v5090_v19, %v5216_v52 }
 0x1d7   : > { %6459 = vst [vmem:[#allocation18_spill] sm:$0xff] %v5226_v51  ;;  %v2730_v9 = vadd.f32 %v2702_v41, %v2654_v13  ;;  %v1826_v15 = vmul.f32 0.01, %v5221_v55  ;;  %v2248_v18 = vmul.f32 %v5000_v1, %v2059_v26  ;;  %v2762_v10 = vmul.f32 %v5097_v37, %v2097_v38  ;;  %v5274_v41 = vld [vmem:[%s6408_s3 + $0x18] ss:$0 sm:$0xff] }
 0x1d8   : > { %v3235_v7 = vsel %vm2428_vm4, %v3233_v58, %v3234_v50  ;;  %v3189_v8 = vadd.f32 %v3159_v56, %v3113_v60  ;;  %v2783_v47 = vmul.f32 %v5101_v48, %v5216_v52  ;;  %v2247_v16 = vmul.f32 %v5000_v1, %v5216_v52 }
 0x1d9   : > { %v2750_v25 = vadd.f32 %v2742_v6, %v2730_v9  ;;  %v2784_v45 = vmul.f32 %v5101_v48, %v2059_v26  ;;  %v2859_v57 = vmul.f32 %v5068_v46, %v2097_v38  ;;  %v2233_v17 = vadd.f32 %v2225_v14, %v2205_v24 }
 0x1da   : > { %v2324_v30 = vmul.f32 %v5005_v5, %v2097_v38  ;;  %vm1792_vm13 = vcmp.gt.f32.partialorder %v5248_v4, 0.0  ;;  %v2325_v31 = vmul.f32 %v5005_v5, %v2099_v3  ;;  %v2816_v27 = vrot.slane %v2783_v47, 1 }
 0x1db   : > { %v2770_v23 = vadd.f32 %v2762_v10, %v2750_v25  ;;  %v2817_v32 = vrot.slane %v2784_v45, 1  ;;  %v2893_v62 = vrot.slane %v2860_v21, 1  ;;  %v2283_v13 = vrot.slane %v2248_v18, 1 }
 0x1dc   : > { %v1931_v36 = vld [vmem:[#allocation4 + $0xaa] sm:$0x1]  ;;  %v3265_v34 = vadd.f32 %v3235_v7, %v3189_v8  ;;  %v3277_v43 = vmul.f32 %v5234_v39, %v5216_v52  ;;  %v2892_v50 = vrot.slane %v2859_v57, 1  ;;  %v2935_v60 = vmul.f32 %v5072_v59, %v5216_v52 }
 0x1dd   : > { %1972 = vst.msk [vmem:[#allocation4 + $0xa8] sm:$0x1] %vm1964_vm2, %v1931_v36  ;;  %1992 = vst.msk [vmem:[#allocation4 + $0xa9] sm:$0x1] %vm1964_vm2, %v1931_v36  ;;  %v1930_v12 = vld [vmem:[#allocation4 + $0x92] sm:$0x1]  ;;  %v2936_v36 = vmul.f32 %v5072_v59, %v2059_v26  ;;  %v2818_v2 = vsel %vm2275_vm3, %v2816_v27, %v2817_v32  ;;  %v3297_v9 = vmul.f32 %v5239_v33, %v2097_v38 }
 0x1de   : > { %1971 = vst.msk [vmem:[#allocation4 + $0x90] sm:$0x1] %vm1964_vm2, %v1930_v12  ;;  %1991 = vst.msk [vmem:[#allocation4 + $0x91] sm:$0x1] %vm1964_vm2, %v1930_v12  ;;  %v2282_v12 = vrot.slane %v2247_v16, 1  ;;  %v2846_v56 = vadd.f32 %v2818_v2, %v2770_v23  ;;  %v3285_v58 = vadd.f32 %v3277_v43, %v3265_v34  ;;  %v3317_v24 = vmul.f32 %v5226_v51, %v5216_v52 }
 0x1df   : > { %v2894_v14 = vsel %vm2275_vm3, %v2892_v50, %v2893_v62  ;;  %v3318_v6 = vmul.f32 %v5226_v51, %v2059_v26  ;;  %v3393_v7 = vmul.f32 %v5230_v54, %v2097_v38  ;;  %v3394_v8 = vmul.f32 %v5230_v54, %v2099_v3  ;;  %v5294_v34 = vld [vmem:[#allocation4 + $0x78] ss:$2 sm:$0xff] }
 0x1e0   : > { %v2284_v18 = vsel %vm2275_vm3, %v2282_v12, %v2283_v13  ;;  %v2922_v25 = vadd.f32 %v2894_v14, %v2846_v56  ;;  %v2969_v10 = vrot.slane %v2936_v36, 2  ;;  %v3305_v47 = vadd.f32 %v3297_v9, %v3285_v58  ;;  %v2172_v14 = vld [vmem:[#allocation4 + $0x79] ss:$2 sm:$0xff] }
 0x1e1   : > { %v3349_v16 = vrot.slane %v3317_v24, 1  ;;  %v3350_v45 = vrot.slane %v3318_v6, 1  ;;  %v3426_v57 = vrot.slane %v3394_v8, 1  ;;  %v3469_v21 = vmul.f32 %v5274_v41, %v5216_v52 }
 0x1e2   : > { %v2401_v23 = vmul.f32 %v5012_v40, %v2059_v26  ;;  %v2968_v27 = vrot.slane %v2935_v60, 2  ;;  %v3470_v32 = vmul.f32 %v5274_v41, %v2059_v26  ;;  %v1858_v38 = vsel %vm1794_vm11, %v5221_v55, %v1826_v15  ;;  %v5297_v26 = vld [vmem:[#allocation4 + $0x88] ss:$2 sm:$0x3] }
 0x1e3   : > { %v2359_v3 = vrot.slane %v2325_v31, 1  ;;  %v3351_v62 = vsel %vm2275_vm3, %v3349_v16, %v3350_v45  ;;  %v3425_v13 = vrot.slane %v3393_v7, 1  ;;  %1892 = vst.msk [vmem:[#allocation4 + $0xb2] sm:$0xff] %vm1880_vm12, %v1858_v38  ;;  %v1824_v36 = vmul.f32 0.01, %v5248_v4 }
 0x1e4   : > { %v2310_v43 = vadd.f32 %v2284_v18, %v2233_v17  ;;  %v2970_v12 = vsel %vm2428_vm4, %v2968_v27, %v2969_v10  ;;  %v3381_v2 = vadd.f32 %v3351_v62, %v3305_v47  ;;  %v3502_v50 = vrot.slane %v3470_v32, 2 }
 0x1e5   : > { %v2998_v60 = vadd.f32 %v2970_v12, %v2922_v25  ;;  %v3427_v55 = vsel %vm2275_vm3, %v3425_v13, %v3426_v57  ;;  %v3501_v15 = vrot.slane %v3469_v21, 2  ;;  %v1856_v31 = vsel %vm1792_vm13, %v5248_v4, %v1824_v36 }
 0x1e6   : > { %v2358_v56 = vrot.slane %v2324_v30, 1  ;;  %v2400_v58 = vmul.f32 %v5012_v40, %v5216_v52  ;;  %v3457_v9 = vadd.f32 %v3427_v55, %v3381_v2  ;;  %1890 = vst.msk [vmem:[#allocation4 + $0x9a] sm:$0xff] %vm1880_vm12, %v1856_v31  ;;  %v3010_v17 = vmul.f32 %v5162_v29, %v5294_v34  ;;  %v2174_v30 = vld [vmem:[#allocation4 + $0x89] ss:$2 sm:$0x3] }
 0x1e7   : > { %v3503_v24 = vsel %vm2428_vm4, %v3501_v15, %v3502_v50  ;;  %v3052_v6 = vmul.f32 %v5171_v49, %v5297_v26  ;;  %v2436_v8 = vrot.slane %v2401_v23, 2  ;;  %v3051_v52 = vmul.f32 %v5171_v49, %v5294_v34 }
 0x1e8   : > { %v2360_v7 = vsel %vm2275_vm3, %v2358_v56, %v2359_v3  ;;  %v3533_v4 = vadd.f32 %v3503_v24, %v3457_v9  ;;  %v3018_v25 = vadd.f32 %v3010_v17, %v2998_v60  ;;  %v2435_v10 = vrot.slane %v2400_v58, 2 }
 0x1e9   : > { %v2386_v18 = vadd.f32 %v2360_v7, %v2310_v43  ;;  %v3030_v16 = vmul.f32 %v5183_v42, %v2172_v14  ;;  %v3085_v45 = vrot.slane %v3052_v6, 1  ;;  %v3128_v57 = vmul.f32 %v5191_v22, %v2174_v30 }
 0x1ea   : > { %v1951_v47 = vld [vmem:[#allocation4 + $0xb9] sm:$0x1]  ;;  %3563 = vst.msk [vmem:[#allocation5 + $0x11] sm:$0xff] %vm1880_vm12, %v3533_v4  ;;  %v2437_v21 = vsel %vm2428_vm4, %v2435_v10, %v2436_v8  ;;  %v3084_v3 = vrot.slane %v3051_v52, 1  ;;  %v3127_v62 = vmul.f32 %v5191_v22, %v2172_v14  ;;  %v2475_v43 = vmul.f32 %v5061_v53, %v5294_v34 }
 0x1eb   : > { %2012 = vst.msk [vmem:[#allocation4 + $0xba] sm:$0x1] %vm1964_vm2, %v1951_v47  ;;  %2032 = vst.msk [vmem:[#allocation4 + $0xbb] sm:$0x1] %vm1964_vm2, %v1951_v47  ;;  %v2463_v23 = vadd.f32 %v2437_v21, %v2386_v18  ;;  %v3038_v27 = vadd.f32 %v3030_v16, %v3018_v25  ;;  %v2518_v2 = vmul.f32 %v5052_v11, %v5297_v26  ;;  %v3161_v60 = vrot.slane %v3128_v57, 1 }
 0x1ec   : > { %v3086_v50 = vsel %vm2275_vm3, %v3084_v3, %v3085_v45  ;;  %v3204_v55 = vmul.f32 %v5203_v61, %v5297_v26  ;;  %v2517_v58 = vmul.f32 %v5052_v11, %v5294_v34  ;;  %v3160_v9 = vrot.slane %v3127_v62, 1 }
 0x1ed   : > { %v1950_v32 = vld [vmem:[#allocation4 + $0xa1] sm:$0x1]  ;;  %v5320_v38 = vld [vmem:[#allocation4 + $0x90] ss:$2 sm:$0xff]  ;;  %v5325_v13 = vld [vmem:[#allocation4 + $0x91] ss:$2 sm:$0xff]  ;;  %v2483_v15 = vadd.f32 %v2475_v43, %v2463_v23  ;;  %v3114_v31 = vadd.f32 %v3086_v50, %v3038_v27  ;;  %v3203_v17 = vmul.f32 %v5203_v61, %v5294_v34  ;;  %v2495_v24 = vmul.f32 %v5064_v44, %v2172_v14 }
 0x1ee   : > { %2011 = vst.msk [vmem:[#allocation4 + $0xa2] sm:$0x1] %vm1964_vm2, %v1950_v32  ;;  %2031 = vst.msk [vmem:[#allocation4 + $0xa3] sm:$0x1] %vm1964_vm2, %v1950_v32  ;;  %v2206_v36 = vmul.f32 %v4994_v63, %v5320_v38  ;;  %v2226_v12 = vmul.f32 %v4997_v0, %v5325_v13  ;;  %v2552_v6 = vrot.slane %v2518_v2, 1  ;;  %v3162_v7 = vsel %vm2275_vm3, %v3160_v9, %v3161_v60 }
 0x1ef   : > { %v3237_v8 = vrot.slane %v3204_v55, 2  ;;  %v2593_v4 = vmul.f32 %v5043_v35, %v2172_v14  ;;  %v2594_v18 = vmul.f32 %v5043_v35, %v2174_v30  ;;  %v2503_v25 = vadd.f32 %v2495_v24, %v2483_v15 }
 0x1f0   : > { %v2234_v56 = vadd.f32 %v2226_v12, %v2206_v36  ;;  %v3190_v52 = vadd.f32 %v3162_v7, %v3114_v31  ;;  %v2551_v10 = vrot.slane %v2517_v58, 1  ;;  %v3236_v47 = vrot.slane %v3203_v17, 2 }
 0x1f1   : > { %v2249_v45 = vmul.f32 %v5000_v1, %v5320_v38  ;;  %v2326_v57 = vmul.f32 %v5005_v5, %v5325_v13  ;;  %v2669_v21 = vmul.f32 %v5047_v20, %v5294_v34  ;;  %v2670_v14 = vmul.f32 %v5047_v20, %v5297_v26 }
 0x1f2   : > { %v2402_v30 = vmul.f32 %v5012_v40, %v5320_v38  ;;  %v3278_v27 = vmul.f32 %v5234_v39, %v5320_v38  ;;  %v2553_v32 = vsel %vm2275_vm3, %v2551_v10, %v2552_v6  ;;  %v3238_v3 = vsel %vm2428_vm4, %v3236_v47, %v3237_v8 }
 0x1f3   : > { %v2628_v36 = vrot.slane %v2594_v18, 1  ;;  %v2579_v26 = vadd.f32 %v2553_v32, %v2503_v25  ;;  %v3266_v12 = vadd.f32 %v3238_v3, %v3190_v52  ;;  %v2285_v2 = vrot.slane %v2249_v45, 1 }
 0x1f4   : > { %v2361_v60 = vrot.slane %v2326_v57, 1  ;;  %v2627_v15 = vrot.slane %v2593_v4, 1  ;;  %v2438_v31 = vrot.slane %v2402_v30, 2  ;;  %v2704_v17 = vrot.slane %v2670_v14, 2  ;;  %v3587_v57 = vld [vmem:[#allocation5 + $0x1] sm:$0xff]  ;;  %v5380_v14 = vld [vmem:[#allocation5 + $0x11] sm:$0xff] }
 0x1f5   : > { %v5346_v16 = vld [vmem:[#allocation4 + $0xa0] ss:$2 sm:$0x3]  ;;  %v5356_v23 = vld [vmem:[#allocation4 + $0xa1] ss:$2 sm:$0x3]  ;;  %v3286_v9 = vadd.f32 %v3278_v27, %v3266_v12  ;;  %v3319_v7 = vmul.f32 %v5226_v51, %v5320_v38  ;;  %v3298_v52 = vmul.f32 %v5239_v33, %v5325_v13 }
 0x1f6   : > { %v2250_v62 = vmul.f32 %v5000_v1, %v5346_v16  ;;  %v2327_v34 = vmul.f32 %v5005_v5, %v5356_v23  ;;  %v2403_v43 = vmul.f32 %v5012_v40, %v5346_v16  ;;  %v2629_v8 = vsel %vm2275_vm3, %v2627_v15, %v2628_v36 }
 0x1f7   : > { %v2703_v10 = vrot.slane %v2669_v21, 2  ;;  %v2655_v47 = vadd.f32 %v2629_v8, %v2579_v26  ;;  %v3320_v45 = vmul.f32 %v5226_v51, %v5346_v16  ;;  %v3306_v32 = vadd.f32 %v3298_v52, %v3286_v9  ;;  %v3620_v9 = vld [vmem:[#allocation5 + $0x2] sm:$0xff] }
 0x1f8   : > { %v2286_v50 = vrot.slane %v2250_v62, 1  ;;  %v2362_v55 = vrot.slane %v2327_v34, 1  ;;  %v2439_v58 = vrot.slane %v2403_v43, 2  ;;  %v3396_v3 = vmul.f32 %v5230_v54, %v5356_v23 }
 0x1f9   : > { %v3352_v34 = vrot.slane %v3319_v7, 1  ;;  %v3353_v36 = vrot.slane %v3320_v45, 1  ;;  %v3471_v21 = vmul.f32 %v5274_v41, %v5320_v38  ;;  %v3472_v26 = vmul.f32 %v5274_v41, %v5346_v16 }
 0x1fa   : > { %v2287_v24 = vsel %vm2275_vm3, %v2285_v2, %v2286_v50  ;;  %v2363_v6 = vsel %vm2275_vm3, %v2361_v60, %v2362_v55  ;;  %v2440_v25 = vsel %vm2428_vm4, %v2438_v31, %v2439_v58  ;;  %v2705_v12 = vsel %vm2428_vm4, %v2703_v10, %v2704_v17 }
 0x1fb   : > { %v2311_v18 = vadd.f32 %v2287_v24, %v2234_v56  ;;  %v3395_v56 = vmul.f32 %v5230_v54, %v5325_v13  ;;  %v3429_v50 = vrot.slane %v3396_v3, 1  ;;  %v3595_v60 = vpack.c.bf16 %v5380_v14, %v3587_v57  ;;  %v5395_v24 = vld [vmem:[#allocation5 + $0x12] sm:$0xff] }
 0x1fc   : > { %v2731_v55 = vadd.f32 %v2705_v12, %v2655_v47  ;;  %v3354_v15 = vsel %vm2275_vm3, %v3352_v34, %v3353_v36  ;;  %v3505_v58 = vrot.slane %v3472_v26, 2  ;;  %v2785_v7 = vmul.f32 %v5101_v48, %v5320_v38 }
 0x1fd   : > { %v2387_v27 = vadd.f32 %v2363_v6, %v2311_v18  ;;  %v3428_v31 = vrot.slane %v3395_v56, 1  ;;  %v2743_v6 = vmul.f32 %v5090_v19, %v5320_v38  ;;  %v2786_v17 = vmul.f32 %v5101_v48, %v5346_v16  ;;  %3603 = vrot.lane.b32.xlu0 %v3595_v60, %s4363_s30 }
 0x1fe   : > { %v3382_v8 = vadd.f32 %v3354_v15, %v3306_v32  ;;  %v3628_v45 = vpack.c.bf16 %v5395_v24, %v3620_v9  ;;  %v2819_v60 = vrot.slane %v2785_v7, 1 }
 0x1ff   : > { %v5391_v2 = vadd.f32 %v2440_v25, %v2387_v27  ;;  %v3430_v18 = vsel %vm2275_vm3, %v3428_v31, %v3429_v50  ;;  %v3504_v25 = vrot.slane %v3471_v21, 2  ;;  %v2751_v3 = vadd.f32 %v2743_v6, %v2731_v55 }
 0x200   : > { %v3458_v47 = vadd.f32 %v3430_v18, %v3382_v8  ;;  %v2820_v21 = vrot.slane %v2786_v17, 1  ;;  %v2938_v6 = vmul.f32 %v5072_v59, %v5346_v16  ;;  %v5431_v8 = vld [vmem:[%s6407_s2] ss:$0 sm:$0xff] }
 0x201   : > { %v3506_v56 = vsel %vm2428_vm4, %v3504_v25, %v3505_v58  ;;  %3636 = vrot.lane.b32.xlu0 %v3628_v45, %s4360_s27  ;;  %v2861_v58 = vmul.f32 %v5068_v46, %v5325_v13  ;;  %6463 = vst [vmem:[#allocation22_spill] sm:$0xff] %v5431_v8 }
 0x202   : > { %v3534_v34 = vadd.f32 %v3506_v56, %v3458_v47  ;;  %v2972_v45 = vrot.slane %v2938_v6, 2 }
 0x204   : > { %3564 = vst.msk [vmem:[#allocation5 + $0x21] sm:$0xff] %vm1880_vm12, %v3534_v34 }
 0x20a   : > { %v4274_v4 = vpop.f32.mrb[12].mxu0 }
 0x20b   : > { %v1704_v30 = vpop.f32.mrb[13].mxu0  ;;  %v1713_v52 = vadd.f32 %v4274_v4, %v4948_v28  ;;  %v3571_v4 = vld [vmem:[#allocation5] sm:$0xff] }
 0x20c   : > { %v4275_v62 = vpop.f32.mrb[14].mxu0  ;;  %v1705_v10 = vadd.f32 %v4948_v28, %v1704_v30  ;;  %v3572_v30 = vld [vmem:[#allocation5 + $0x10] sm:$0xff] }
 0x20d   : > { %v1707_v43 = vpop.f32.mrb[15].mxu0  ;;  %v1716_v57 = vadd.f32 %v4275_v62, %v4948_v28  ;;  %vm1797_vm14 = vcmp.gt.f32.partialorder %v1713_v52, 0.0  ;;  %v1829_v32 = vmul.f32 0.01, %v1713_v52  ;;  %v2862_v62 = vmul.f32 %v5068_v46, %v5356_v23 }
 0x20e   : > { %v1708_v27 = vadd.f32 %v4948_v28, %v1707_v43  ;;  %vm1795_vm15 = vcmp.gt.f32.partialorder %v1705_v10, 0.0  ;;  %v1827_v36 = vmul.f32 0.01, %v1705_v10  ;;  %v2763_v28 = vmul.f32 %v5097_v37, %v5325_v13 }
 0x20f   : > { %vm1798_vm0 = vcmp.gt.f32.partialorder %v1716_v57, 0.0  ;;  %v1861_v26 = vsel %vm1797_vm14, %v1713_v52, %v1829_v32  ;;  %v1830_v12 = vmul.f32 0.01, %v1716_v57  ;;  %v3579_v15 = vpack.c.bf16 %v3572_v30, %v3571_v4 }
 0x210   : > { %vm1796_vm1 = vcmp.gt.f32.partialorder %v1708_v27, 0.0  ;;  %1895 = vst.msk [vmem:[#allocation4 + $0xda] sm:$0xff] %vm1880_vm12, %v1861_v26  ;;  %v1859_v43 = vsel %vm1795_vm15, %v1705_v10, %v1827_v36  ;;  %v1828_v50 = vmul.f32 0.01, %v1708_v27  ;;  %v2771_v31 = vadd.f32 %v2763_v28, %v2751_v3 }
 0x211   : > { %1893 = vst.msk [vmem:[#allocation4 + $0xc2] sm:$0xff] %vm1880_vm12, %v1859_v43  ;;  %v1862_v55 = vsel %vm1798_vm0, %v1716_v57, %v1830_v12  ;;  %v2821_v23 = vsel %vm2275_vm3, %v2819_v60, %v2820_v21  ;;  %3583 = vst.msk [vmem:[#allocation6] sm:$0xff] %vm1880_vm12, %v3579_v15  ;;  %v2896_v7 = vrot.slane %v2862_v62, 1  ;;  %v2895_v52 = vrot.slane %v2861_v58, 1  ;;  %v3653_v57 = vld [vmem:[#allocation5 + $0x10] sm:$0xff] }
 0x212   : > { %1896 = vst.msk [vmem:[#allocation4 + $0xe2] sm:$0xff] %vm1880_vm12, %v1862_v55  ;;  %v1860_v9 = vsel %vm1796_vm1, %v1708_v27, %v1828_v50  ;;  %v2847_v25 = vadd.f32 %v2821_v23, %v2771_v31  ;;  %v2937_v10 = vmul.f32 %v5072_v59, %v5320_v38  ;;  %v5437_v27 = vld [vmem:[#allocation5 + $0x20] sm:$0xff]  ;;  %v5456_v31 = vld [vmem:[#allocation4 + $0xb8] ss:$2 sm:$0x3] }
 0x213   : > { %1894 = vst.msk [vmem:[#allocation4 + $0xca] sm:$0xff] %vm1880_vm12, %v1860_v9  ;;  %6464 = vst [vmem:[#allocation23_spill] sm:$0xff] %v5437_v27  ;;  %v2897_v3 = vsel %vm2275_vm3, %v2895_v52, %v2896_v7  ;;  %v3661_v34 = vpack.c.bf16 %v5437_v27, %v3653_v57  ;;  %v5442_v38 = vld [vmem:[#allocation5 + $0x21] sm:$0xff] }
 0x214   : > { %6465 = vst [vmem:[#allocation24_spill] sm:$0xff] %v5442_v38  ;;  %v2923_v62 = vadd.f32 %v2897_v3, %v2847_v25  ;;  %v2971_v60 = vrot.slane %v2937_v10, 2  ;;  %v3694_v58 = vpack.c.bf16 %v5442_v38, %v5380_v14  ;;  %v5462_v23 = vld [vmem:[#allocation4 + $0xa8] ss:$2 sm:$0xff]  ;;  %v3054_v14 = vmul.f32 %v5171_v49, %v5456_v31 }
 0x215   : > { %3669 = vrot.lane.b32.xlu0 %v3661_v34, %s4366_s9  ;;  %v5465_v7 = vld [vmem:[#allocation5 + $0x22] sm:$0xff]  ;;  %v3011_v25 = vmul.f32 %v5162_v29, %v5462_v23  ;;  %v2178_v10 = vld [vmem:[#allocation4 + $0xb9] ss:$2 sm:$0x3] }
 0x216   : > { %v2973_v6 = vsel %vm2428_vm4, %v2971_v60, %v2972_v45  ;;  %6466 = vst [vmem:[#allocation25_spill] sm:$0xff] %v5465_v7  ;;  %v3727_v52 = vpack.c.bf16 %v5465_v7, %v5395_v24  ;;  %v3088_v45 = vrot.slane %v3054_v14, 1 }
 0x217   : > { %v1933_v36 = vld [vmem:[#allocation4 + $0xda] sm:$0x1] }
 0x218   : > { %v1932_v4 = vld [vmem:[#allocation4 + $0xc2] sm:$0x1]  ;;  %1974 = vst.msk [vmem:[#allocation4 + $0xd8] sm:$0x1] %vm1964_vm2, %v1933_v36  ;;  %1994 = vst.msk [vmem:[#allocation4 + $0xd9] sm:$0x1] %vm1964_vm2, %v1933_v36 }
 0x219   : > { %1973 = vst.msk [vmem:[#allocation4 + $0xc0] sm:$0x1] %vm1964_vm2, %v1932_v4  ;;  %1993 = vst.msk [vmem:[#allocation4 + $0xc1] sm:$0x1] %vm1964_vm2, %v1932_v4  ;;  %v1953_v21 = vld [vmem:[#allocation4 + $0xe9] sm:$0x1]  ;;  %3702 = vrot.lane.b32.xlu0 %v3694_v58, %s4367_s14 }
 0x21a   : > { %v4282_v17 = vpop.f32.mrb[0].mxu1  ;;  %2014 = vst.msk [vmem:[#allocation4 + $0xea] sm:$0x1] %vm1964_vm2, %v1953_v21  ;;  %2034 = vst.msk [vmem:[#allocation4 + $0xeb] sm:$0x1] %vm1964_vm2, %v1953_v21  ;;  %v2476_v21 = vmul.f32 %v5061_v53, %v5462_v23 }
 0x21b   : > { %v1745_v13 = vadd.f32 %v5431_v8, %v4282_v17  ;;  %v1736_v18 = vpop.f32.mrb[1].mxu1  ;;  %v1952_v43 = vld [vmem:[#allocation4 + $0xd1] sm:$0x1] }
 0x21c   : > { %v1737_v16 = vadd.f32 %v5431_v8, %v1736_v18  ;;  %v4283_v47 = vpop.f32.mrb[2].mxu1  ;;  %2013 = vst.msk [vmem:[#allocation4 + $0xd2] sm:$0x1] %vm1964_vm2, %v1952_v43  ;;  %2033 = vst.msk [vmem:[#allocation4 + $0xd3] sm:$0x1] %vm1964_vm2, %v1952_v43  ;;  %v2520_v43 = vmul.f32 %v5052_v11, %v5456_v31  ;;  %v2484_v14 = vadd.f32 %v2476_v21, %v5391_v2 }
 0x21d   : > { %vm1805_vm5 = vcmp.gt.f32.partialorder %v1745_v13, 0.0  ;;  %v1837_v56 = vmul.f32 0.01, %v1745_v13  ;;  %v1748_v32 = vadd.f32 %v5431_v8, %v4283_v47  ;;  %v1739_v30 = vpop.f32.mrb[3].mxu1  ;;  %v5472_v18 = vld [vmem:[#allocation4 + $0xa9] ss:$2 sm:$0xff]  ;;  %3735 = vrot.lane.b32.xlu0 %v3727_v52, %s4369_s10  ;;  %v3053_v47 = vmul.f32 %v5171_v49, %v5462_v23 }
 0x21e   : > { %vm1803_vm6 = vcmp.gt.f32.partialorder %v1737_v16, 0.0  ;;  %v1835_v12 = vmul.f32 0.01, %v1737_v16  ;;  %v1740_v28 = vadd.f32 %v5431_v8, %v1739_v30  ;;  %v3129_v57 = vmul.f32 %v5191_v22, %v5472_v18 }
 0x21f   : > { %v1869_v26 = vsel %vm1805_vm5, %v1745_v13, %v1837_v56  ;;  %vm1806_vm7 = vcmp.gt.f32.partialorder %v1748_v32, 0.0  ;;  %v1838_v50 = vmul.f32 0.01, %v1748_v32  ;;  %v2999_v13 = vadd.f32 %v2973_v6, %v2923_v62 }
 0x220   : > { %1903 = vst.msk [vmem:[#allocation4 + $0x13a] sm:$0xff] %vm1880_vm12, %v1869_v26  ;;  %v1867_v55 = vsel %vm1803_vm6, %v1737_v16, %v1835_v12  ;;  %vm1804_vm8 = vcmp.gt.f32.partialorder %v1740_v28, 0.0  ;;  %v1836_v15 = vmul.f32 0.01, %v1740_v28  ;;  %v3031_v56 = vmul.f32 %v5183_v42, %v5472_v18  ;;  %v5486_v3 = vld [vmem:[#allocation4 + $0xc0] ss:$2 sm:$0xff] }
 0x221   : > { %1901 = vst.msk [vmem:[#allocation4 + $0x122] sm:$0xff] %vm1880_vm12, %v1867_v55  ;;  %v1870_v9 = vsel %vm1806_vm7, %v1748_v32, %v1838_v50  ;;  %v3019_v16 = vadd.f32 %v3011_v25, %v2999_v13  ;;  %v3130_v32 = vmul.f32 %v5191_v22, %v2178_v10  ;;  %v5488_v24 = vld [vmem:[#allocation4 + $0xc1] ss:$2 sm:$0xff]  ;;  %v2496_v26 = vmul.f32 %v5064_v44, %v5472_v18 }
 0x222   : > { %1904 = vst.msk [vmem:[#allocation4 + $0x142] sm:$0xff] %vm1880_vm12, %v1870_v9  ;;  %v1868_v17 = vsel %vm1804_vm8, %v1740_v28, %v1836_v15  ;;  %v2519_v12 = vmul.f32 %v5052_v11, %v5462_v23  ;;  %v3087_v50 = vrot.slane %v3053_v47, 1  ;;  %v3163_v60 = vrot.slane %v3129_v57, 1 }
 0x223   : > { %1902 = vst.msk [vmem:[#allocation4 + $0x12a] sm:$0xff] %vm1880_vm12, %v1868_v17  ;;  %v3039_v28 = vadd.f32 %v3031_v56, %v3019_v16  ;;  %v5498_v62 = vld [vmem:[#allocation4 + $0xd0] ss:$2 sm:$0x3]  ;;  %v3205_v55 = vmul.f32 %v5203_v61, %v5462_v23  ;;  %v3164_v58 = vrot.slane %v3130_v32, 1  ;;  %v3206_v9 = vmul.f32 %v5203_v61, %v5456_v31 }
 0x224   : > { %v5510_v15 = vld [vmem:[#allocation4 + $0xd1] ss:$2 sm:$0x3]  ;;  %v2207_v6 = vmul.f32 %v4994_v63, %v5486_v3  ;;  %v2227_v17 = vmul.f32 %v4997_v0, %v5488_v24  ;;  %v3089_v13 = vsel %vm2275_vm3, %v3087_v50, %v3088_v45  ;;  %v2251_v25 = vmul.f32 %v5000_v1, %v5486_v3 }
 0x225   : > { %v2252_v52 = vmul.f32 %v5000_v1, %v5498_v62  ;;  %v3115_v16 = vadd.f32 %v3089_v13, %v3039_v28  ;;  %v2328_v57 = vmul.f32 %v5005_v5, %v5488_v24  ;;  %v2329_v56 = vmul.f32 %v5005_v5, %v5510_v15 }
 0x226   : > { %v2235_v47 = vadd.f32 %v2227_v17, %v2207_v6  ;;  %v2288_v32 = vrot.slane %v2251_v25, 1  ;;  %v2404_v45 = vmul.f32 %v5012_v40, %v5486_v3  ;;  %v2405_v2 = vmul.f32 %v5012_v40, %v5498_v62 }
 0x227   : > { %v1937_v34 = vld [vmem:[#allocation4 + $0x13a] sm:$0x1]  ;;  %v2365_v21 = vrot.slane %v2329_v56, 1  ;;  %v3165_v28 = vsel %vm2275_vm3, %v3163_v60, %v3164_v58  ;;  %v2555_v13 = vrot.slane %v2520_v43, 1  ;;  %v3239_v8 = vrot.slane %v3205_v55, 2 }
 0x228   : > { %1978 = vst.msk [vmem:[#allocation4 + $0x138] sm:$0x1] %vm1964_vm2, %v1937_v34  ;;  %1998 = vst.msk [vmem:[#allocation4 + $0x139] sm:$0x1] %vm1964_vm2, %v1937_v34  ;;  %v1936_v36 = vld [vmem:[#allocation4 + $0x122] sm:$0x1]  ;;  %v3191_v7 = vadd.f32 %v3165_v28, %v3115_v16  ;;  %v2504_v38 = vadd.f32 %v2496_v26, %v2484_v14  ;;  %v2672_v60 = vmul.f32 %v5047_v20, %v5456_v31 }
 0x229   : > { %v1957_v4 = vld [vmem:[#allocation4 + $0x149] sm:$0x1]  ;;  %1977 = vst.msk [vmem:[#allocation4 + $0x120] sm:$0x1] %vm1964_vm2, %v1936_v36  ;;  %1997 = vst.msk [vmem:[#allocation4 + $0x121] sm:$0x1] %vm1964_vm2, %v1936_v36  ;;  %v2596_v36 = vmul.f32 %v5043_v35, %v2178_v10  ;;  %v2595_v10 = vmul.f32 %v5043_v35, %v5472_v18  ;;  %v3279_v26 = vmul.f32 %v5234_v39, %v5486_v3 }
 0x22a   : > { %v1956_v30 = vld [vmem:[#allocation4 + $0x131] sm:$0x1]  ;;  %2018 = vst.msk [vmem:[#allocation4 + $0x14a] sm:$0x1] %vm1964_vm2, %v1957_v4  ;;  %2038 = vst.msk [vmem:[#allocation4 + $0x14b] sm:$0x1] %vm1964_vm2, %v1957_v4  ;;  %v3321_v18 = vmul.f32 %v5226_v51, %v5486_v3  ;;  %v3397_v31 = vmul.f32 %v5230_v54, %v5488_v24 }
 0x22b   : > { %2017 = vst.msk [vmem:[#allocation4 + $0x132] sm:$0x1] %vm1964_vm2, %v1956_v30  ;;  %2037 = vst.msk [vmem:[#allocation4 + $0x133] sm:$0x1] %vm1964_vm2, %v1956_v30  ;;  %v2289_v34 = vrot.slane %v2252_v52, 1  ;;  %v3240_v4 = vrot.slane %v3206_v9, 2 }
 0x22c   : > { %v2364_v30 = vrot.slane %v2328_v57, 1  ;;  %v2441_v6 = vrot.slane %v2404_v45, 2  ;;  %v2442_v17 = vrot.slane %v2405_v2, 2  ;;  %v2554_v27 = vrot.slane %v2519_v12, 1 }
 0x22d   : > { %v2290_v50 = vsel %vm2275_vm3, %v2288_v32, %v2289_v34  ;;  %v2631_v57 = vrot.slane %v2596_v36, 1  ;;  %v3241_v58 = vsel %vm2428_vm4, %v3239_v8, %v3240_v4  ;;  %v2671_v12 = vmul.f32 %v5047_v20, %v5462_v23 }
 0x22e   : > { %v2312_v25 = vadd.f32 %v2290_v50, %v2235_v47  ;;  %v2366_v52 = vsel %vm2275_vm3, %v2364_v30, %v2365_v21  ;;  %v2443_v40 = vsel %vm2428_vm4, %v2441_v6, %v2442_v17  ;;  %v2556_v43 = vsel %vm2275_vm3, %v2554_v27, %v2555_v13 }
 0x22f   : > { %v3267_v16 = vadd.f32 %v3241_v58, %v3191_v7  ;;  %v2580_v55 = vadd.f32 %v2556_v43, %v2504_v38  ;;  %v2630_v14 = vrot.slane %v2595_v10, 1  ;;  %v3299_v8 = vmul.f32 %v5239_v33, %v5488_v24 }
 0x230   : > { %v2388_v9 = vadd.f32 %v2366_v52, %v2312_v25  ;;  %v2707_v27 = vrot.slane %v2672_v60, 2  ;;  %v3398_v7 = vmul.f32 %v5230_v54, %v5510_v15  ;;  %v3355_v32 = vrot.slane %v3321_v18, 1  ;;  %v2180_v18 = vld [vmem:[#allocation4 + $0xd9] ss:$2 sm:$0xff] }
 0x231   : > { %v3287_v56 = vadd.f32 %v3279_v26, %v3267_v16  ;;  %v2632_v38 = vsel %vm2275_vm3, %v2630_v14, %v2631_v57  ;;  %v3473_v36 = vmul.f32 %v5274_v41, %v5486_v3  ;;  %v3474_v4 = vmul.f32 %v5274_v41, %v5498_v62  ;;  %v2144_v26 = vld [vmem:[#allocation4 + $0xd8] ss:$2 sm:$0xff]  ;;  %v2182_v14 = vld [vmem:[#allocation4 + $0xe9] ss:$2 sm:$0x3] }
 0x232   : > { %v5543_v47 = vadd.f32 %v2443_v40, %v2388_v9  ;;  %v3322_v40 = vmul.f32 %v5226_v51, %v5498_v62  ;;  %v2656_v45 = vadd.f32 %v2632_v38, %v2580_v55  ;;  %v3432_v2 = vrot.slane %v3398_v7, 1  ;;  %v6467_v54 = vld [vmem:[#allocation23_spill] sm:$0xff] }
 0x233   : > { %v3307_v23 = vadd.f32 %v3299_v8, %v3287_v56  ;;  %v2706_v30 = vrot.slane %v2671_v12, 2  ;;  %v3431_v28 = vrot.slane %v3397_v31, 1  ;;  %v2744_v50 = vmul.f32 %v5090_v19, %v5486_v3  ;;  %v2146_v12 = vld [vmem:[#allocation4 + $0xe8] ss:$2 sm:$0x3] }
 0x234   : > { %v3356_v34 = vrot.slane %v3322_v40, 1  ;;  %v3508_v17 = vrot.slane %v3474_v4, 2  ;;  %v2788_v25 = vmul.f32 %v5101_v48, %v5498_v62  ;;  %v3507_v10 = vrot.slane %v3473_v36, 2 }
 0x235   : > { %v2708_v13 = vsel %vm2428_vm4, %v2706_v30, %v2707_v27  ;;  %v3433_v52 = vsel %vm2275_vm3, %v3431_v28, %v3432_v2  ;;  %v2787_v41 = vmul.f32 %v5101_v48, %v5486_v3  ;;  %v2764_v55 = vmul.f32 %v5097_v37, %v5488_v24 }
 0x236   : > { %v3357_v21 = vsel %vm2275_vm3, %v3355_v32, %v3356_v34  ;;  %v2732_v9 = vadd.f32 %v2708_v13, %v2656_v45  ;;  %v3509_v60 = vsel %vm2428_vm4, %v3507_v10, %v3508_v17  ;;  %v2823_v16 = vrot.slane %v2788_v25, 1  ;;  %v5606_v10 = vld [vmem:[#allocation4 + $0x130] ss:$2 sm:$0x3] }
 0x237   : > { %v3383_v6 = vadd.f32 %v3357_v21, %v3307_v23  ;;  %v2822_v56 = vrot.slane %v2787_v41, 1  ;;  %v2864_v8 = vmul.f32 %v5068_v46, %v5510_v15  ;;  %v2521_v27 = vmul.f32 %v5052_v11, %v2144_v26 }
 0x238   : > { %v2752_v58 = vadd.f32 %v2744_v50, %v2732_v9  ;;  %v2863_v7 = vmul.f32 %v5068_v46, %v5488_v24  ;;  %v2522_v38 = vmul.f32 %v5052_v11, %v2146_v12  ;;  %v2597_v23 = vmul.f32 %v5043_v35, %v2180_v18 }
 0x239   : > { %v3459_v57 = vadd.f32 %v3433_v52, %v3383_v6  ;;  %v2824_v31 = vsel %vm2275_vm3, %v2822_v56, %v2823_v16  ;;  %v2598_v32 = vmul.f32 %v5043_v35, %v2182_v14  ;;  %v2899_v45 = vrot.slane %v2864_v8, 1  ;;  %v5620_v56 = vld [vmem:[#allocation4 + $0x120] ss:$2 sm:$0xff] }
 0x23a   : > { %v2772_v40 = vadd.f32 %v2764_v55, %v2752_v58  ;;  %v2940_v15 = vmul.f32 %v5072_v59, %v5498_v62  ;;  %v5593_v36 = vmul.f32 %v5047_v20, %v2144_v26  ;;  %v5596_v4 = vmul.f32 %v5047_v20, %v2146_v12 }
 0x23b   : > { %v3535_v43 = vadd.f32 %v3509_v60, %v3459_v57  ;;  %v2477_v21 = vmul.f32 %v5061_v53, %v2144_v26  ;;  %v2557_v28 = vrot.slane %v2521_v27, 1  ;;  %v2898_v50 = vrot.slane %v2863_v7, 1  ;;  %v5630_v7 = vld [vmem:[#allocation4 + $0x121] ss:$2 sm:$0xff] }
 0x23c   : > { %v2848_v24 = vadd.f32 %v2824_v31, %v2772_v40  ;;  %v2939_v6 = vmul.f32 %v5072_v59, %v5486_v3  ;;  %v2497_v62 = vmul.f32 %v5064_v44, %v2180_v18  ;;  %v2558_v13 = vrot.slane %v2522_v38, 1 }
 0x23d   : > { %3565 = vst.msk [vmem:[#allocation5 + $0x31] sm:$0xff] %vm1880_vm12, %v3535_v43  ;;  %v2633_v25 = vrot.slane %v2597_v23, 1  ;;  %v2634_v52 = vrot.slane %v2598_v32, 1  ;;  %v3012_v9 = vmul.f32 %v5162_v29, %v2144_v26  ;;  %v5610_v57 = vmul.f32 %v5183_v42, %v2180_v18  ;;  %v6468_v43 = vld [vmem:[#allocation24_spill] sm:$0xff] }
 0x23e   : > { %v2900_v41 = vsel %vm2275_vm3, %v2898_v50, %v2899_v45  ;;  %v2975_v60 = vrot.slane %v2940_v15, 2  ;;  %v5618_v16 = vmul.f32 %v5171_v49, %v2144_v26  ;;  %v5625_v40 = vmul.f32 %v5171_v49, %v2146_v12 }
 0x23f   : > { %v2924_v55 = vadd.f32 %v2900_v41, %v2848_v24  ;;  %v5628_v27 = vmul.f32 %v5191_v22, %v2180_v18  ;;  %v2974_v31 = vrot.slane %v2939_v6, 2  ;;  %v2256_v38 = vmul.f32 %v5000_v1, %v5606_v10  ;;  %v5648_v24 = vld [vmem:[#allocation4 + $0x131] ss:$2 sm:$0x3] }
 0x240   : > { %v5637_v32 = vsel %vm2275_vm3, %v2557_v28, %v2558_v13  ;;  %v5640_v45 = vsel %vm2275_vm3, %v2633_v25, %v2634_v52  ;;  %v5643_v15 = vmul.f32 %v5191_v22, %v2182_v14  ;;  %v5646_v18 = vmul.f32 %v5203_v61, %v2144_v26 }
 0x241   : > { %v5651_v6 = vmul.f32 %v5203_v61, %v2146_v12  ;;  %v2485_v41 = vadd.f32 %v2477_v21, %v5543_v47  ;;  %v2976_v28 = vsel %vm2428_vm4, %v2974_v31, %v2975_v60  ;;  %v2255_v13 = vmul.f32 %v5000_v1, %v5620_v56 }
 0x242   : > { %v3000_v52 = vadd.f32 %v2976_v28, %v2924_v55  ;;  %v2209_v14 = vmul.f32 %v4994_v63, %v5620_v56  ;;  %v2229_v26 = vmul.f32 %v4997_v0, %v5630_v7  ;;  %v2332_v3 = vmul.f32 %v5005_v5, %v5630_v7  ;;  %v6469_v55 = vld [vmem:[#allocation22_spill] sm:$0xff] }
 0x243   : > { %v2295_v21 = vrot.slane %v2256_v38, 1  ;;  %v2333_v60 = vmul.f32 %v5005_v5, %v5648_v24  ;;  %v3167_v31 = vrot.slane %v5643_v15, 1  ;;  %v3243_v33 = vrot.slane %v5651_v6, 2 }
 0x244   : > { %v3754_v25 = vld [vmem:[#allocation5 + $0x30] sm:$0xff]  ;;  %v5672_v1 = vadd.f32 %v2497_v62, %v2485_v41  ;;  %v2294_v0 = vrot.slane %v2255_v13, 1  ;;  %v5675_v38 = vadd.f32 %v3012_v9, %v3000_v52  ;;  %v2237_v39 = vadd.f32 %v2229_v26, %v2209_v14  ;;  %v6471_v13 = vld [vmem:[#allocation11_spill] sm:$0xff] }
 0x245   : > { %v3590_v12 = vld [vmem:[#allocation5 + $0x31] sm:$0xff]  ;;  %v3761_v51 = vpack.c.bf16 %v3754_v25, %v6467_v54  ;;  %v2370_v5 = vrot.slane %v2332_v3, 1  ;;  %v2371_v25 = vrot.slane %v2333_v60, 1  ;;  %v2409_v52 = vmul.f32 %v6471_v13, %v5606_v10 }
 0x246   : > { %v3596_v63 = vpack.c.bf16 %v3590_v12, %v6468_v43  ;;  %v3623_v47 = vld [vmem:[#allocation5 + $0x32] sm:$0xff]  ;;  %v2296_v54 = vsel %vm2275_vm3, %v2294_v0, %v2295_v21  ;;  %v5698_v21 = vld [vmem:[#allocation4 + $0x148] ss:$2 sm:$0x3]  ;;  %vm3615_vm5 = vcmask 130112   ;;  %vm3648_vm6 = vcmask 195712  }
 0x247   : > { %v5586_v34 = vpop.f32.mrb[16].mxu0  ;;  %3769 = vrot.lane.b32.xlu0 %v3761_v51, %s4370_s11  ;;  %v6470_v43 = vld [vmem:[#allocation25_spill] sm:$0xff]  ;;  %v2314_v14 = vadd.f32 %v2296_v54, %v2237_v39  ;;  %v2190_v54 = vld [vmem:[#allocation4 + $0x149] ss:$2 sm:$0x3]  ;;  %vm3681_vm7 = vcmask 261312  }
 0x248   : > { %v5590_v2 = vpop.f32.mrb[17].mxu0  ;;  %v1729_v28 = vadd.f32 %v6469_v55, %v5586_v34  ;;  %3605 = vrot.lane.b32.xlu1 %v3596_v63, %s4363_s30  ;;  %v3629_v41 = vpack.c.bf16 %v3623_v47, %v6470_v43  ;;  %v5696_v47 = vld [vmem:[#allocation4 + $0x138] ss:$2 sm:$0xff]  ;;  %vm3714_vm8 = vcmask 326912  }
 0x249   : > { %v5598_v30 = vpop.f32.mrb[18].mxu0  ;;  %v1721_v62 = vadd.f32 %v6469_v55, %v5590_v2 }
 0x24a   : > { %v5603_v17 = vpop.f32.mrb[19].mxu0  ;;  %v1732_v9 = vadd.f32 %v6469_v55, %v5598_v30  ;;  %vm1801_vm9 = vcmp.gt.f32.partialorder %v1729_v28, 0.0  ;;  %v1833_v3 = vmul.f32 0.01, %v1729_v28 }
 0x24b   : > { %v1724_v51 = vadd.f32 %v6469_v55, %v5603_v17  ;;  %vm1799_vm10 = vcmp.gt.f32.partialorder %v1721_v62, 0.0  ;;  %v1831_v34 = vmul.f32 0.01, %v1721_v62  ;;  %3802 = vrot.lane.b32.xlu0 %v3596_v63, %s4371_s12 }
 0x24c   : > { %vm1802_vm11 = vcmp.gt.f32.partialorder %v1732_v9, 0.0  ;;  %v1834_v0 = vmul.f32 0.01, %v1732_v9  ;;  %v1865_v2 = vsel %vm1801_vm9, %v1729_v28, %v1833_v3  ;;  %3638 = vrot.lane.b32.xlu1 %v3629_v41, %s4360_s27  ;;  %vm3747_vm9 = vcmask 392512  }
 0x24d   : > { %vm1800_vm13 = vcmp.gt.f32.partialorder %v1724_v51, 0.0  ;;  %v1832_v30 = vmul.f32 0.01, %v1724_v51  ;;  %1899 = vst.msk [vmem:[#allocation4 + $0x10a] sm:$0xff] %vm1880_vm12, %v1865_v2  ;;  %v1863_v26 = vsel %vm1799_vm10, %v1721_v62, %v1831_v34  ;;  %v2408_v62 = vmul.f32 %v6471_v13, %v5620_v56 }
 0x24e   : > { %v5613_v58 = vpop.f32.mrb[4].mxu1  ;;  %v1866_v17 = vsel %vm1802_vm11, %v1732_v9, %v1834_v0  ;;  %1897 = vst.msk [vmem:[#allocation4 + $0xf2] sm:$0xff] %vm1880_vm12, %v1863_v26  ;;  %v2602_v2 = vmul.f32 %v5043_v35, %v2190_v54  ;;  %v3573_v26 = vld [vmem:[#allocation5 + $0x20] sm:$0xff] }
 0x24f   : > { %v5622_v8 = vpop.f32.mrb[5].mxu1  ;;  %v1761_v12 = vadd.f32 %v6469_v55, %v5613_v58  ;;  %1900 = vst.msk [vmem:[#allocation4 + $0x112] sm:$0xff] %vm1880_vm12, %v1866_v17  ;;  %v1864_v63 = vsel %vm1800_vm13, %v1724_v51, %v1832_v30  ;;  %v2372_v58 = vsel %vm2275_vm3, %v2370_v5, %v2371_v25  ;;  %3835 = vrot.lane.b32.xlu0 %v3629_v41, %s4372_s13  ;;  %v5712_v5 = vld [vmem:[#allocation4 + $0x139] ss:$2 sm:$0xff]  ;;  %v6472_v17 = vrot.slane %v5596_v4, 2 }
 0x250   : > { %v5634_v23 = vpop.f32.mrb[6].mxu1  ;;  %v1753_v39 = vadd.f32 %v6469_v55, %v5622_v8  ;;  %1898 = vst.msk [vmem:[#allocation4 + $0xfa] sm:$0xff] %vm1880_vm12, %v1864_v63  ;;  %v2526_v25 = vmul.f32 %v5052_v11, %v5698_v21  ;;  %v2390_v51 = vadd.f32 %v2372_v58, %v2314_v14  ;;  %v2525_v41 = vmul.f32 %v5052_v11, %v5696_v47 }
 0x251   : > { %v1755_v50 = vpop.f32.mrb[7].mxu1  ;;  %v1764_v60 = vadd.f32 %v6469_v55, %v5634_v23  ;;  %vm1809_vm14 = vcmp.gt.f32.partialorder %v1761_v12, 0.0  ;;  %v1841_v9 = vmul.f32 0.01, %v1761_v12  ;;  %v2448_v23 = vrot.slane %v2409_v52, 2 }
 0x252   : > { %v1756_v28 = vadd.f32 %v6469_v55, %v1755_v50  ;;  %vm1807_vm15 = vcmp.gt.f32.partialorder %v1753_v39, 0.0  ;;  %v1839_v8 = vmul.f32 0.01, %v1753_v39  ;;  %v3574_v55 = vld [vmem:[#allocation5 + $0x30] sm:$0xff]  ;;  %v2447_v52 = vrot.slane %v2408_v62, 2 }
 0x253   : > { %vm1810_vm0 = vcmp.gt.f32.partialorder %v1764_v60, 0.0  ;;  %v1842_v43 = vmul.f32 0.01, %v1764_v60  ;;  %v1873_v3 = vsel %vm1809_vm14, %v1761_v12, %v1841_v9  ;;  %v6473_v14 = vrot.slane %v5593_v36, 2 }
 0x254   : > { %vm1808_vm1 = vcmp.gt.f32.partialorder %v1756_v28, 0.0  ;;  %v1840_v50 = vmul.f32 0.01, %v1756_v28  ;;  %1907 = vst.msk [vmem:[#allocation4 + $0x16a] sm:$0xff] %vm1880_vm12, %v1873_v3  ;;  %v1871_v34 = vsel %vm1807_vm15, %v1753_v39, %v1839_v8  ;;  %v6474_v63 = vrot.slane %v5625_v40, 1 }
 0x255   : > { %v1874_v0 = vsel %vm1810_vm0, %v1764_v60, %v1842_v43  ;;  %1905 = vst.msk [vmem:[#allocation4 + $0x152] sm:$0xff] %vm1880_vm12, %v1871_v34  ;;  %v5727_v12 = vsel %vm2428_vm4, %v6473_v14, %v6472_v17  ;;  %v6475_v39 = vrot.slane %v5618_v16, 1  ;;  %v6476_v58 = vrot.slane %v5628_v27, 1  ;;  %v1935_v62 = vld [vmem:[#allocation4 + $0x10a] sm:$0x1] }
 0x256   : > { %1908 = vst.msk [vmem:[#allocation4 + $0x172] sm:$0xff] %vm1880_vm12, %v1874_v0  ;;  %v1872_v30 = vsel %vm1808_vm1, %v1756_v28, %v1840_v50  ;;  %v3580_v36 = vpack.c.bf16 %v3574_v55, %v3573_v26  ;;  %v6477_v4 = vrot.slane %v5646_v18, 2  ;;  %v3040_v16 = vadd.f32 %v5610_v57, %v5675_v38  ;;  %v1955_v9 = vld [vmem:[#allocation4 + $0x119] sm:$0x1] }
 0x257   : > { %v3092_v60 = vsel %vm2275_vm3, %v6475_v39, %v6474_v63  ;;  %v5739_v28 = vsel %vm2275_vm3, %v6476_v58, %v3167_v31  ;;  %1906 = vst.msk [vmem:[#allocation4 + $0x15a] sm:$0xff] %vm1880_vm12, %v1872_v30  ;;  %v2601_v27 = vmul.f32 %v5043_v35, %v5712_v5  ;;  %v2449_v15 = vsel %vm2428_vm4, %v2447_v52, %v2448_v23  ;;  %v1934_v31 = vld [vmem:[#allocation4 + $0xf2] sm:$0x1]  ;;  %v1954_v57 = vld [vmem:[#allocation4 + $0x101] sm:$0x1] }
 0x258   : > { %v5747_v40 = vsel %vm2428_vm4, %v6477_v4, %v3243_v33  ;;  %1976 = vst.msk [vmem:[#allocation4 + $0x108] sm:$0x1] %vm1964_vm2, %v1935_v62  ;;  %1996 = vst.msk [vmem:[#allocation4 + $0x109] sm:$0x1] %vm1964_vm2, %v1935_v62  ;;  %v2581_v18 = vadd.f32 %v5637_v32, %v5672_v1  ;;  %v2564_v6 = vrot.slane %v2526_v25, 1  ;;  %v2677_v33 = vmul.f32 %v5047_v20, %v5696_v47 }
 0x259   : > { %v2467_v8 = vadd.f32 %v2449_v15, %v2390_v51  ;;  %1975 = vst.msk [vmem:[#allocation4 + $0xf0] sm:$0x1] %vm1964_vm2, %v1934_v31  ;;  %1995 = vst.msk [vmem:[#allocation4 + $0xf1] sm:$0x1] %vm1964_vm2, %v1934_v31  ;;  %v2479_v38 = vmul.f32 %v5061_v53, %v5696_v47  ;;  %v2499_v1 = vmul.f32 %v5064_v44, %v5712_v5  ;;  %v2563_v32 = vrot.slane %v2525_v41, 1 }
 0x25a   : > { %2016 = vst.msk [vmem:[#allocation4 + $0x11a] sm:$0x1] %vm1964_vm2, %v1955_v9  ;;  %2036 = vst.msk [vmem:[#allocation4 + $0x11b] sm:$0x1] %vm1964_vm2, %v1955_v9  ;;  %v2640_v43 = vrot.slane %v2602_v2, 1  ;;  %v2678_v23 = vmul.f32 %v5047_v20, %v5698_v21  ;;  %v3060_v3 = vmul.f32 %v5171_v49, %v5698_v21  ;;  %v3136_v50 = vmul.f32 %v5191_v22, %v2190_v54 }
 0x25b   : > { %3584 = vst.msk [vmem:[#allocation6 + $0x8] sm:$0xff] %vm1880_vm12, %v3580_v36  ;;  %v3212_v55 = vmul.f32 %v5203_v61, %v5698_v21  ;;  %v3116_v25 = vadd.f32 %v3092_v60, %v3040_v16  ;;  %v2639_v51 = vrot.slane %v2601_v27, 1  ;;  %v3059_v34 = vmul.f32 %v5171_v49, %v5696_v47  ;;  %v1939_v41 = vld [vmem:[#allocation4 + $0x16a] sm:$0x1] }
 0x25c   : > { %2015 = vst.msk [vmem:[#allocation4 + $0x102] sm:$0x1] %vm1964_vm2, %v1954_v57  ;;  %2035 = vst.msk [vmem:[#allocation4 + $0x103] sm:$0x1] %vm1964_vm2, %v1954_v57  ;;  %v3135_v0 = vmul.f32 %v5191_v22, %v5712_v5  ;;  %v2565_v2 = vsel %vm2275_vm3, %v2563_v32, %v2564_v6  ;;  %v2715_v52 = vrot.slane %v2677_v33, 2  ;;  %v3211_v30 = vmul.f32 %v5203_v61, %v5696_v47 }
 0x25d   : > { %v2487_v26 = vadd.f32 %v2479_v38, %v2467_v8  ;;  %1980 = vst.msk [vmem:[#allocation4 + $0x168] sm:$0x1] %vm1964_vm2, %v1939_v41  ;;  %2000 = vst.msk [vmem:[#allocation4 + $0x169] sm:$0x1] %vm1964_vm2, %v1939_v41  ;;  %v1938_v21 = vld [vmem:[#allocation4 + $0x152] sm:$0x1]  ;;  %v5788_v17 = vsel %vm2275_vm3, %v2639_v51, %v2640_v43  ;;  %v5792_v14 = vmul.f32 %v5162_v29, %v5696_v47 }
 0x25e   : > { %v1959_v54 = vld [vmem:[#allocation4 + $0x179] sm:$0x1]  ;;  %v5796_v63 = vmul.f32 %v5101_v48, %v5620_v56  ;;  %v5800_v39 = vmul.f32 %v5101_v48, %v5606_v10  ;;  %1979 = vst.msk [vmem:[#allocation4 + $0x150] sm:$0x1] %vm1964_vm2, %v1938_v21  ;;  %1999 = vst.msk [vmem:[#allocation4 + $0x151] sm:$0x1] %vm1964_vm2, %v1938_v21  ;;  %v5810_v4 = vmul.f32 %v5183_v42, %v5712_v5 }
 0x25f   : > { %6478 = vst [vmem:[#allocation23_spill] sm:$0xff] %v5792_v14  ;;  %2020 = vst.msk [vmem:[#allocation4 + $0x17a] sm:$0x1] %vm1964_vm2, %v1959_v54  ;;  %v1958_v60 = vld [vmem:[#allocation4 + $0x161] sm:$0x1]  ;;  %v2716_v58 = vrot.slane %v2678_v23, 2  ;;  %v5814_v15 = vmul.f32 %v5068_v46, %v5630_v7  ;;  %v2507_v9 = vadd.f32 %v2499_v1, %v2487_v26  ;;  %v5818_v6 = vmul.f32 %v5068_v46, %v5648_v24 }
 0x260   : > { %2040 = vst.msk [vmem:[#allocation4 + $0x17b] sm:$0x1] %vm1964_vm2, %v1959_v54  ;;  %v3097_v47 = vrot.slane %v3060_v3, 1  ;;  %v3173_v62 = vrot.slane %v3136_v50, 1  ;;  %v3249_v36 = vrot.slane %v3212_v55, 2  ;;  %6479 = vst [vmem:[#allocation24_spill] sm:$0xff] %v5810_v4  ;;  %v5822_v33 = vmul.f32 %v5072_v59, %v5606_v10 }
 0x261   : > { %2019 = vst.msk [vmem:[#allocation4 + $0x162] sm:$0x1] %vm1964_vm2, %v1958_v60  ;;  %2039 = vst.msk [vmem:[#allocation4 + $0x163] sm:$0x1] %vm1964_vm2, %v1958_v60  ;;  %v3096_v16 = vrot.slane %v3059_v34, 1  ;;  %v3172_v27 = vrot.slane %v3135_v0, 1  ;;  %v2657_v38 = vadd.f32 %v5640_v45, %v2581_v18  ;;  %v3192_v32 = vadd.f32 %v5739_v28, %v3116_v25 }
 0x262   : > { %v3248_v31 = vrot.slane %v3211_v30, 2  ;;  %v5826_v57 = vld [vmem:[#allocation4 + $0x108] ss:$2 sm:$0xff]  ;;  %v5833_v1 = vsel %vm2428_vm4, %v2715_v52, %v2716_v58  ;;  %v5844_v55 = vld [vmem:[#allocation4 + $0x118] ss:$2 sm:$0x3]  ;;  %v5854_v18 = vmul.f32 %v5090_v19, %v5620_v56  ;;  %v5858_v25 = vmul.f32 %v5097_v37, %v5630_v7 }
 0x263   : > { %v5836_v23 = vsel %vm2275_vm3, %v3096_v16, %v3097_v47  ;;  %v5839_v3 = vsel %vm2275_vm3, %v3172_v27, %v3173_v62  ;;  %v5846_v51 = vld [vmem:[#allocation4 + $0x109] ss:$2 sm:$0xff]  ;;  %v5848_v45 = vld [vmem:[#allocation4 + $0x119] ss:$2 sm:$0x3]  ;;  %v5863_v0 = vmul.f32 %v5072_v59, %v5620_v56  ;;  %v5871_v26 = vadd.f32 %v2565_v2, %v2507_v9  ;;  %v6490_v34 = vld [vmem:[#allocation7_spill] sm:$0xff] }
 0x264   : > { %6481 = vst [vmem:[#allocation25_spill] sm:$0xff] %v5836_v23  ;;  %6482 = vst [vmem:[#allocation11_spill] sm:$0xff] %v5839_v3  ;;  %v5842_v50 = vsel %vm2428_vm4, %v3248_v31, %v3249_v36  ;;  %v5865_v41 = vld [vmem:[#allocation4 + $0xf0] ss:$2 sm:$0xff]  ;;  %v5867_v52 = vld [vmem:[#allocation4 + $0xf1] ss:$2 sm:$0xff]  ;;  %v2478_v36 = vmul.f32 %v5061_v53, %v5826_v57  ;;  %v2498_v16 = vmul.f32 %v5064_v44, %v5846_v51 }
 0x265   : > { %6483 = vst [vmem:[#allocation26_spill] sm:$0xff] %v5842_v50  ;;  %6485 = vst [vmem:[#allocation28_spill] sm:$0xff] %v5858_v25  ;;  %v6487_v60 = vld [vmem:[#allocation20_spill] sm:$0xff]  ;;  %v5879_v47 = vld [vmem:[#allocation4 + $0x100] ss:$2 sm:$0x3]  ;;  %v2733_v27 = vadd.f32 %v5727_v12, %v2657_v38  ;;  %v3268_v31 = vadd.f32 %v5747_v40, %v3192_v32  ;;  %v2523_v9 = vmul.f32 %v5052_v11, %v5826_v57 }
 0x266   : > { %v5877_v58 = vmul.f32 %v6487_v60, %v5620_v56  ;;  %v2111_v2 = vld [vmem:[#allocation4 + $0x101] ss:$2 sm:$0x3]  ;;  %v5893_v54 = vmul.f32 %v5043_v35, %v5846_v51  ;;  %v2208_v21 = vmul.f32 %v6490_v34, %v5865_v41  ;;  %v6491_v8 = vld [vmem:[#allocation8_spill] sm:$0xff]  ;;  %v2524_v44 = vmul.f32 %v5052_v11, %v5844_v55  ;;  %v6492_v40 = vld [vmem:[#allocation9_spill] sm:$0xff] }
 0x267   : > { %v2228_v5 = vmul.f32 %v6491_v8, %v5867_v52  ;;  %v5903_v12 = vmul.f32 %v5043_v35, %v5848_v45  ;;  %v2253_v38 = vmul.f32 %v6492_v40, %v5865_v41  ;;  %v2254_v32 = vmul.f32 %v6492_v40, %v5879_v47  ;;  %v6493_v11 = vld [vmem:[#allocation10_spill] sm:$0xff] }
 0x268   : > { %6488 = vst [vmem:[#allocation30_spill] sm:$0xff] %v5877_v58  ;;  %v5911_v53 = vmul.f32 %v5047_v20, %v5826_v57  ;;  %v5915_v58 = vmul.f32 %v5047_v20, %v5844_v55  ;;  %v2331_v35 = vmul.f32 %v6493_v11, %v2111_v2  ;;  %v2406_v3 = vmul.f32 %v6471_v13, %v5865_v41 }
 0x269   : > { %v2292_v50 = vrot.slane %v2254_v32, 1  ;;  %v2236_v23 = vadd.f32 %v2228_v5, %v2208_v21  ;;  %v2745_v20 = vmul.f32 %v5090_v19, %v5865_v41  ;;  %v2636_v14 = vrot.slane %v5893_v54, 1 }
 0x26a   : > { %v2368_v4 = vrot.slane %v2331_v35, 1  ;;  %v2444_v34 = vrot.slane %v2406_v3, 2  ;;  %v2789_v25 = vmul.f32 %v5101_v48, %v5865_v41  ;;  %v2790_v35 = vmul.f32 %v5101_v48, %v5879_v47 }
 0x26b   : > { %v2753_v5 = vadd.f32 %v2745_v20, %v2733_v27  ;;  %v2865_v21 = vmul.f32 %v5068_v46, %v5867_v52  ;;  %v2866_v20 = vmul.f32 %v5068_v46, %v2111_v2  ;;  %v3280_v27 = vmul.f32 %v6487_v60, %v5865_v41 }
 0x26c   : > { %vm3814_vm15 = vcmask 523712   ;;  %vm3847_vm0 = vcmask 589312   ;;  %vm3899_vm1 = vcmask 588800  }
 0x26e   : > { %v5830_v43 = vpop.f32.mrb[8].mxu1 }
 0x26f   : > { %6480 = vst [vmem:[#allocation22_spill] sm:$0xff] %v5830_v43  ;;  %v5850_v28 = vpop.f32.mrb[9].mxu1  ;;  %v2560_v43 = vrot.slane %v2523_v9, 1 }
 0x270   : > { %6484 = vst [vmem:[#allocation27_spill] sm:$0xff] %v5850_v28  ;;  %v5869_v30 = vpop.f32.mrb[10].mxu1  ;;  %v2407_v28 = vmul.f32 %v6471_v13, %v5879_v47 }
 0x271   : > { %6486 = vst [vmem:[#allocation29_spill] sm:$0xff] %v5869_v30  ;;  %v5881_v62 = vpop.f32.mrb[11].mxu1  ;;  %v2291_v30 = vrot.slane %v2253_v38, 1  ;;  %v2561_v38 = vrot.slane %v2524_v44, 1  ;;  %v2713_v44 = vrot.slane %v5915_v58, 2  ;;  %v6494_v58 = vld [vmem:[#allocation21_spill] sm:$0xff] }
 0x272   : > { %6489 = vst [vmem:[#allocation31_spill] sm:$0xff] %v5881_v62  ;;  %v2330_v62 = vmul.f32 %v6493_v11, %v5867_v52  ;;  %v2445_v11 = vrot.slane %v2407_v28, 2  ;;  %v2712_v28 = vrot.slane %v5911_v53, 2 }
 0x273   : > { %v2293_v40 = vsel %vm2275_vm3, %v2291_v30, %v2292_v50  ;;  %v2637_v50 = vrot.slane %v5903_v12, 1  ;;  %v2765_v30 = vmul.f32 %v5097_v37, %v5867_v52  ;;  %v2901_v12 = vrot.slane %v2865_v21, 1 }
 0x274   : > { %v2367_v8 = vrot.slane %v2330_v62, 1  ;;  %v2313_v32 = vadd.f32 %v2293_v40, %v2236_v23  ;;  %v2446_v3 = vsel %vm2428_vm4, %v2444_v34, %v2445_v11  ;;  %v2825_v62 = vrot.slane %v2789_v25, 1  ;;  %v6495_v11 = vld [vmem:[#allocation18_spill] sm:$0xff] }
 0x275   : > { %v2773_v53 = vadd.f32 %v2765_v30, %v2753_v5  ;;  %v3300_v40 = vmul.f32 %v6494_v58, %v5867_v52  ;;  %v3323_v34 = vmul.f32 %v6495_v11, %v5865_v41  ;;  %v2942_v25 = vmul.f32 %v5072_v59, %v5879_v47  ;;  %v6496_v5 = vld [vmem:[#allocation19_spill] sm:$0xff] }
 0x276   : > { %v2369_v9 = vsel %vm2275_vm3, %v2367_v8, %v2368_v4  ;;  %v2826_v4 = vrot.slane %v2790_v35, 1  ;;  %v2562_v8 = vsel %vm2275_vm3, %v2560_v43, %v2561_v38  ;;  %v3288_v35 = vadd.f32 %v3280_v27, %v3268_v31  ;;  %v5960_v31 = vld [vmem:[%s6408_s3 + $0x18] ss:$0 sm:$0xff] }
 0x277   : > { %v2389_v23 = vadd.f32 %v2369_v9, %v2313_v32  ;;  %v3324_v43 = vmul.f32 %v6495_v11, %v5879_v47  ;;  %v2902_v38 = vrot.slane %v2866_v20, 1  ;;  %v3399_v21 = vmul.f32 %v6496_v5, %v5867_v52  ;;  %v3604_v52 = vpop.permute.xlu0 %3603 }
 0x278   : > { %v2827_v9 = vsel %vm2275_vm3, %v2825_v62, %v2826_v4  ;;  %v3308_v30 = vadd.f32 %v3300_v40, %v3288_v35  ;;  %v3358_v60 = vrot.slane %v3323_v34, 1  ;;  %v3475_v4 = vmul.f32 %v5960_v31, %v5865_v41  ;;  %3616 = vst.msk [vmem:[#allocation6] sm:$0xff] %vm3615_vm5, %v3604_v52 }
 0x279   : > { %v2466_v54 = vadd.f32 %v2446_v3, %v2389_v23  ;;  %v3400_v23 = vmul.f32 %v6496_v5, %v2111_v2  ;;  %v3359_v37 = vrot.slane %v3324_v43, 1  ;;  %v3476_v20 = vmul.f32 %v5960_v31, %v5879_v47 }
 0x27a   : > { %v3434_v27 = vrot.slane %v3399_v21, 1  ;;  %v2903_v40 = vsel %vm2275_vm3, %v2901_v12, %v2902_v38  ;;  %v2978_v35 = vrot.slane %v2942_v25, 2  ;;  %v3510_v43 = vrot.slane %v3475_v4, 2 }
 0x27b   : > { %v2486_v32 = vadd.f32 %v2478_v36, %v2466_v54  ;;  %v2849_v36 = vadd.f32 %v2827_v9, %v2773_v53  ;;  %v3435_v54 = vrot.slane %v3400_v23, 1  ;;  %v3360_v2 = vsel %vm2275_vm3, %v3358_v60, %v3359_v37  ;;  %v3637_v21 = vpop.permute.xlu0 %3636 }
 0x27c   : > { %v2638_v53 = vsel %vm2275_vm3, %v2636_v14, %v2637_v50  ;;  %v3384_v34 = vadd.f32 %v3360_v2, %v3308_v30  ;;  %v2714_v37 = vsel %vm2428_vm4, %v2712_v28, %v2713_v44  ;;  %v5980_v14 = vmul.f32 %v6495_v11, %v5606_v10  ;;  %3649 = vst.msk [vmem:[#allocation6] sm:$0xff] %vm3648_vm6, %v3637_v21  ;;  %v6503_v21 = vld [vmem:[#allocation7_spill] sm:$0xff] }
 0x27d   : > { %v2506_v3 = vadd.f32 %v2498_v16, %v2486_v32  ;;  %v2941_v16 = vmul.f32 %v5072_v59, %v5865_v41  ;;  %v3511_v32 = vrot.slane %v3476_v20, 2  ;;  %v3436_v47 = vsel %vm2275_vm3, %v3434_v27, %v3435_v54 }
 0x27e   : > { %v2925_v41 = vadd.f32 %v2903_v40, %v2849_v36  ;;  %v3460_v60 = vadd.f32 %v3436_v47, %v3384_v34  ;;  %v2980_v25 = vrot.slane %v5863_v0, 2  ;;  %v5987_v23 = vmul.f32 %v6496_v5, %v5630_v7  ;;  %v6041_v34 = vld [vmem:[#allocation4 + $0x151] ss:$2 sm:$0xff] }
 0x27f   : > { %v2582_v62 = vadd.f32 %v2562_v8, %v2506_v3  ;;  %v5975_v8 = vmul.f32 %v6495_v11, %v5620_v56  ;;  %v2977_v12 = vrot.slane %v2941_v16, 2  ;;  %v3512_v38 = vsel %vm2428_vm4, %v3510_v43, %v3511_v32 }
 0x280   : > { %v5991_v28 = vmul.f32 %v6496_v5, %v5648_v24  ;;  %v3536_v44 = vadd.f32 %v3512_v38, %v3460_v60  ;;  %v6497_v3 = vrot.slane %v5800_v39, 1  ;;  %v6498_v30 = vrot.slane %v5796_v63, 1  ;;  %v6502_v60 = vld [vmem:[#allocation28_spill] sm:$0xff]  ;;  %v6505_v38 = vld [vmem:[#allocation9_spill] sm:$0xff] }
 0x281   : > { %v2658_v9 = vadd.f32 %v2638_v53, %v2582_v62  ;;  %v6000_v54 = vmul.f32 %v6494_v58, %v5630_v7  ;;  %v2979_v0 = vsel %vm2428_vm4, %v2977_v12, %v2978_v35  ;;  %v2659_v4 = vadd.f32 %v5788_v17, %v5871_v26  ;;  %v6033_v53 = vld [vmem:[#allocation4 + $0x150] ss:$2 sm:$0xff]  ;;  %v6048_v35 = vld [vmem:[#allocation4 + $0x161] ss:$2 sm:$0x3] }
 0x282   : > { %v2830_v36 = vsel %vm2275_vm3, %v6498_v30, %v6497_v3  ;;  %v6499_v20 = vrot.slane %v5818_v6, 1  ;;  %v6500_v24 = vrot.slane %v5814_v15, 1  ;;  %v6501_v63 = vrot.slane %v5822_v33, 2  ;;  %3566 = vst.msk [vmem:[#allocation5 + $0x41] sm:$0xff] %vm1880_vm12, %v3536_v44  ;;  %v6506_v30 = vld [vmem:[#allocation10_spill] sm:$0xff] }
 0x283   : > { %v2734_v50 = vadd.f32 %v2714_v37, %v2658_v9  ;;  %v3361_v7 = vrot.slane %v5975_v8, 1  ;;  %v3001_v62 = vadd.f32 %v2979_v0, %v2925_v41  ;;  %v3362_v16 = vrot.slane %v5980_v14, 1 }
 0x284   : > { %v6010_v52 = vsel %vm2275_vm3, %v6500_v24, %v6499_v20  ;;  %v6015_v39 = vsel %vm2428_vm4, %v2980_v25, %v6501_v63  ;;  %v3058_v17 = vmul.f32 %v5171_v49, %v5844_v55  ;;  %v3134_v15 = vmul.f32 %v5191_v22, %v5848_v45 }
 0x285   : > { %v2754_v6 = vadd.f32 %v5854_v18, %v2734_v50  ;;  %v3437_v33 = vrot.slane %v5987_v23, 1  ;;  %v3438_v26 = vrot.slane %v5991_v28, 1  ;;  %v6029_v2 = vmul.f32 %v5960_v31, %v5606_v10  ;;  %v6039_v18 = vld [vmem:[#allocation4 + $0x160] ss:$2 sm:$0x3] }
 0x286   : > { %v3013_v27 = vmul.f32 %v5162_v29, %v5826_v57  ;;  %v3057_v40 = vmul.f32 %v5171_v49, %v5826_v57  ;;  %v3133_v45 = vmul.f32 %v5191_v22, %v5846_v51  ;;  %v2735_v32 = vadd.f32 %v5833_v1, %v2659_v4 }
 0x287   : > { %v6046_v10 = vmul.f32 %v5203_v61, %v5826_v57  ;;  %v6052_v47 = vmul.f32 %v5960_v31, %v5620_v56  ;;  %v3033_v43 = vmul.f32 %v5183_v42, %v5846_v51  ;;  %v3094_v37 = vrot.slane %v3058_v17, 1  ;;  %v6504_v57 = vld [vmem:[#allocation8_spill] sm:$0xff] }
 0x288   : > { %v3021_v9 = vadd.f32 %v3013_v27, %v3001_v62  ;;  %v3170_v41 = vrot.slane %v3134_v15, 1  ;;  %v2774_v1 = vadd.f32 %v6502_v60, %v2754_v6  ;;  %v2210_v50 = vmul.f32 %v6503_v21, %v6033_v53  ;;  %v3670_v62 = vpop.permute.xlu0 %3669 }
 0x289   : > { %v2230_v12 = vmul.f32 %v6504_v57, %v6041_v34  ;;  %v2257_v25 = vmul.f32 %v6505_v38, %v6033_v53  ;;  %v2258_v56 = vmul.f32 %v6505_v38, %v6039_v18  ;;  %v3093_v44 = vrot.slane %v3057_v40, 1  ;;  %3682 = vst.msk [vmem:[#allocation6] sm:$0xff] %vm3681_vm7, %v3670_v62  ;;  %v6507_v38 = vld [vmem:[#allocation17_spill] sm:$0xff] }
 0x28a   : > { %v3169_v3 = vrot.slane %v3133_v45, 1  ;;  %v3210_v51 = vmul.f32 %v5203_v61, %v5844_v55  ;;  %v2335_v0 = vmul.f32 %v6506_v30, %v6048_v35  ;;  %v3245_v4 = vrot.slane %v6046_v10, 2 }
 0x28b   : > { %v3041_v20 = vadd.f32 %v3033_v43, %v3021_v9  ;;  %v2297_v24 = vrot.slane %v2257_v25, 1  ;;  %v2298_v63 = vrot.slane %v2258_v56, 1  ;;  %v3095_v17 = vsel %vm2275_vm3, %v3093_v44, %v3094_v37 }
 0x28c   : > { %v2850_v15 = vadd.f32 %v2830_v36, %v2774_v1  ;;  %v2334_v6 = vmul.f32 %v6506_v30, %v6041_v34  ;;  %v2747_v27 = vmul.f32 %v5090_v19, %v6033_v53  ;;  %v3171_v55 = vsel %vm2275_vm3, %v3169_v3, %v3170_v41 }
 0x28d   : > { %v2238_v40 = vadd.f32 %v2230_v12, %v2210_v50  ;;  %v2299_v45 = vsel %vm2275_vm3, %v2297_v24, %v2298_v63  ;;  %v2411_v10 = vmul.f32 %v6471_v13, %v6039_v18  ;;  %v3246_v9 = vrot.slane %v3210_v51, 2  ;;  %v3703_v50 = vpop.permute.xlu0 %3702 }
 0x28e   : > { %v2374_v43 = vrot.slane %v2335_v0, 1  ;;  %v2755_v37 = vadd.f32 %v2747_v27, %v2735_v32  ;;  %v2793_v36 = vmul.f32 %v5101_v48, %v6033_v53  ;;  %v3117_v60 = vadd.f32 %v3095_v17, %v3041_v20  ;;  %3715 = vst.msk [vmem:[#allocation6] sm:$0xff] %vm3714_vm8, %v3703_v50 }
 0x28f   : > { %v2315_v1 = vadd.f32 %v2299_v45, %v2238_v40  ;;  %v2794_v21 = vmul.f32 %v5101_v48, %v6039_v18  ;;  %v2870_v41 = vmul.f32 %v5068_v46, %v6048_v35  ;;  %v2373_v57 = vrot.slane %v2334_v6, 1  ;;  %v6508_v40 = vld [vmem:[#allocation23_spill] sm:$0xff] }
 0x290   : > { %v2410_v12 = vmul.f32 %v6471_v13, %v6033_v53  ;;  %v2767_v25 = vmul.f32 %v6507_v38, %v6041_v34  ;;  %v2926_v32 = vadd.f32 %v6010_v52, %v2850_v15  ;;  %v2451_v56 = vrot.slane %v2411_v10, 2 }
 0x291   : > { %v2831_v44 = vrot.slane %v2793_v36, 1  ;;  %v2832_v3 = vrot.slane %v2794_v21, 1  ;;  %v2869_v51 = vmul.f32 %v5068_v46, %v6041_v34  ;;  %v2375_v30 = vsel %vm2275_vm3, %v2373_v57, %v2374_v43  ;;  %v3736_v17 = vpop.permute.xlu0 %3735  ;;  %v6510_v21 = vld [vmem:[#allocation20_spill] sm:$0xff]  ;;  %v6511_v57 = vld [vmem:[#allocation25_spill] sm:$0xff] }
 0x292   : > { %v2775_v0 = vadd.f32 %v2767_v25, %v2755_v37  ;;  %v2946_v20 = vmul.f32 %v5072_v59, %v6039_v18  ;;  %v3002_v13 = vadd.f32 %v6015_v39, %v2926_v32  ;;  %v3193_v24 = vadd.f32 %v3171_v55, %v3117_v60  ;;  %3748 = vst.msk [vmem:[#allocation6] sm:$0xff] %vm3747_vm9, %v3736_v17 }
 0x293   : > { %v2391_v63 = vadd.f32 %v2375_v30, %v2315_v1  ;;  %v2833_v52 = vsel %vm2275_vm3, %v2831_v44, %v2832_v3  ;;  %v2908_v62 = vrot.slane %v2870_v41, 1  ;;  %v6104_v15 = vsel %vm2275_vm3, %v3361_v7, %v3362_v16  ;;  %v6509_v16 = vld [vmem:[#allocation24_spill] sm:$0xff]  ;;  %v6512_v44 = vld [vmem:[#allocation22_spill] sm:$0xff] }
 0x294   : > { %v2450_v6 = vrot.slane %v2410_v12, 2  ;;  %v2945_v27 = vmul.f32 %v5072_v59, %v6033_v53  ;;  %v3022_v45 = vadd.f32 %v6508_v40, %v3002_v13  ;;  %v3514_v39 = vrot.slane %v6029_v2, 2  ;;  %v6514_v13 = vld [vmem:[#allocation11_spill] sm:$0xff]  ;;  %v6516_v40 = vld [vmem:[#allocation29_spill] sm:$0xff] }
 0x295   : > { %v3247_v55 = vsel %vm2428_vm4, %v3245_v4, %v3246_v9  ;;  %v2907_v10 = vrot.slane %v2869_v51, 1  ;;  %v3513_v14 = vrot.slane %v6052_v47, 2  ;;  %v2851_v43 = vadd.f32 %v2833_v52, %v2775_v0  ;;  %v6513_v51 = vld [vmem:[#allocation27_spill] sm:$0xff] }
 0x296   : > { %v2452_v8 = vsel %vm2428_vm4, %v2450_v6, %v2451_v56  ;;  %v2984_v7 = vrot.slane %v2946_v20, 2  ;;  %v3042_v37 = vadd.f32 %v6509_v16, %v3022_v45  ;;  %v3269_v36 = vadd.f32 %v3247_v55, %v3193_v24  ;;  %v4350_v56 = vld [vmem:[%s6407_s2] ss:$0 sm:$0xff] }
 0x297   : > { %v6115_v60 = vadd.f32 %v2452_v8, %v2391_v63  ;;  %v2909_v1 = vsel %vm2275_vm3, %v2907_v10, %v2908_v62  ;;  %v3282_v41 = vmul.f32 %v6510_v21, %v6033_v53  ;;  %v2983_v50 = vrot.slane %v2945_v27, 2  ;;  %v6515_v62 = vld [vmem:[#allocation26_spill] sm:$0xff]  ;;  %v6143_v16 = vld [vmem:[#allocation4 + $0x168] ss:$2 sm:$0xff] }
 0x298   : > { %v3118_v4 = vadd.f32 %v6511_v57, %v3042_v37  ;;  %v3327_v9 = vmul.f32 %v6495_v11, %v6033_v53  ;;  %v3328_v12 = vmul.f32 %v6495_v11, %v6039_v18  ;;  %v3302_v25 = vmul.f32 %v6494_v58, %v6041_v34 }
 0x299   : > { %v3403_v32 = vmul.f32 %v6496_v5, %v6041_v34  ;;  %v1777_v3 = vadd.f32 %v4350_v56, %v6512_v44  ;;  %v1769_v30 = vadd.f32 %v4350_v56, %v6513_v51  ;;  %v2927_v0 = vadd.f32 %v2909_v1, %v2851_v43  ;;  %v6517_v43 = vld [vmem:[#allocation31_spill] sm:$0xff] }
 0x29a   : > { %v2985_v20 = vsel %vm2428_vm4, %v2983_v50, %v2984_v7  ;;  %v3194_v24 = vadd.f32 %v6514_v13, %v3118_v4  ;;  %v3404_v63 = vmul.f32 %v6496_v5, %v6048_v35  ;;  %v3364_v6 = vrot.slane %v3327_v9, 1  ;;  %v6149_v50 = vld [vmem:[#allocation4 + $0x178] ss:$2 sm:$0x3]  ;;  %v6519_v13 = vld [vmem:[#allocation15_spill] sm:$0xff] }
 0x29b   : > { %vm1813_vm10 = vcmp.gt.f32.partialorder %v1777_v3, 0.0  ;;  %v1845_v52 = vmul.f32 0.01, %v1777_v3  ;;  %vm1811_vm11 = vcmp.gt.f32.partialorder %v1769_v30, 0.0  ;;  %v1843_v34 = vmul.f32 0.01, %v1769_v30 }
 0x29c   : > { %v3270_v17 = vadd.f32 %v6515_v62, %v3194_v24  ;;  %v3365_v27 = vrot.slane %v3328_v12, 1  ;;  %v1780_v45 = vadd.f32 %v4350_v56, %v6516_v40  ;;  %v3480_v55 = vmul.f32 %v5960_v31, %v6039_v18  ;;  %v6518_v4 = vld [vmem:[#allocation30_spill] sm:$0xff] }
 0x29d   : > { %v1877_v10 = vsel %vm1813_vm10, %v1777_v3, %v1845_v52  ;;  %v1875_v8 = vsel %vm1811_vm11, %v1769_v30, %v1843_v34  ;;  %v1772_v7 = vadd.f32 %v4350_v56, %v6517_v43  ;;  %v3441_v37 = vrot.slane %v3404_v63, 1  ;;  %v2194_v63 = vld [vmem:[#allocation4 + $0x179] ss:$2 sm:$0x3] }
 0x29e   : > { %v3290_v35 = vadd.f32 %v3282_v41, %v3270_v17  ;;  %1911 = vst.msk [vmem:[#allocation4 + $0x19a] sm:$0xff] %vm1880_vm12, %v1877_v10  ;;  %1919 = vst.msk [vmem:[#allocation4 + $0x1b2] sm:$0xff] %vm1880_vm12, %v1877_v10  ;;  %vm1814_vm13 = vcmp.gt.f32.partialorder %v1780_v45, 0.0  ;;  %v1846_v1 = vmul.f32 0.01, %v1780_v45  ;;  %v3479_v18 = vmul.f32 %v5960_v31, %v6033_v53 }
 0x29f   : > { %1922 = vst.msk [vmem:[#allocation4 + $0x1ca] sm:$0xff] %vm1880_vm12, %v1877_v10  ;;  %1909 = vst.msk [vmem:[#allocation4 + $0x182] sm:$0xff] %vm1880_vm12, %v1875_v8  ;;  %vm1812_vm14 = vcmp.gt.f32.partialorder %v1772_v7, 0.0  ;;  %v1844_v57 = vmul.f32 0.01, %v1772_v7  ;;  %v3289_v41 = vadd.f32 %v6518_v4, %v3269_v36  ;;  %v3003_v9 = vadd.f32 %v2985_v20, %v2927_v0  ;;  %v6520_v36 = vld [vmem:[#allocation14_spill] sm:$0xff] }
 0x2a0   : > { %v3310_v12 = vadd.f32 %v3302_v25, %v3290_v35  ;;  %v3440_v56 = vrot.slane %v3403_v32, 1  ;;  %v1878_v44 = vsel %vm1814_vm13, %v1780_v45, %v1846_v1  ;;  %v3366_v3 = vsel %vm2275_vm3, %v3364_v6, %v3365_v27  ;;  %v2192_v20 = vld [vmem:[#allocation4 + $0x169] ss:$2 sm:$0xff] }
 0x2a1   : > { %v3517_v51 = vrot.slane %v3480_v55, 2  ;;  %1912 = vst.msk [vmem:[#allocation4 + $0x1a2] sm:$0xff] %vm1880_vm12, %v1878_v44  ;;  %1920 = vst.msk [vmem:[#allocation4 + $0x1ba] sm:$0xff] %vm1880_vm12, %v1878_v44  ;;  %v1876_v30 = vsel %vm1812_vm14, %v1772_v7, %v1844_v57  ;;  %v3309_v53 = vadd.f32 %v6000_v54, %v3289_v41  ;;  %v2480_v24 = vmul.f32 %v6519_v13, %v6143_v16  ;;  %v6521_v8 = vld [vmem:[#allocation16_spill] sm:$0xff] }
 0x2a2   : > { %1923 = vst.msk [vmem:[#allocation4 + $0x1d2] sm:$0xff] %vm1880_vm12, %v1878_v44  ;;  %v2528_v25 = vmul.f32 %v6520_v36, %v6149_v50  ;;  %v3015_v32 = vmul.f32 %v5162_v29, %v6143_v16  ;;  %v3386_v0 = vadd.f32 %v3366_v3, %v3310_v12  ;;  %1910 = vst.msk [vmem:[#allocation4 + $0x18a] sm:$0xff] %vm1880_vm12, %v1876_v30  ;;  %v3516_v54 = vrot.slane %v3479_v18, 2  ;;  %v6523_v30 = vld [vmem:[#allocation13_spill] sm:$0xff] }
 0x2a3   : > { %v3062_v52 = vmul.f32 %v5171_v49, %v6149_v50  ;;  %v3442_v34 = vsel %vm2275_vm3, %v3440_v56, %v3441_v37  ;;  %v3385_v62 = vadd.f32 %v6104_v15, %v3309_v53  ;;  %v3439_v17 = vsel %vm2275_vm3, %v3437_v33, %v3438_v26  ;;  %v6522_v26 = vld [vmem:[#allocation12_spill] sm:$0xff] }
 0x2a4   : > { %v2488_v6 = vadd.f32 %v2480_v24, %v6115_v60  ;;  %v3462_v27 = vadd.f32 %v3442_v34, %v3386_v0  ;;  %v3515_v40 = vsel %vm2428_vm4, %v3513_v14, %v3514_v39  ;;  %v2527_v45 = vmul.f32 %v6520_v36, %v6143_v16 }
 0x2a5   : > { %v3023_v55 = vadd.f32 %v3015_v32, %v3003_v9  ;;  %v3518_v15 = vsel %vm2428_vm4, %v3516_v54, %v3517_v51  ;;  %v1941_v28 = vld [vmem:[#allocation4 + $0x19a] sm:$0x1]  ;;  %v1942_v10 = vld [vmem:[#allocation4 + $0x1b2] sm:$0x1]  ;;  %v3461_v23 = vadd.f32 %v3439_v17, %v3385_v62  ;;  %v2500_v33 = vmul.f32 %v6521_v8, %v2192_v20 }
 0x2a6   : > { %v2604_v60 = vmul.f32 %v6522_v26, %v2194_v63  ;;  %v3061_v2 = vmul.f32 %v5171_v49, %v6143_v16  ;;  %v3538_v43 = vadd.f32 %v3518_v15, %v3462_v27  ;;  %1982 = vst.msk [vmem:[#allocation4 + $0x198] sm:$0x1] %vm1964_vm2, %v1941_v28  ;;  %1983 = vst.msk [vmem:[#allocation4 + $0x1b0] sm:$0x1] %vm1964_vm2, %v1942_v10  ;;  %v1940_v47 = vld [vmem:[#allocation4 + $0x182] sm:$0x1] }
 0x2a7   : > { %2002 = vst.msk [vmem:[#allocation4 + $0x199] sm:$0x1] %vm1964_vm2, %v1941_v28  ;;  %2003 = vst.msk [vmem:[#allocation4 + $0x1b1] sm:$0x1] %vm1964_vm2, %v1942_v10  ;;  %v2567_v39 = vrot.slane %v2528_v25, 1  ;;  %v3035_v14 = vmul.f32 %v5183_v42, %v2192_v20  ;;  %v3100_v7 = vrot.slane %v3062_v52, 1  ;;  %v3537_v35 = vadd.f32 %v3515_v40, %v3461_v23 }
 0x2a8   : > { %1981 = vst.msk [vmem:[#allocation4 + $0x180] sm:$0x1] %vm1964_vm2, %v1940_v47  ;;  %2001 = vst.msk [vmem:[#allocation4 + $0x181] sm:$0x1] %vm1964_vm2, %v1940_v47  ;;  %v3138_v37 = vmul.f32 %v5191_v22, %v2194_v63  ;;  %v2508_v1 = vadd.f32 %v2500_v33, %v2488_v6  ;;  %v1961_v18 = vld [vmem:[#allocation4 + $0x1a9] sm:$0x1]  ;;  %v2603_v41 = vmul.f32 %v6522_v26, %v2192_v20 }
 0x2a9   : > { %3568 = vst.msk [vmem:[#allocation5 + $0x61] sm:$0xff] %vm1880_vm12, %v3538_v43  ;;  %v1962_v57 = vld [vmem:[#allocation4 + $0x1c1] sm:$0x1]  ;;  %v2566_v4 = vrot.slane %v2527_v45, 1  ;;  %v3043_v9 = vadd.f32 %v3035_v14, %v3023_v55  ;;  %v1960_v12 = vld [vmem:[#allocation4 + $0x191] sm:$0x1]  ;;  %v3137_v44 = vmul.f32 %v5191_v22, %v2192_v20  ;;  %v2680_v53 = vmul.f32 %v6523_v30, %v6149_v50 }
 0x2aa   : > { %2022 = vst.msk [vmem:[#allocation4 + $0x1aa] sm:$0x1] %vm1964_vm2, %v1961_v18  ;;  %2023 = vst.msk [vmem:[#allocation4 + $0x1c2] sm:$0x1] %vm1964_vm2, %v1962_v57  ;;  %v3099_v56 = vrot.slane %v3061_v2, 1  ;;  %v2643_v51 = vrot.slane %v2604_v60, 1  ;;  %v3214_v36 = vmul.f32 %v5203_v61, %v6149_v50  ;;  %v2679_v0 = vmul.f32 %v6523_v30, %v6143_v16 }
 0x2ab   : > { %2042 = vst.msk [vmem:[#allocation4 + $0x1ab] sm:$0x1] %vm1964_vm2, %v1961_v18  ;;  %2043 = vst.msk [vmem:[#allocation4 + $0x1c3] sm:$0x1] %vm1964_vm2, %v1962_v57  ;;  %v2568_v3 = vsel %vm2275_vm3, %v2566_v4, %v2567_v39  ;;  %v3176_v24 = vrot.slane %v3138_v37, 1  ;;  %v2642_v32 = vrot.slane %v2603_v41, 1  ;;  %v3213_v52 = vmul.f32 %v5203_v61, %v6143_v16 }
 0x2ac   : > { %3567 = vst.msk [vmem:[#allocation5 + $0x51] sm:$0xff] %vm1880_vm12, %v3537_v35  ;;  %v3101_v13 = vsel %vm2275_vm3, %v3099_v56, %v3100_v7  ;;  %v2584_v25 = vadd.f32 %v2568_v3, %v2508_v1  ;;  %v3175_v63 = vrot.slane %v3137_v44, 1  ;;  %v2719_v54 = vrot.slane %v2680_v53, 2 }
 0x2ad   : > { %2021 = vst.msk [vmem:[#allocation4 + $0x192] sm:$0x1] %vm1964_vm2, %v1960_v12  ;;  %2041 = vst.msk [vmem:[#allocation4 + $0x193] sm:$0x1] %vm1964_vm2, %v1960_v12  ;;  %v3119_v20 = vadd.f32 %v3101_v13, %v3043_v9  ;;  %v2644_v34 = vsel %vm2275_vm3, %v2642_v32, %v2643_v51  ;;  %v3252_v6 = vrot.slane %v3214_v36, 2  ;;  %v2718_v40 = vrot.slane %v2679_v0, 2 }
 0x2ae   : > { %v3177_v17 = vsel %vm2275_vm3, %v3175_v63, %v3176_v24  ;;  %v2660_v27 = vadd.f32 %v2644_v34, %v2584_v25  ;;  %v3251_v45 = vrot.slane %v3213_v52, 2  ;;  %v6218_v55 = vld [vmem:[#allocation4 + $0x198] ss:$2 sm:$0xff]  ;;  %v6220_v15 = vld [vmem:[#allocation4 + $0x199] ss:$2 sm:$0xff]  ;;  %vm3781_vm2 = vcmask 458112  }
 0x2af   : > { %v2081_v62 = vld [vmem:[#allocation4 + $0x180] ss:$2 sm:$0xff]  ;;  %v3195_v50 = vadd.f32 %v3177_v17, %v3119_v20  ;;  %v2720_v10 = vsel %vm2428_vm4, %v2718_v40, %v2719_v54  ;;  %v2121_v23 = vld [vmem:[#allocation4 + $0x181] ss:$2 sm:$0xff]  ;;  %v3016_v39 = vmul.f32 %v5162_v29, %v6218_v55  ;;  %v6230_v14 = vmul.f32 %v5171_v49, %v6218_v55 }
 0x2b0   : > { %v2748_v28 = vmul.f32 %v5090_v19, %v2081_v62  ;;  %v3253_v8 = vsel %vm2428_vm4, %v3251_v45, %v3252_v6  ;;  %v2736_v60 = vadd.f32 %v2720_v10, %v2660_v27  ;;  %v2795_v43 = vmul.f32 %v5101_v48, %v2081_v62  ;;  %v6261_v17 = vld [vmem:[#allocation5 + $0x42] sm:$0xff] }
 0x2b1   : > { %v2162_v16 = vld [vmem:[#allocation4 + $0x1a8] ss:$2 sm:$0x3]  ;;  %v3271_v47 = vadd.f32 %v3253_v8, %v3195_v50  ;;  %v2768_v7 = vmul.f32 %v6507_v38, %v2121_v23  ;;  %v6238_v37 = vmul.f32 %v5191_v22, %v6220_v15  ;;  %v2871_v57 = vmul.f32 %v5068_v46, %v2121_v23 }
 0x2b2   : > { %v2198_v33 = vld [vmem:[#allocation4 + $0x1a9] ss:$2 sm:$0x3]  ;;  %v2756_v19 = vadd.f32 %v2748_v28, %v2736_v60  ;;  %v6234_v35 = vmul.f32 %v5171_v49, %v2162_v16  ;;  %v2947_v41 = vmul.f32 %v5072_v59, %v2081_v62  ;;  %v2834_v38 = vrot.slane %v2795_v43, 1 }
 0x2b3   : > { %v6241_v1 = vmul.f32 %v5191_v22, %v2198_v33  ;;  %v3283_v12 = vmul.f32 %v6510_v21, %v2081_v62  ;;  %v2910_v56 = vrot.slane %v2871_v57, 1  ;;  %v3303_v22 = vmul.f32 %v6494_v58, %v2121_v23  ;;  %v6255_v36 = vld [vmem:[#allocation5 + $0x52] sm:$0xff]  ;;  %v6267_v33 = vld [vmem:[#allocation5 + $0x40] sm:$0xff] }
 0x2b4   : > { %v2083_v26 = vld [vmem:[#allocation4 + $0x190] ss:$2 sm:$0x3]  ;;  %v2123_v2 = vld [vmem:[#allocation4 + $0x191] ss:$2 sm:$0x3]  ;;  %v2776_v29 = vadd.f32 %v2768_v7, %v2756_v19  ;;  %v3481_v34 = vmul.f32 %v5960_v31, %v2081_v62  ;;  %v3828_v45 = vpack.c.bf16 %v6255_v36, %v6261_v17  ;;  %v3216_v28 = vmul.f32 %v5203_v61, %v2162_v16 }
 0x2b5   : > { %v2796_v18 = vmul.f32 %v5101_v48, %v2083_v26  ;;  %v2872_v4 = vmul.f32 %v5068_v46, %v2123_v2  ;;  %v2948_v9 = vmul.f32 %v5072_v59, %v2083_v26  ;;  %v3329_v48 = vmul.f32 %v6495_v11, %v2081_v62  ;;  %v3657_v6 = vld [vmem:[#allocation5 + $0x50] sm:$0xff]  ;;  %v3658_v19 = vld [vmem:[#allocation5 + $0x60] sm:$0xff] }
 0x2b6   : > { %v3291_v30 = vadd.f32 %v3283_v12, %v3271_v47  ;;  %v3330_v46 = vmul.f32 %v6495_v11, %v2083_v26  ;;  %v2986_v24 = vrot.slane %v2947_v41, 2  ;;  %v3405_v59 = vmul.f32 %v6496_v5, %v2121_v23  ;;  %3837 = vrot.lane.b32.xlu0 %v3828_v45, %s4372_s13 }
 0x2b7   : > { %v2835_v49 = vrot.slane %v2796_v18, 1  ;;  %v2911_v44 = vrot.slane %v2872_v4, 1  ;;  %v2987_v51 = vrot.slane %v2948_v9, 2  ;;  %v3367_v32 = vrot.slane %v3329_v48, 1  ;;  %v2125_v48 = vld [vmem:[#allocation4 + $0x1b1] ss:$2 sm:$0xff] }
 0x2b8   : > { %v3311_v25 = vadd.f32 %v3303_v22, %v3291_v30  ;;  %v3368_v0 = vrot.slane %v3330_v46, 1  ;;  %v3406_v20 = vmul.f32 %v6496_v5, %v2123_v2  ;;  %v3482_v54 = vmul.f32 %v5960_v31, %v2083_v26 }
 0x2b9   : > { %v2836_v3 = vsel %vm2275_vm3, %v2834_v38, %v2835_v49  ;;  %v2912_v13 = vsel %vm2275_vm3, %v2910_v56, %v2911_v44  ;;  %v2988_v52 = vsel %vm2428_vm4, %v2986_v24, %v2987_v51  ;;  %v3443_v40 = vrot.slane %v3405_v59, 1  ;;  %v3770_v7 = vpop.permute.xlu0 %3769  ;;  %v2127_v38 = vld [vmem:[#allocation4 + $0x1c1] ss:$2 sm:$0x3]  ;;  %v6299_v24 = vld [vmem:[#allocation5 + $0x51] sm:$0xff] }
 0x2ba   : > { %v2852_v53 = vadd.f32 %v2836_v3, %v2776_v29  ;;  %v3369_v27 = vsel %vm2275_vm3, %v3367_v32, %v3368_v0  ;;  %v3444_v50 = vrot.slane %v3406_v20, 1  ;;  %v3520_v8 = vrot.slane %v3482_v54, 2  ;;  %3782 = vst.msk [vmem:[#allocation6] sm:$0xff] %vm3781_vm2, %v3770_v7  ;;  %v3606_v4 = vpop.permute.xlu1 %3605  ;;  %3640 = vrot.lane.b32.xlu0 %v3828_v45, %s4360_s27  ;;  %v3691_v3 = vld [vmem:[#allocation5 + $0x61] sm:$0xff] }
 0x2bb   : > { %v3387_v23 = vadd.f32 %v3369_v27, %v3311_v25  ;;  %v3103_v62 = vrot.slane %v6234_v35, 1  ;;  %v3519_v60 = vrot.slane %v3481_v34, 2  ;;  %v6273_v2 = vpack.c.bf16 %v3657_v6, %v6267_v33  ;;  %3617 = vst.msk [vmem:[#allocation6 + $0x8] sm:$0xff] %vm3615_vm5, %v3606_v4  ;;  %v4343_v4 = vld [vmem:[%s6409_s4] sm:$0xff]  }
 0x2bc   : > { %v2928_v63 = vadd.f32 %v2912_v13, %v2852_v53  ;;  %v3445_v26 = vsel %vm2275_vm3, %v3443_v40, %v3444_v50  ;;  %v3036_v43 = vmul.f32 %v5183_v42, %v6220_v15  ;;  %v3102_v18 = vrot.slane %v6230_v14, 1  ;;  %v2087_v42 = vld [vmem:[#allocation4 + $0x1c0] ss:$2 sm:$0x3]  ;;  %4292 = vmatprep.subr.bf16.mxu1 %v4343_v4 }
 0x2bd   : > { %v3463_v16 = vadd.f32 %v3445_v26, %v3387_v23  ;;  %v3179_v29 = vrot.slane %v6241_v1, 1  ;;  %v3215_v35 = vmul.f32 %v5203_v61, %v6218_v55  ;;  %v3521_v57 = vsel %vm2428_vm4, %v3519_v60, %v3520_v8  ;;  %3585 = vst.msk [vmem:[#allocation6 + $0x10] sm:$0xff] %vm1880_vm12, %v6273_v2  ;;  %v2085_v55 = vld [vmem:[#allocation4 + $0x1b0] ss:$2 sm:$0xff]  ;;  %v3803_v9 = vpop.permute.xlu0 %3802  ;;  %4293 = vmatpush3.bf16.msra.mxu1 %v4343_v4 }
 0x2be   : > { %v3004_v10 = vadd.f32 %v2988_v52, %v2928_v63  ;;  %v3104_v14 = vsel %vm2275_vm3, %v3102_v18, %v3103_v62  ;;  %v3178_v1 = vrot.slane %v6238_v37, 1  ;;  %v3255_v41 = vrot.slane %v3216_v28, 2  ;;  %3815 = vst.msk [vmem:[#allocation6] sm:$0xff] %vm3814_vm15, %v3803_v9  ;;  %v3639_v22 = vpop.permute.xlu1 %3638  ;;  %v3724_v63 = vld [vmem:[#allocation5 + $0x62] sm:$0xff] }
 0x2bf   : > { %v3663_v61 = vpack.c.bf16 %v3658_v19, %v3657_v6  ;;  %v3254_v56 = vrot.slane %v3215_v35, 2  ;;  %v3332_v44 = vmul.f32 %v6495_v11, %v2087_v42  ;;  %3650 = vst.msk [vmem:[#allocation6 + $0x8] sm:$0xff] %vm3648_vm6, %v3639_v22  ;;  %v3331_v30 = vmul.f32 %v6495_v11, %v2085_v55 }
 0x2c0   : > { %v3024_v47 = vadd.f32 %v3016_v39, %v3004_v10  ;;  %v3539_v39 = vadd.f32 %v3521_v57, %v3463_v16  ;;  %v3180_v12 = vsel %vm2275_vm3, %v3178_v1, %v3179_v29  ;;  %v3408_v46 = vmul.f32 %v6496_v5, %v2127_v38  ;;  %v3760_v57 = vld [vmem:[#allocation5 + $0x90] sm:$0xff]  ;;  %v3689_v1 = vld [vmem:[#allocation5 + $0x41] sm:$0xff] }
 0x2c1   : > { %v3256_v51 = vsel %vm2428_vm4, %v3254_v56, %v3255_v41  ;;  %3673 = vrot.lane.b32.xlu0 %v3663_v61, %s4366_s9  ;;  %v3284_v53 = vmul.f32 %v6510_v21, %v2085_v55  ;;  %v3836_v59 = vpop.permute.xlu0 %3835  ;;  %v3371_v25 = vrot.slane %v3332_v44, 1  ;;  %v3407_v32 = vmul.f32 %v6496_v5, %v2125_v48  ;;  %v4345_v41 = vld [vmem:[%s6409_s4 + $0x10] sm:$0xff]   ;;  %v3688_v61 = vld [vmem:[#allocation5 + $0x31] sm:$0xff]  ;;  %v4346_v38 = vld [vmem:[%s6409_s4 + $0x18] sm:$0xff]  }
 0x2c2   : > { %v3044_v15 = vadd.f32 %v3036_v43, %v3024_v47  ;;  %3569 = vst.msk [vmem:[#allocation5 + $0x71] sm:$0xff] %vm1880_vm12, %v3539_v39  ;;  %v3484_v0 = vmul.f32 %v5960_v31, %v2087_v42  ;;  %v3696_v20 = vpack.c.bf16 %v3691_v3, %v6299_v24  ;;  %v3304_v11 = vmul.f32 %v6494_v58, %v2125_v48  ;;  %v4351_v39 = vld [vmem:[#allocation5 + $0x30] sm:$0xff] }
 0x2c3   : > { %3848 = vst.msk [vmem:[#allocation6] sm:$0xff] %vm3847_vm0, %v3836_v59  ;;  %v3370_v34 = vrot.slane %v3331_v30, 1  ;;  %v3447_v54 = vrot.slane %v3408_v46, 1  ;;  %v3483_v21 = vmul.f32 %v5960_v31, %v2085_v55  ;;  %v3446_v50 = vrot.slane %v3407_v32, 1  ;;  %v3826_v44 = vld [vmem:[#allocation5 + $0x92] sm:$0xff] }
 0x2c4   : > { %v3120_v49 = vadd.f32 %v3104_v14, %v3044_v15  ;;  %v3523_v45 = vrot.slane %v3484_v0, 2  ;;  %v3729_v28 = vpack.c.bf16 %v3724_v63, %v6255_v36  ;;  %v4344_v15 = vld [vmem:[%s6409_s4 + $0x8] sm:$0xff]   ;;  %v3662_v14 = vpack.c.bf16 %v6267_v33, %v4351_v39 }
 0x2c5   : > { %3706 = vrot.lane.b32.xlu0 %v3696_v20, %s4367_s14  ;;  %v3372_v5 = vsel %vm2275_vm3, %v3370_v34, %v3371_v25  ;;  %v3448_v58 = vsel %vm2275_vm3, %v3446_v50, %v3447_v54  ;;  %v3522_v23 = vrot.slane %v3483_v21, 2  ;;  %4294 = vmatprep.subr.bf16.mxu1 %v4344_v15  ;;  %v3695_v55 = vpack.c.bf16 %v3689_v1, %v3688_v61 }
 0x2c6   : > { %v3196_v37 = vadd.f32 %v3180_v12, %v3120_v49  ;;  %4295 = vmatpush3.bf16.msra.mxu1 %v4344_v15  ;;  %v3721_v49 = vld [vmem:[#allocation5 + $0x32] sm:$0xff]  ;;  %v3795_v9 = vpack.c.bf16 %v6299_v24, %v3689_v1  ;;  %v4347_v12 = vld [vmem:[%s6409_s4 + $0x20] ss:$0 sps:$4 sm:$0xff]   ;;  %vm3912_vm3 = vcmask 1043456  }
 0x2c7   : > { %v3524_v62 = vsel %vm2428_vm4, %v3522_v23, %v3523_v45  ;;  %4296 = vmatprep.subr.bf16.mxu1 %v4345_v41  ;;  %v3728_v33 = vpack.c.bf16 %v6261_v17, %v3721_v49  ;;  %v3914_v56 = vsel %vm3912_vm3, %v4347_v12, 0  ;;  %v3793_v17 = vld [vmem:[#allocation5 + $0x91] sm:$0xff]  ;;  %v4133_v45 = vld [vmem:[%s6410_s5] ss:$0 sm:$0xff] }
 0x2c8   : > { %v3272_v13 = vadd.f32 %v3256_v51, %v3196_v37 }
 0x2c9   : > { %v3758_v6 = vld [vmem:[#allocation5 + $0x70] sm:$0xff]  ;;  %3739 = vrot.lane.b32.xlu0 %v3729_v28, %s4369_s10 }
 0x2ca   : > { %v3292_v52 = vadd.f32 %v3284_v53, %v3272_v13  ;;  %v3763_v27 = vpack.c.bf16 %v3758_v6, %v3658_v19  ;;  %v3852_v8 = vld [vmem:[#allocation6] sm:$0xff]  ;;  %v3791_v60 = vld [vmem:[#allocation5 + $0x71] sm:$0xff]  ;;  %4297 = vmatpush3.bf16.msra.mxu1 %v4345_v41 }
 0x2cb   : > { %4302 = vmatprep.mubr.msk.bf16.mxu1 %vm3899_vm1, %v3852_v8  ;;  %v3796_v36 = vpack.c.bf16 %v3791_v60, %v3691_v3  ;;  %v3824_v43 = vld [vmem:[#allocation5 + $0x72] sm:$0xff]  ;;  %4298 = vmatprep.subr.bf16.mxu1 %v4346_v38 }
 0x2cc   : > { %v3312_v40 = vadd.f32 %v3304_v11, %v3292_v52  ;;  %3586 = vst.msk [vmem:[#allocation6 + $0x18] sm:$0xff] %vm1880_vm12, %v3763_v27  ;;  %v3829_v47 = vpack.c.bf16 %v3824_v43, %v3724_v63 }
 0x2cd   : > { %3773 = vrot.lane.b32.xlu0 %v3763_v27, %s4370_s11 }
 0x2ce   : > { %v3388_v10 = vadd.f32 %v3372_v5, %v3312_v40  ;;  %4299 = vmatpush3.bf16.msra.mxu1 %v4346_v38 }
 0x2cf   : > { %4318 = vmatprep.subr.msk.bf16.mxu1 %vm3912_vm3, %v4347_v12 }
 0x2d0   : > { %v3464_v31 = vadd.f32 %v3448_v58, %v3388_v10 }
 0x2d1   : > { %3806 = vrot.lane.b32.xlu0 %v3796_v36, %s4371_s12 }
 0x2d2   : > { %v3540_v26 = vadd.f32 %v3524_v62, %v3464_v31  ;;  %4301 = vmatpush3.bf16.msra.mxu1 %v3914_v56 }
 0x2d4   : > { %3570 = vst.msk [vmem:[#allocation5 + $0x81] sm:$0xff] %vm1880_vm12, %v3540_v26 }
 0x2d5   : > { %3839 = vrot.lane.b32.xlu0 %v3829_v47, %s4372_s13 }
 0x2db   : > { %v3660_v16 = vld [vmem:[#allocation5 + $0x80] sm:$0xff] }
 0x2dc   : > { %v3664_v19 = vpack.c.bf16 %v3660_v16, %v3758_v6  ;;  %v3693_v7 = vld [vmem:[#allocation5 + $0x81] sm:$0xff]  ;;  %v3764_v42 = vpack.c.bf16 %v3760_v57, %v3660_v16 }
 0x2dd   : > { %v3697_v18 = vpack.c.bf16 %v3693_v7, %v3791_v60  ;;  %v3726_v29 = vld [vmem:[#allocation5 + $0x82] sm:$0xff] }
 0x2de   : > { %3675 = vrot.lane.b32.xlu1 %v3664_v19, %s4366_s9  ;;  %v3730_v35 = vpack.c.bf16 %v3726_v29, %v3824_v43  ;;  %v3830_v22 = vpack.c.bf16 %v3826_v44, %v3726_v29 }
 0x2e2   : > { %3708 = vrot.lane.b32.xlu1 %v3697_v18, %s4367_s14 }
 0x2e6   : > { %3741 = vrot.lane.b32.xlu1 %v3730_v35, %s4369_s10 }
 0x2ea   : > { %3775 = vrot.lane.b32.xlu1 %v3764_v42, %s4370_s11 }
 0x2ee   : > { %3671 = vrot.lane.b32.xlu1 %v3662_v14, %s4366_s9 }
 0x2f2   : > { %3704 = vrot.lane.b32.xlu1 %v3695_v55, %s4367_s14  ;;  %s4146_s14 = sshll.u32 %s6525_s22, 6 }
 0x2f6   : > { %3737 = vrot.lane.b32.xlu1 %v3728_v33, %s4369_s10 }
 0x2fa   : > { %3771 = vrot.lane.b32.xlu1 %v6273_v2, %s4370_s11  ;;  %v3797_v2 = vpack.c.bf16 %v3793_v17, %v3693_v7  ;;  %s6384_s11 = scalar_lea.vmem %s6411_s6, %s4146_s14 }
 0x2fe   : > { %3804 = vrot.lane.b32.xlu1 %v3795_v9, %s4371_s12 }
 0x302   : > { %3607 = vrot.lane.b32.xlu1 %v3795_v9, %s4363_s30 }
 0x306   : > { %3609 = vrot.lane.b32.xlu1 %v3796_v36, %s4363_s30 }
 0x30a   : > { %3642 = vrot.lane.b32.xlu1 %v3829_v47, %s4360_s27 }
 0x30e   : > { %3808 = vrot.lane.b32.xlu1 %v3797_v2, %s4371_s12 }
 0x312   : > { %3841 = vrot.lane.b32.xlu1 %v3830_v22, %s4372_s13 }
 0x328   : > { %v3838_v37 = vpop.permute.xlu0 %3837 }
 0x32c   : > { %v3641_v30 = vpop.permute.xlu0 %3640 }
 0x333   : > { %v3674_v53 = vpop.permute.xlu0 %3673 }
 0x337   : > { %v3707_v24 = vpop.permute.xlu0 %3706 }
 0x33b   : > { %v3740_v32 = vpop.permute.xlu0 %3739 }
 0x33f   : > { %v3774_v20 = vpop.permute.xlu0 %3773 }
 0x343   : > { %v3807_v52 = vpop.permute.xlu0 %3806 }
 0x347   : > { %v3840_v21 = vpop.permute.xlu0 %3839 }
 0x350   : > { %v3676_v48 = vpop.permute.xlu1 %3675 }
 0x354   : > { %v3709_v3 = vpop.permute.xlu1 %3708 }
 0x358   : > { %v3742_v51 = vpop.permute.xlu1 %3741 }
 0x35c   : > { %v3776_v46 = vpop.permute.xlu1 %3775 }
 0x360   : > { %v3672_v13 = vpop.permute.xlu1 %3671 }
 0x361   : > { %3683 = vst.msk [vmem:[#allocation6 + $0x8] sm:$0xff] %vm3681_vm7, %v3672_v13 }
 0x364   : > { %v3705_v59 = vpop.permute.xlu1 %3704 }
 0x365   : > { %3716 = vst.msk [vmem:[#allocation6 + $0x8] sm:$0xff] %vm3714_vm8, %v3705_v59 }
 0x368   : > { %v3738_v25 = vpop.permute.xlu1 %3737 }
 0x369   : > { %3749 = vst.msk [vmem:[#allocation6 + $0x8] sm:$0xff] %vm3747_vm9, %v3738_v25 }
 0x36c   : > { %v3772_v0 = vpop.permute.xlu1 %3771 }
 0x36d   : > { %3783 = vst.msk [vmem:[#allocation6 + $0x8] sm:$0xff] %vm3781_vm2, %v3772_v0 }
 0x370   : > { %v3805_v11 = vpop.permute.xlu1 %3804 }
 0x371   : > { %3816 = vst.msk [vmem:[#allocation6 + $0x8] sm:$0xff] %vm3814_vm15, %v3805_v11 }
 0x372   : > { %3849 = vst.msk [vmem:[#allocation6 + $0x8] sm:$0xff] %vm3847_vm0, %v3838_v37 }
 0x374   : > { %v3608_v63 = vpop.permute.xlu1 %3607 }
 0x375   : > { %3618 = vst.msk [vmem:[#allocation6 + $0x10] sm:$0xff] %vm3615_vm5, %v3608_v63 }
 0x376   : > { %3651 = vst.msk [vmem:[#allocation6 + $0x10] sm:$0xff] %vm3648_vm6, %v3641_v30 }
 0x377   : > { %3684 = vst.msk [vmem:[#allocation6 + $0x10] sm:$0xff] %vm3681_vm7, %v3674_v53 }
 0x378   : > { %3717 = vst.msk [vmem:[#allocation6 + $0x10] sm:$0xff] %vm3714_vm8, %v3707_v24  ;;  %v3610_v34 = vpop.permute.xlu1 %3609 }
 0x379   : > { %3750 = vst.msk [vmem:[#allocation6 + $0x10] sm:$0xff] %vm3747_vm9, %v3740_v32  ;;  %v3853_v54 = vld [vmem:[#allocation6 + $0x8] sm:$0xff] }
 0x37a   : > { %3619 = vst.msk [vmem:[#allocation6 + $0x18] sm:$0xff] %vm3615_vm5, %v3610_v34  ;;  %4303 = vmatmul.mubr.msk.bf16.vlgmr.msra.gmra.mrb[12].mxu1 %vm3899_vm1, %v3853_v54 }
 0x37b   : > { %3784 = vst.msk [vmem:[#allocation6 + $0x10] sm:$0xff] %vm3781_vm2, %v3774_v20 }
 0x37c   : > { %3817 = vst.msk [vmem:[#allocation6 + $0x10] sm:$0xff] %vm3814_vm15, %v3807_v52  ;;  %v3643_v6 = vpop.permute.xlu1 %3642 }
 0x37d   : > { %3850 = vst.msk [vmem:[#allocation6 + $0x10] sm:$0xff] %vm3847_vm0, %v3840_v21 }
 0x37e   : > { %3652 = vst.msk [vmem:[#allocation6 + $0x18] sm:$0xff] %vm3648_vm6, %v3643_v6 }
 0x37f   : > { %3685 = vst.msk [vmem:[#allocation6 + $0x18] sm:$0xff] %vm3681_vm7, %v3676_v48 }
 0x380   : > { %3718 = vst.msk [vmem:[#allocation6 + $0x18] sm:$0xff] %vm3714_vm8, %v3709_v3  ;;  %v3809_v27 = vpop.permute.xlu1 %3808 }
 0x381   : > { %3751 = vst.msk [vmem:[#allocation6 + $0x18] sm:$0xff] %vm3747_vm9, %v3742_v51 }
 0x382   : > { %3785 = vst.msk [vmem:[#allocation6 + $0x18] sm:$0xff] %vm3781_vm2, %v3776_v46 }
 0x383   : > { %3818 = vst.msk [vmem:[#allocation6 + $0x18] sm:$0xff] %vm3814_vm15, %v3809_v27 }
 0x384   : > { %v3854_v40 = vld [vmem:[#allocation6 + $0x10] sm:$0xff]  ;;  %v3842_v5 = vpop.permute.xlu1 %3841 }
 0x385   : > { %4306 = vmatprep.mubr.msk.bf16.mxu1 %vm3899_vm1, %v3854_v40  ;;  %3851 = vst.msk [vmem:[#allocation6 + $0x18] sm:$0xff] %vm3847_vm0, %v3842_v5 }
 0x38c   : > { %v3855_v50 = vld [vmem:[#allocation6 + $0x18] sm:$0xff] }
 0x38d   : > { %4307 = vmatmul.mubr.msk.bf16.gmra.mrb[16].mxu1 %vm3899_vm1, %v3855_v50 }
 0x44d   : > { %v4304_v28 = vpop.f32.mrb[12].mxu1 }
 0x44e   : > { %v3959_v10 = vadd.f32 %v4304_v28, %v4133_v45  ;;  %v3950_v58 = vpop.f32.mrb[13].mxu1 }
 0x44f   : > { %v3951_v23 = vadd.f32 %v4133_v45, %v3950_v58  ;;  %v4305_v31 = vpop.f32.mrb[14].mxu1 }
 0x450   : > { %vm3983_vm4 = vcmp.gt.f32.partialorder %v3959_v10, 0.0  ;;  %v3991_v8 = vmul.f32 0.01, %v3959_v10  ;;  %v3962_v62 = vadd.f32 %v4305_v31, %v4133_v45  ;;  %v3953_v26 = vpop.f32.mrb[15].mxu1 }
 0x451   : > { %vm3981_vm5 = vcmp.gt.f32.partialorder %v3951_v23, 0.0  ;;  %v3989_v60 = vmul.f32 0.01, %v3951_v23  ;;  %v3954_v36 = vadd.f32 %v4133_v45, %v3953_v26 }
 0x452   : > { %v3999_v43 = vsel %vm3983_vm4, %v3959_v10, %v3991_v8  ;;  %vm3984_vm6 = vcmp.gt.f32.partialorder %v3962_v62, 0.0  ;;  %v3992_v47 = vmul.f32 0.01, %v3962_v62 }
 0x453   : > { %4007 = vst.msk [vmem:[%s6384_s11 + $0x10] sm:$0xff] %vm1880_vm12, %v3999_v43  ;;  %v3997_v16 = vsel %vm3981_vm5, %v3951_v23, %v3989_v60  ;;  %vm3982_vm7 = vcmp.gt.f32.partialorder %v3954_v36, 0.0  ;;  %v3990_v19 = vmul.f32 0.01, %v3954_v36 }
 0x454   : > { %4005 = vst.msk [vmem:[%s6384_s11] sm:$0xff] %vm1880_vm12, %v3997_v16  ;;  %v4000_v7 = vsel %vm3984_vm6, %v3962_v62, %v3992_v47 }
 0x455   : > { %4008 = vst.msk [vmem:[%s6384_s11 + $0x18] sm:$0xff] %vm1880_vm12, %v4000_v7  ;;  %v3998_v18 = vsel %vm3982_vm7, %v3954_v36, %v3990_v19 }
 0x456   : > { %4006 = vst.msk [vmem:[%s6384_s11 + $0x8] sm:$0xff] %vm1880_vm12, %v3998_v18 }
 0x460   : > { %v4308_v29 = vpop.f32.mrb[16].mxu1 }
 0x461   : > { %v3975_v35 = vadd.f32 %v4308_v29, %v4133_v45  ;;  %v3966_v57 = vpop.f32.mrb[17].mxu1 }
 0x462   : > { %v3967_v4 = vadd.f32 %v4133_v45, %v3966_v57  ;;  %v4309_v42 = vpop.f32.mrb[18].mxu1 }
 0x463   : > { %vm3987_vm8 = vcmp.gt.f32.partialorder %v3975_v35, 0.0  ;;  %v3995_v15 = vmul.f32 0.01, %v3975_v35  ;;  %v3978_v39 = vadd.f32 %v4309_v42, %v4133_v45  ;;  %v3969_v14 = vpop.f32.mrb[19].mxu1 }
 0x464   : > { %vm3985_vm9 = vcmp.gt.f32.partialorder %v3967_v4, 0.0  ;;  %v3993_v1 = vmul.f32 0.01, %v3967_v4  ;;  %v3970_v41 = vadd.f32 %v4133_v45, %v3969_v14 }
 0x465   : > { %v4003_v61 = vsel %vm3987_vm8, %v3975_v35, %v3995_v15  ;;  %vm3988_vm10 = vcmp.gt.f32.partialorder %v3978_v39, 0.0  ;;  %v3996_v55 = vmul.f32 0.01, %v3978_v39 }
 0x466   : > { %4011 = vst.msk [vmem:[%s6384_s11 + $0x30] sm:$0xff] %vm1880_vm12, %v4003_v61  ;;  %v4001_v38 = vsel %vm3985_vm9, %v3967_v4, %v3993_v1  ;;  %vm3986_vm11 = vcmp.gt.f32.partialorder %v3970_v41, 0.0  ;;  %v3994_v49 = vmul.f32 0.01, %v3970_v41 }
 0x467   : > { %4009 = vst.msk [vmem:[%s6384_s11 + $0x20] sm:$0xff] %vm1880_vm12, %v4001_v38  ;;  %v4004_v33 = vsel %vm3988_vm10, %v3978_v39, %v3996_v55 }
 0x468   : > { %4012 = vst.msk [vmem:[%s6384_s11 + $0x38] sm:$0xff] %vm1880_vm12, %v4004_v33  ;;  %v4002_v9 = vsel %vm3986_vm11, %v3970_v41, %v3994_v49 }
 0x469   : > { %4010 = vst.msk [vmem:[%s6384_s11 + $0x28] sm:$0xff] %vm1880_vm12, %v4002_v9 }
 0x46a PF: > { %s16_s21 = sadd.s32 1, %s4358_s21  }
 0x46b   : > { %p13_p4 = scmp.ge.s32.totalorder %s16_s21, 4  }
 0x46d   :  { %15 = sbr.rel (!%p13_p4) target bundleno = 1 (0x1), region = 157 }

</bundles_post_ra>
